<compile_context>
chip_gen: v7x
topology: tpu7x:2x2x1
jax: 0.10.0
libtpu: 0.0.40
codegen_flags: <defaults>
</compile_context>

<pallas_src>
import functools

import jax
import jax.numpy as jnp
from jax.experimental import pallas as pl
from jax.experimental.pallas import tpu as pltpu


LANE = 128  # TPU vreg lane width; channel-pad target.


def _round_up(x, m):
    return (x + m - 1) // m * m


def _basic_block_kernel(x_ref, w1_ref, w2_ref, s1_ref, b1_ref, s2_ref, b2_ref,
                        out_ref, xpad_ref, hpad_ref, col_ref, res_ref,
                        *, H, W, Cin, Cpad):
    """One image per grid step: both 3x3 convs, folded-BN affines, shortcut, ReLUs."""
    cdt = col_ref.dtype  # matmul compute dtype (bf16 by default)

    # --- scratch (re)initialization --------------------------------------------
    # VMEM scratch is NOT zero-initialized and the batch axis may be split across
    # TensorCores under "parallel" semantics, so anything read-but-not-written this
    # step must be zeroed here.  Only columns 0..W+1 of the width-padded halo
    # buffers are ever read by the nine shifted views, so the width-pad columns
    # (W+2 .. Wp-1) are never zeroed.
    zrow = jnp.zeros((1, W + 2, Cpad), cdt)
    zcol = jnp.zeros((H, 1, Cpad), cdt)

    # hpad: interior is fully overwritten by h below -> zero only the 1-px border.
    hpad_ref[0:1, 0:W + 2, :] = zrow
    hpad_ref[H + 1:H + 2, 0:W + 2, :] = zrow
    hpad_ref[1:H + 1, 0:1, :] = zcol
    hpad_ref[1:H + 1, W + 1:W + 2, :] = zcol

    # xpad: border AND the interior channel-pad slab [.., Cin:Cpad] must be zero.
    if Cin < Cpad:
        # With Cin << Cpad the pad slab is ~the whole read window; one rectangular
        # store is cheaper/simpler than border strips + a lane-offset slab store.
        xpad_ref[0:H + 2, 0:W + 2, :] = jnp.zeros((H + 2, W + 2, Cpad), cdt)
    else:
        xpad_ref[0:1, 0:W + 2, :] = zrow
        xpad_ref[H + 1:H + 2, 0:W + 2, :] = zrow
        xpad_ref[1:H + 1, 0:1, :] = zcol
        xpad_ref[1:H + 1, W + 1:W + 2, :] = zcol

    x = x_ref[0]                                          # (H, W, Cin) f32
    xpad_ref[1:H + 1, 1:W + 1, 0:Cin] = x.astype(cdt)     # cast ONCE to compute dtype
    res_ref[:, :, 0:Cin] = x                              # aligned f32 residual copy
    # res_ref[:, :, Cin:] is intentionally left untouched: those output channels are
    # lane padding and are sliced off in the wrapper, so their values never matter.

    def conv3x3(src_ref, w_ref):
        # im2col: pack the 9 shifted (H*W, Cpad) views lane-dense into
        # col_ref (H*W, 9*Cpad) -- lane-aligned stores, no per-tap casts -- then hit
        # the MXU once with K = 9*Cpad.
        for idx in range(9):
            dh, dw = idx // 3, idx % 3
            col_ref[:, idx * Cpad:(idx + 1) * Cpad] = (
                src_ref[dh:dh + H, dw:dw + W, :].reshape(H * W, Cpad))
        return jnp.dot(col_ref[...], w_ref[...],
                       preferred_element_type=jnp.float32)

    # conv1 -> bn1 -> relu; intermediate stays resident in VMEM (never hits HBM).
    h = jnp.maximum(conv3x3(xpad_ref, w1_ref) * s1_ref[...] + b1_ref[...], 0.0)
    hpad_ref[1:H + 1, 1:W + 1, :] = h.astype(cdt).reshape(H, W, Cpad)

    # conv2 -> bn2 -> + identity shortcut (exact f32) -> relu.
    out = conv3x3(hpad_ref, w2_ref) * s2_ref[...] + b2_ref[...]
    out = out + res_ref[...].reshape(H * W, Cpad)
    out_ref[0] = jnp.maximum(out, 0.0)


def _basic_block_call(x_nhwc, p):
    """x_nhwc: (N, H, W, Cin) f32.  Returns (N, H*W, Cpad) f32 (lane-dense output)."""
    N, H, W, Cin = x_nhwc.shape
    Cpad = p["cpad"]
    cdt = p["w1"].dtype
    Wp = _round_up(W + 2, 8)          # regular sublane tiling for the halo buffers

    kern = functools.partial(_basic_block_kernel, H=H, W=W, Cin=Cin, Cpad=Cpad)

    grid_spec = pltpu.PrefetchScalarGridSpec(
        num_scalar_prefetch=0,
        grid=(N,),
        in_specs=[
            pl.BlockSpec((1, H, W, Cin), lambda n: (n, 0, 0, 0)),     # x
            pl.BlockSpec((9 * Cpad, Cpad), lambda n: (0, 0)),         # w1 (im2col layout)
            pl.BlockSpec((9 * Cpad, Cpad), lambda n: (0, 0)),         # w2
            pl.BlockSpec((1, Cpad), lambda n: (0, 0)),                # bn1 scale
            pl.BlockSpec((1, Cpad), lambda n: (0, 0)),                # bn1 bias
            pl.BlockSpec((1, Cpad), lambda n: (0, 0)),                # bn2 scale
            pl.BlockSpec((1, Cpad), lambda n: (0, 0)),                # bn2 bias
        ],
        out_specs=pl.BlockSpec((1, H * W, Cpad), lambda n: (n, 0, 0)),
        scratch_shapes=[
            pltpu.VMEM((H + 2, Wp, Cpad), cdt),          # padded x halo (compute dtype)
            pltpu.VMEM((H + 2, Wp, Cpad), cdt),          # padded h halo (compute dtype)
            pltpu.VMEM((H * W, 9 * Cpad), cdt),          # im2col, reused by both convs
            pltpu.VMEM((H, W, Cpad), jnp.float32),       # aligned f32 residual copy of x
        ],
    )
    # Working set is ~2.5 MB at these shapes, far below the scoped-VMEM defaults on
    # v5e/v6e/v7x, so vmem_limit_bytes stays at its default.
    return pl.pallas_call(
        kern,
        out_shape=jax.ShapeDtypeStruct((N, H * W, Cpad), jnp.float32),
        grid_spec=grid_spec,
        compiler_params=pltpu.CompilerParams(
            dimension_semantics=("parallel",)),   # batch axis feeds both TCs on v7x
    )(x_nhwc, p["w1"], p["w2"], p["s1"], p["b1"], p["s2"], p["b2"])


def prepare_block_params(params, *, stride=1, compute_dtype=jnp.bfloat16, eps=1e-5):
    """Fold BN running stats into per-channel affines and pad/reshape conv weights
    to the kernel's lane-dense (9*Cpad, Cpad) im2col layout — done once, outside
    the per-call path."""
    assert stride == 1, "TODO(synk): stride>1 shortcut path not implemented"
    cout1, cin1 = params["w1"].shape[:2]       # torch OIHW
    cout2, cin2 = params["w2"].shape[:2]
    Cpad = _round_up(max(cin1, cout1, cin2, cout2), LANE)

    def pack_w(w, cin, cout):
        wt = jnp.transpose(w, (2, 3, 1, 0)).astype(jnp.float32)          # (3,3,cin,cout)
        wp = jnp.zeros((3, 3, Cpad, Cpad), jnp.float32).at[:, :, :cin, :cout].set(wt)
        return wp.reshape(9 * Cpad, Cpad).astype(compute_dtype)

    def fold_bn(gamma, beta, mean, var, cout):
        s = (gamma / jnp.sqrt(var + eps)).astype(jnp.float32)
        b = (beta - mean * s).astype(jnp.float32)
        pad = (0, Cpad - cout)
        return jnp.pad(s, pad).reshape(1, Cpad), jnp.pad(b, pad).reshape(1, Cpad)

    s1, b1 = fold_bn(*params["bn1"], cout1)
    s2, b2 = fold_bn(*params["bn2"], cout2)
    return {
        "w1": pack_w(params["w1"], cin1, cout1),
        "w2": pack_w(params["w2"], cin2, cout2),
        "s1": s1, "b1": b1, "s2": s2, "b2": b2,
        "cout": cout2, "cpad": Cpad,
    }


def basic_block_enc(x_nchw, prepared):
    """NCHW in/out wrapper.  For a stack of blocks, keep activations NHWC and
    transpose only at the model boundary (this demo has a single block)."""
    N, C, H, W = x_nchw.shape
    x = jnp.transpose(x_nchw, (0, 2, 3, 1)).astype(jnp.float32)          # NCHW -> NHWC
    out = _basic_block_call(x, prepared)                                 # (N, H*W, Cpad)
    out = out.reshape(N, H, W, prepared["cpad"])[:, :, :, :prepared["cout"]]
    return jnp.transpose(out, (0, 3, 1, 2))                              # NHWC -> NCHW


# ----------------------------- reference (pure JAX) -----------------------------
def _ref_forward(x, params, eps=1e-5):
    def conv(x, w):
        return jax.lax.conv_general_dilated(
            x, w, window_strides=(1, 1), padding=((1, 1), (1, 1)),
            dimension_numbers=("NCHW", "OIHW", "NCHW"))

    def bn(x, gamma, beta, mean, var):
        r = lambda v: v.reshape(1, -1, 1, 1)
        return (x - r(mean)) / jnp.sqrt(r(var) + eps) * r(gamma) + r(beta)

    out = jax.nn.relu(bn(conv(x, params["w1"]), *params["bn1"]))
    out = bn(conv(out, params["w2"]), *params["bn2"])
    out = out + x                                                        # identity shortcut
    return jax.nn.relu(out)


if __name__ == "__main__":
    N, C, H, W = 2, 4, 16, 16         # in_planes=4, stride=1 -> planes=4
    planes = C

    key = jax.random.PRNGKey(0)
    keys = jax.random.split(key, 11)
    params = {
        "w1": jax.random.normal(keys[0], (planes, C, 3, 3), jnp.float32) * 0.1,
        "w2": jax.random.normal(keys[1], (planes, planes, 3, 3), jnp.float32) * 0.1,
        "bn1": (1.0 + 0.1 * jax.random.normal(keys[2], (planes,), jnp.float32),   # gamma
                0.1 * jax.random.normal(keys[3], (planes,), jnp.float32),         # beta
                0.1 * jax.random.normal(keys[4], (planes,), jnp.float32),         # running_mean
                jax.random.uniform(keys[5], (planes,), jnp.float32, 0.5, 1.5)),   # running_var
        "bn2": (1.0 + 0.1 * jax.random.normal(keys[6], (planes,), jnp.float32),
                0.1 * jax.random.normal(keys[7], (planes,), jnp.float32),
                0.1 * jax.random.normal(keys[8], (planes,), jnp.float32),
                jax.random.uniform(keys[9], (planes,), jnp.float32, 0.5, 1.5)),
    }
    x = jax.random.normal(keys[10], (N, C, H, W), jnp.float32)

    ref = jax.block_until_ready(_ref_forward(x, params))

    # f32 compute path: tolerance covers MXU multi-pass f32 matmul vs XLA's conv
    # algorithm under default TPU matmul precision (both ~1e-3-level), well below
    # any structural-bug signal.
    prep_f32 = prepare_block_params(params, compute_dtype=jnp.float32)
    out_f32 = jax.block_until_ready(basic_block_enc(x, prep_f32))
    assert out_f32.shape == ref.shape == (N, planes, H, W)
    assert jnp.allclose(out_f32, ref, atol=2e-2, rtol=2e-2), (
        f"f32 max abs err = {float(jnp.max(jnp.abs(out_f32 - ref)))}")

    # bf16 MXU path (default perf config): looser tolerance reflects bf16 matmul
    # inputs; accumulation and the residual add are still f32.
    prep_bf16 = prepare_block_params(params)
    out_bf16 = jax.block_until_ready(basic_block_enc(x, prep_bf16))
    assert jnp.allclose(out_bf16, ref, atol=5e-2, rtol=5e-2), (
        f"bf16 max abs err = {float(jnp.max(jnp.abs(out_bf16 - ref)))}")

    print("KERNEL_OK")
</pallas_src>

<mosaic_0001>
module attributes {stable_mosaic.version = 11 : i64} {
  func.func @_basic_block_kernel(%arg0: i32, %arg1: memref<1x16x16x4xf32, #tpu.memory_space<vmem>>, %arg2: memref<1152x128xf32, #tpu.memory_space<vmem>>, %arg3: memref<1152x128xf32, #tpu.memory_space<vmem>>, %arg4: memref<1x128xf32, #tpu.memory_space<vmem>>, %arg5: memref<1x128xf32, #tpu.memory_space<vmem>>, %arg6: memref<1x128xf32, #tpu.memory_space<vmem>>, %arg7: memref<1x128xf32, #tpu.memory_space<vmem>>, %arg8: memref<1x256x128xf32, #tpu.memory_space<vmem>>, %arg9: memref<18x24x128xf32, #tpu.memory_space<vmem>>, %arg10: memref<18x24x128xf32, #tpu.memory_space<vmem>>, %arg11: memref<256x1152xf32, #tpu.memory_space<vmem>>, %arg12: memref<16x16x128xf32, #tpu.memory_space<vmem>>) attributes {dimension_semantics = [#tpu.dimension_semantics<parallel>], iteration_bounds = array<i64: 2>, scalar_prefetch = 0 : i64, scratch_operands = 4 : i64, tpu.core_type = #tpu.core_type<tc>, window_params = [{transform_indices = @transform_0, window_bounds = array<i64: 1, 16, 16, 4>}, {pipeline_mode = #tpu.pipeline_mode<synchronous>, transform_indices = @transform_1, window_bounds = array<i64: 1152, 128>}, {pipeline_mode = #tpu.pipeline_mode<synchronous>, transform_indices = @transform_2, window_bounds = array<i64: 1152, 128>}, {pipeline_mode = #tpu.pipeline_mode<synchronous>, transform_indices = @transform_3, window_bounds = array<i64: 1, 128>}, {pipeline_mode = #tpu.pipeline_mode<synchronous>, transform_indices = @transform_4, window_bounds = array<i64: 1, 128>}, {pipeline_mode = #tpu.pipeline_mode<synchronous>, transform_indices = @transform_5, window_bounds = array<i64: 1, 128>}, {pipeline_mode = #tpu.pipeline_mode<synchronous>, transform_indices = @transform_6, window_bounds = array<i64: 1, 128>}, {transform_indices = @transform_7, window_bounds = array<i64: 1, 256, 128>}]} {
    %cst = arith.constant 0.000000e+00 : f32
    %0 = vector.broadcast %cst : f32 to vector<1x18x128xf32>
    %cst_0 = arith.constant 0.000000e+00 : f32
    %1 = vector.broadcast %cst_0 : f32 to vector<16x1x128xf32>
    %c0 = arith.constant 0 : index
    %c0_1 = arith.constant 0 : index
    %c0_2 = arith.constant 0 : index
    %2 = vector.load %arg10[%c0, %c0_1, %c0_2] : memref<18x24x128xf32, #tpu.memory_space<vmem>>, vector<1x18x128xf32>
    tpu.vector_store %arg10[%c0, %c0_1, %c0_2], %0 {strides = array<i32>} : memref<18x24x128xf32, #tpu.memory_space<vmem>>, vector<1x18x128xf32>,
    %c17 = arith.constant 17 : index
    %c0_3 = arith.constant 0 : index
    %c0_4 = arith.constant 0 : index
    %3 = vector.load %arg10[%c17, %c0_3, %c0_4] : memref<18x24x128xf32, #tpu.memory_space<vmem>>, vector<1x18x128xf32>
    tpu.vector_store %arg10[%c17, %c0_3, %c0_4], %0 {strides = array<i32>} : memref<18x24x128xf32, #tpu.memory_space<vmem>>, vector<1x18x128xf32>,
    %c1 = arith.constant 1 : index
    %c0_5 = arith.constant 0 : index
    %c0_6 = arith.constant 0 : index
    %4 = vector.load %arg10[%c1, %c0_5, %c0_6] : memref<18x24x128xf32, #tpu.memory_space<vmem>>, vector<16x1x128xf32>
    tpu.vector_store %arg10[%c1, %c0_5, %c0_6], %1 {strides = array<i32>} : memref<18x24x128xf32, #tpu.memory_space<vmem>>, vector<16x1x128xf32>,
    %c1_7 = arith.constant 1 : index
    %c17_8 = arith.constant 17 : index
    %c0_9 = arith.constant 0 : index
    %5 = vector.load %arg10[%c1_7, %c17_8, %c0_9] : memref<18x24x128xf32, #tpu.memory_space<vmem>>, vector<16x1x128xf32>
    tpu.vector_store %arg10[%c1_7, %c17_8, %c0_9], %1 {strides = array<i32>} : memref<18x24x128xf32, #tpu.memory_space<vmem>>, vector<16x1x128xf32>,
    %cst_10 = arith.constant 0.000000e+00 : f32
    %6 = vector.broadcast %cst_10 : f32 to vector<18x18x128xf32>
    %c0_11 = arith.constant 0 : index
    %c0_12 = arith.constant 0 : index
    %c0_13 = arith.constant 0 : index
    %7 = vector.load %arg9[%c0_11, %c0_12, %c0_13] : memref<18x24x128xf32, #tpu.memory_space<vmem>>, vector<18x18x128xf32>
    tpu.vector_store %arg9[%c0_11, %c0_12, %c0_13], %6 {strides = array<i32>} : memref<18x24x128xf32, #tpu.memory_space<vmem>>, vector<18x18x128xf32>,
    %c0_14 = arith.constant 0 : index
    %c0_15 = arith.constant 0 : index
    %c0_16 = arith.constant 0 : index
    %c0_17 = arith.constant 0 : index
    %8 = vector.load %arg1[%c0_14, %c0_15, %c0_16, %c0_17] : memref<1x16x16x4xf32, #tpu.memory_space<vmem>>, vector<1x16x16x4xf32>
    %9 = vector.shape_cast %8 : vector<1x16x16x4xf32> to vector<16x16x4xf32>
    %c1_18 = arith.constant 1 : index
    %c1_19 = arith.constant 1 : index
    %c0_20 = arith.constant 0 : index
    %10 = vector.load %arg9[%c1_18, %c1_19, %c0_20] : memref<18x24x128xf32, #tpu.memory_space<vmem>>, vector<16x16x4xf32>
    tpu.vector_store %arg9[%c1_18, %c1_19, %c0_20], %9 {strides = array<i32>} : memref<18x24x128xf32, #tpu.memory_space<vmem>>, vector<16x16x4xf32>,
    %c0_21 = arith.constant 0 : index
    %c0_22 = arith.constant 0 : index
    %c0_23 = arith.constant 0 : index
    %11 = vector.load %arg12[%c0_21, %c0_22, %c0_23] : memref<16x16x128xf32, #tpu.memory_space<vmem>>, vector<16x16x4xf32>
    tpu.vector_store %arg12[%c0_21, %c0_22, %c0_23], %9 {strides = array<i32>} : memref<16x16x128xf32, #tpu.memory_space<vmem>>, vector<16x16x4xf32>,
    %c0_24 = arith.constant 0 : index
    %c0_25 = arith.constant 0 : index
    %c0_26 = arith.constant 0 : index
    %12 = vector.load %arg9[%c0_24, %c0_25, %c0_26] : memref<18x24x128xf32, #tpu.memory_space<vmem>>, vector<16x16x128xf32>
    %13 = vector.shape_cast %12 : vector<16x16x128xf32> to vector<256x128xf32>
    %c0_27 = arith.constant 0 : index
    %c0_28 = arith.constant 0 : index
    %14 = vector.load %arg11[%c0_27, %c0_28] : memref<256x1152xf32, #tpu.memory_space<vmem>>, vector<256x128xf32>
    tpu.vector_store %arg11[%c0_27, %c0_28], %13 {strides = array<i32>} : memref<256x1152xf32, #tpu.memory_space<vmem>>, vector<256x128xf32>,
    %c0_29 = arith.constant 0 : index
    %c1_30 = arith.constant 1 : index
    %c0_31 = arith.constant 0 : index
    %15 = vector.load %arg9[%c0_29, %c1_30, %c0_31] : memref<18x24x128xf32, #tpu.memory_space<vmem>>, vector<16x16x128xf32>
    %16 = vector.shape_cast %15 : vector<16x16x128xf32> to vector<256x128xf32>
    %c0_32 = arith.constant 0 : index
    %c128 = arith.constant 128 : index
    %17 = vector.load %arg11[%c0_32, %c128] : memref<256x1152xf32, #tpu.memory_space<vmem>>, vector<256x128xf32>
    tpu.vector_store %arg11[%c0_32, %c128], %16 {strides = array<i32>} : memref<256x1152xf32, #tpu.memory_space<vmem>>, vector<256x128xf32>,
    %c0_33 = arith.constant 0 : index
    %c2 = arith.constant 2 : index
    %c0_34 = arith.constant 0 : index
    %18 = vector.load %arg9[%c0_33, %c2, %c0_34] : memref<18x24x128xf32, #tpu.memory_space<vmem>>, vector<16x16x128xf32>
    %19 = vector.shape_cast %18 : vector<16x16x128xf32> to vector<256x128xf32>
    %c0_35 = arith.constant 0 : index
    %c256 = arith.constant 256 : index
    %20 = vector.load %arg11[%c0_35, %c256] : memref<256x1152xf32, #tpu.memory_space<vmem>>, vector<256x128xf32>
    tpu.vector_store %arg11[%c0_35, %c256], %19 {strides = array<i32>} : memref<256x1152xf32, #tpu.memory_space<vmem>>, vector<256x128xf32>,
    %c1_36 = arith.constant 1 : index
    %c0_37 = arith.constant 0 : index
    %c0_38 = arith.constant 0 : index
    %21 = vector.load %arg9[%c1_36, %c0_37, %c0_38] : memref<18x24x128xf32, #tpu.memory_space<vmem>>, vector<16x16x128xf32>
    %22 = vector.shape_cast %21 : vector<16x16x128xf32> to vector<256x128xf32>
    %c0_39 = arith.constant 0 : index
    %c384 = arith.constant 384 : index
    %23 = vector.load %arg11[%c0_39, %c384] : memref<256x1152xf32, #tpu.memory_space<vmem>>, vector<256x128xf32>
    tpu.vector_store %arg11[%c0_39, %c384], %22 {strides = array<i32>} : memref<256x1152xf32, #tpu.memory_space<vmem>>, vector<256x128xf32>,
    %c1_40 = arith.constant 1 : index
    %c1_41 = arith.constant 1 : index
    %c0_42 = arith.constant 0 : index
    %24 = vector.load %arg9[%c1_40, %c1_41, %c0_42] : memref<18x24x128xf32, #tpu.memory_space<vmem>>, vector<16x16x128xf32>
    %25 = vector.shape_cast %24 : vector<16x16x128xf32> to vector<256x128xf32>
    %c0_43 = arith.constant 0 : index
    %c512 = arith.constant 512 : index
    %26 = vector.load %arg11[%c0_43, %c512] : memref<256x1152xf32, #tpu.memory_space<vmem>>, vector<256x128xf32>
    tpu.vector_store %arg11[%c0_43, %c512], %25 {strides = array<i32>} : memref<256x1152xf32, #tpu.memory_space<vmem>>, vector<256x128xf32>,
    %c1_44 = arith.constant 1 : index
    %c2_45 = arith.constant 2 : index
    %c0_46 = arith.constant 0 : index
    %27 = vector.load %arg9[%c1_44, %c2_45, %c0_46] : memref<18x24x128xf32, #tpu.memory_space<vmem>>, vector<16x16x128xf32>
    %28 = vector.shape_cast %27 : vector<16x16x128xf32> to vector<256x128xf32>
    %c0_47 = arith.constant 0 : index
    %c640 = arith.constant 640 : index
    %29 = vector.load %arg11[%c0_47, %c640] : memref<256x1152xf32, #tpu.memory_space<vmem>>, vector<256x128xf32>
    tpu.vector_store %arg11[%c0_47, %c640], %28 {strides = array<i32>} : memref<256x1152xf32, #tpu.memory_space<vmem>>, vector<256x128xf32>,
    %c2_48 = arith.constant 2 : index
    %c0_49 = arith.constant 0 : index
    %c0_50 = arith.constant 0 : index
    %30 = vector.load %arg9[%c2_48, %c0_49, %c0_50] : memref<18x24x128xf32, #tpu.memory_space<vmem>>, vector<16x16x128xf32>
    %31 = vector.shape_cast %30 : vector<16x16x128xf32> to vector<256x128xf32>
    %c0_51 = arith.constant 0 : index
    %c768 = arith.constant 768 : index
    %32 = vector.load %arg11[%c0_51, %c768] : memref<256x1152xf32, #tpu.memory_space<vmem>>, vector<256x128xf32>
    tpu.vector_store %arg11[%c0_51, %c768], %31 {strides = array<i32>} : memref<256x1152xf32, #tpu.memory_space<vmem>>, vector<256x128xf32>,
    %c2_52 = arith.constant 2 : index
    %c1_53 = arith.constant 1 : index
    %c0_54 = arith.constant 0 : index
    %33 = vector.load %arg9[%c2_52, %c1_53, %c0_54] : memref<18x24x128xf32, #tpu.memory_space<vmem>>, vector<16x16x128xf32>
    %34 = vector.shape_cast %33 : vector<16x16x128xf32> to vector<256x128xf32>
    %c0_55 = arith.constant 0 : index
    %c896 = arith.constant 896 : index
    %35 = vector.load %arg11[%c0_55, %c896] : memref<256x1152xf32, #tpu.memory_space<vmem>>, vector<256x128xf32>
    tpu.vector_store %arg11[%c0_55, %c896], %34 {strides = array<i32>} : memref<256x1152xf32, #tpu.memory_space<vmem>>, vector<256x128xf32>,
    %c2_56 = arith.constant 2 : index
    %c2_57 = arith.constant 2 : index
    %c0_58 = arith.constant 0 : index
    %36 = vector.load %arg9[%c2_56, %c2_57, %c0_58] : memref<18x24x128xf32, #tpu.memory_space<vmem>>, vector<16x16x128xf32>
    %37 = vector.shape_cast %36 : vector<16x16x128xf32> to vector<256x128xf32>
    %c0_59 = arith.constant 0 : index
    %c1024 = arith.constant 1024 : index
    %38 = vector.load %arg11[%c0_59, %c1024] : memref<256x1152xf32, #tpu.memory_space<vmem>>, vector<256x128xf32>
    tpu.vector_store %arg11[%c0_59, %c1024], %37 {strides = array<i32>} : memref<256x1152xf32, #tpu.memory_space<vmem>>, vector<256x128xf32>,
    %c0_60 = arith.constant 0 : index
    %c0_61 = arith.constant 0 : index
    %39 = vector.load %arg11[%c0_60, %c0_61] : memref<256x1152xf32, #tpu.memory_space<vmem>>, vector<256x1152xf32>
    %c0_62 = arith.constant 0 : index
    %c0_63 = arith.constant 0 : index
    %40 = vector.load %arg2[%c0_62, %c0_63] : memref<1152x128xf32, #tpu.memory_space<vmem>>, vector<1152x128xf32>
    %cst_64 = arith.constant dense<0.000000e+00> : vector<256x128xf32>
    %41 = tpu.matmul %39, %40, %cst_64 {dimension_numbers = #tpu.dot_dimension_numbers<[1], [0], [0], [1], [0, 0, 1, 1], [], []>} : vector<256x1152xf32>, vector<1152x128xf32>, vector<256x128xf32> -> vector<256x128xf32>
    %c0_65 = arith.constant 0 : index
    %c0_66 = arith.constant 0 : index
    %42 = vector.load %arg4[%c0_65, %c0_66] : memref<1x128xf32, #tpu.memory_space<vmem>>, vector<1x128xf32>
    %43 = vector.broadcast %42 : vector<1x128xf32> to vector<256x128xf32>
    %44 = arith.mulf %41, %43 : vector<256x128xf32>
    %c0_67 = arith.constant 0 : index
    %c0_68 = arith.constant 0 : index
    %45 = vector.load %arg5[%c0_67, %c0_68] : memref<1x128xf32, #tpu.memory_space<vmem>>, vector<1x128xf32>
    %46 = vector.broadcast %45 : vector<1x128xf32> to vector<256x128xf32>
    %47 = arith.addf %44, %46 : vector<256x128xf32>
    %cst_69 = arith.constant 0.000000e+00 : f32
    %48 = vector.broadcast %cst_69 : f32 to vector<256x128xf32>
    %49 = arith.maximumf %47, %48 : vector<256x128xf32>
    %50 = vector.shape_cast %49 : vector<256x128xf32> to vector<16x16x128xf32>
    %c1_70 = arith.constant 1 : index
    %c1_71 = arith.constant 1 : index
    %c0_72 = arith.constant 0 : index
    %51 = vector.load %arg10[%c1_70, %c1_71, %c0_72] : memref<18x24x128xf32, #tpu.memory_space<vmem>>, vector<16x16x128xf32>
    tpu.vector_store %arg10[%c1_70, %c1_71, %c0_72], %50 {strides = array<i32>} : memref<18x24x128xf32, #tpu.memory_space<vmem>>, vector<16x16x128xf32>,
    %c0_73 = arith.constant 0 : index
    %c0_74 = arith.constant 0 : index
    %c0_75 = arith.constant 0 : index
    %52 = vector.load %arg10[%c0_73, %c0_74, %c0_75] : memref<18x24x128xf32, #tpu.memory_space<vmem>>, vector<16x16x128xf32>
    %53 = vector.shape_cast %52 : vector<16x16x128xf32> to vector<256x128xf32>
    %c0_76 = arith.constant 0 : index
    %c0_77 = arith.constant 0 : index
    %54 = vector.load %arg11[%c0_76, %c0_77] : memref<256x1152xf32, #tpu.memory_space<vmem>>, vector<256x128xf32>
    tpu.vector_store %arg11[%c0_76, %c0_77], %53 {strides = array<i32>} : memref<256x1152xf32, #tpu.memory_space<vmem>>, vector<256x128xf32>,
    %c0_78 = arith.constant 0 : index
    %c1_79 = arith.constant 1 : index
    %c0_80 = arith.constant 0 : index
    %55 = vector.load %arg10[%c0_78, %c1_79, %c0_80] : memref<18x24x128xf32, #tpu.memory_space<vmem>>, vector<16x16x128xf32>
    %56 = vector.shape_cast %55 : vector<16x16x128xf32> to vector<256x128xf32>
    %c0_81 = arith.constant 0 : index
    %c128_82 = arith.constant 128 : index
    %57 = vector.load %arg11[%c0_81, %c128_82] : memref<256x1152xf32, #tpu.memory_space<vmem>>, vector<256x128xf32>
    tpu.vector_store %arg11[%c0_81, %c128_82], %56 {strides = array<i32>} : memref<256x1152xf32, #tpu.memory_space<vmem>>, vector<256x128xf32>,
    %c0_83 = arith.constant 0 : index
    %c2_84 = arith.constant 2 : index
    %c0_85 = arith.constant 0 : index
    %58 = vector.load %arg10[%c0_83, %c2_84, %c0_85] : memref<18x24x128xf32, #tpu.memory_space<vmem>>, vector<16x16x128xf32>
    %59 = vector.shape_cast %58 : vector<16x16x128xf32> to vector<256x128xf32>
    %c0_86 = arith.constant 0 : index
    %c256_87 = arith.constant 256 : index
    %60 = vector.load %arg11[%c0_86, %c256_87] : memref<256x1152xf32, #tpu.memory_space<vmem>>, vector<256x128xf32>
    tpu.vector_store %arg11[%c0_86, %c256_87], %59 {strides = array<i32>} : memref<256x1152xf32, #tpu.memory_space<vmem>>, vector<256x128xf32>,
    %c1_88 = arith.constant 1 : index
    %c0_89 = arith.constant 0 : index
    %c0_90 = arith.constant 0 : index
    %61 = vector.load %arg10[%c1_88, %c0_89, %c0_90] : memref<18x24x128xf32, #tpu.memory_space<vmem>>, vector<16x16x128xf32>
    %62 = vector.shape_cast %61 : vector<16x16x128xf32> to vector<256x128xf32>
    %c0_91 = arith.constant 0 : index
    %c384_92 = arith.constant 384 : index
    %63 = vector.load %arg11[%c0_91, %c384_92] : memref<256x1152xf32, #tpu.memory_space<vmem>>, vector<256x128xf32>
    tpu.vector_store %arg11[%c0_91, %c384_92], %62 {strides = array<i32>} : memref<256x1152xf32, #tpu.memory_space<vmem>>, vector<256x128xf32>,
    %c1_93 = arith.constant 1 : index
    %c1_94 = arith.constant 1 : index
    %c0_95 = arith.constant 0 : index
    %64 = vector.load %arg10[%c1_93, %c1_94, %c0_95] : memref<18x24x128xf32, #tpu.memory_space<vmem>>, vector<16x16x128xf32>
    %65 = vector.shape_cast %64 : vector<16x16x128xf32> to vector<256x128xf32>
    %c0_96 = arith.constant 0 : index
    %c512_97 = arith.constant 512 : index
    %66 = vector.load %arg11[%c0_96, %c512_97] : memref<256x1152xf32, #tpu.memory_space<vmem>>, vector<256x128xf32>
    tpu.vector_store %arg11[%c0_96, %c512_97], %65 {strides = array<i32>} : memref<256x1152xf32, #tpu.memory_space<vmem>>, vector<256x128xf32>,
    %c1_98 = arith.constant 1 : index
    %c2_99 = arith.constant 2 : index
    %c0_100 = arith.constant 0 : index
    %67 = vector.load %arg10[%c1_98, %c2_99, %c0_100] : memref<18x24x128xf32, #tpu.memory_space<vmem>>, vector<16x16x128xf32>
    %68 = vector.shape_cast %67 : vector<16x16x128xf32> to vector<256x128xf32>
    %c0_101 = arith.constant 0 : index
    %c640_102 = arith.constant 640 : index
    %69 = vector.load %arg11[%c0_101, %c640_102] : memref<256x1152xf32, #tpu.memory_space<vmem>>, vector<256x128xf32>
    tpu.vector_store %arg11[%c0_101, %c640_102], %68 {strides = array<i32>} : memref<256x1152xf32, #tpu.memory_space<vmem>>, vector<256x128xf32>,
    %c2_103 = arith.constant 2 : index
    %c0_104 = arith.constant 0 : index
    %c0_105 = arith.constant 0 : index
    %70 = vector.load %arg10[%c2_103, %c0_104, %c0_105] : memref<18x24x128xf32, #tpu.memory_space<vmem>>, vector<16x16x128xf32>
    %71 = vector.shape_cast %70 : vector<16x16x128xf32> to vector<256x128xf32>
    %c0_106 = arith.constant 0 : index
    %c768_107 = arith.constant 768 : index
    %72 = vector.load %arg11[%c0_106, %c768_107] : memref<256x1152xf32, #tpu.memory_space<vmem>>, vector<256x128xf32>
    tpu.vector_store %arg11[%c0_106, %c768_107], %71 {strides = array<i32>} : memref<256x1152xf32, #tpu.memory_space<vmem>>, vector<256x128xf32>,
    %c2_108 = arith.constant 2 : index
    %c1_109 = arith.constant 1 : index
    %c0_110 = arith.constant 0 : index
    %73 = vector.load %arg10[%c2_108, %c1_109, %c0_110] : memref<18x24x128xf32, #tpu.memory_space<vmem>>, vector<16x16x128xf32>
    %74 = vector.shape_cast %73 : vector<16x16x128xf32> to vector<256x128xf32>
    %c0_111 = arith.constant 0 : index
    %c896_112 = arith.constant 896 : index
    %75 = vector.load %arg11[%c0_111, %c896_112] : memref<256x1152xf32, #tpu.memory_space<vmem>>, vector<256x128xf32>
    tpu.vector_store %arg11[%c0_111, %c896_112], %74 {strides = array<i32>} : memref<256x1152xf32, #tpu.memory_space<vmem>>, vector<256x128xf32>,
    %c2_113 = arith.constant 2 : index
    %c2_114 = arith.constant 2 : index
    %c0_115 = arith.constant 0 : index
    %76 = vector.load %arg10[%c2_113, %c2_114, %c0_115] : memref<18x24x128xf32, #tpu.memory_space<vmem>>, vector<16x16x128xf32>
    %77 = vector.shape_cast %76 : vector<16x16x128xf32> to vector<256x128xf32>
    %c0_116 = arith.constant 0 : index
    %c1024_117 = arith.constant 1024 : index
    %78 = vector.load %arg11[%c0_116, %c1024_117] : memref<256x1152xf32, #tpu.memory_space<vmem>>, vector<256x128xf32>
    tpu.vector_store %arg11[%c0_116, %c1024_117], %77 {strides = array<i32>} : memref<256x1152xf32, #tpu.memory_space<vmem>>, vector<256x128xf32>,
    %c0_118 = arith.constant 0 : index
    %c0_119 = arith.constant 0 : index
    %79 = vector.load %arg11[%c0_118, %c0_119] : memref<256x1152xf32, #tpu.memory_space<vmem>>, vector<256x1152xf32>
    %c0_120 = arith.constant 0 : index
    %c0_121 = arith.constant 0 : index
    %80 = vector.load %arg3[%c0_120, %c0_121] : memref<1152x128xf32, #tpu.memory_space<vmem>>, vector<1152x128xf32>
    %cst_122 = arith.constant dense<0.000000e+00> : vector<256x128xf32>
    %81 = tpu.matmul %79, %80, %cst_122 {dimension_numbers = #tpu.dot_dimension_numbers<[1], [0], [0], [1], [0, 0, 1, 1], [], []>} : vector<256x1152xf32>, vector<1152x128xf32>, vector<256x128xf32> -> vector<256x128xf32>
    %c0_123 = arith.constant 0 : index
    %c0_124 = arith.constant 0 : index
    %82 = vector.load %arg6[%c0_123, %c0_124] : memref<1x128xf32, #tpu.memory_space<vmem>>, vector<1x128xf32>
    %83 = vector.broadcast %82 : vector<1x128xf32> to vector<256x128xf32>
    %84 = arith.mulf %81, %83 : vector<256x128xf32>
    %c0_125 = arith.constant 0 : index
    %c0_126 = arith.constant 0 : index
    %85 = vector.load %arg7[%c0_125, %c0_126] : memref<1x128xf32, #tpu.memory_space<vmem>>, vector<1x128xf32>
    %86 = vector.broadcast %85 : vector<1x128xf32> to vector<256x128xf32>
    %87 = arith.addf %84, %86 : vector<256x128xf32>
    %c0_127 = arith.constant 0 : index
    %c0_128 = arith.constant 0 : index
    %c0_129 = arith.constant 0 : index
    %88 = vector.load %arg12[%c0_127, %c0_128, %c0_129] : memref<16x16x128xf32, #tpu.memory_space<vmem>>, vector<16x16x128xf32>
    %89 = vector.shape_cast %88 : vector<16x16x128xf32> to vector<256x128xf32>
    %90 = arith.addf %87, %89 : vector<256x128xf32>
    %cst_130 = arith.constant 0.000000e+00 : f32
    %91 = vector.broadcast %cst_130 : f32 to vector<256x128xf32>
    %92 = arith.maximumf %90, %91 : vector<256x128xf32>
    %c0_131 = arith.constant 0 : index
    %c0_132 = arith.constant 0 : index
    %c0_133 = arith.constant 0 : index
    %93 = vector.load %arg8[%c0_131, %c0_132, %c0_133] : memref<1x256x128xf32, #tpu.memory_space<vmem>>, vector<1x256x128xf32>
    %94 = vector.shape_cast %93 : vector<1x256x128xf32> to vector<256x128xf32>
    %95 = vector.shape_cast %92 : vector<256x128xf32> to vector<1x256x128xf32>
    tpu.vector_store %arg8[%c0_131, %c0_132, %c0_133], %95 {strides = array<i32>} : memref<1x256x128xf32, #tpu.memory_space<vmem>>, vector<1x256x128xf32>,
    return
  }
  func.func @transform_0(%arg0: i32) -> (i32, i32, i32, i32) {
    %c0_i32 = arith.constant 0 : i32
    %c0_i32_0 = arith.constant 0 : i32
    %c0_i32_1 = arith.constant 0 : i32
    %c0_i32_2 = arith.constant 0 : i32
    return %arg0, %c0_i32, %c0_i32_0, %c0_i32_1 : i32, i32, i32, i32
  }
  func.func @transform_1(%arg0: i32) -> (i32, i32) {
    %c0_i32 = arith.constant 0 : i32
    %c0_i32_0 = arith.constant 0 : i32
    %c0_i32_1 = arith.constant 0 : i32
    return %c0_i32, %c0_i32_0 : i32, i32
  }
  func.func @transform_2(%arg0: i32) -> (i32, i32) {
    %c0_i32 = arith.constant 0 : i32
    %c0_i32_0 = arith.constant 0 : i32
    %c0_i32_1 = arith.constant 0 : i32
    return %c0_i32, %c0_i32_0 : i32, i32
  }
  func.func @transform_3(%arg0: i32) -> (i32, i32) {
    %c0_i32 = arith.constant 0 : i32
    %c0_i32_0 = arith.constant 0 : i32
    %c0_i32_1 = arith.constant 0 : i32
    return %c0_i32, %c0_i32_0 : i32, i32
  }
  func.func @transform_4(%arg0: i32) -> (i32, i32) {
    %c0_i32 = arith.constant 0 : i32
    %c0_i32_0 = arith.constant 0 : i32
    %c0_i32_1 = arith.constant 0 : i32
    return %c0_i32, %c0_i32_0 : i32, i32
  }
  func.func @transform_5(%arg0: i32) -> (i32, i32) {
    %c0_i32 = arith.constant 0 : i32
    %c0_i32_0 = arith.constant 0 : i32
    %c0_i32_1 = arith.constant 0 : i32
    return %c0_i32, %c0_i32_0 : i32, i32
  }
  func.func @transform_6(%arg0: i32) -> (i32, i32) {
    %c0_i32 = arith.constant 0 : i32
    %c0_i32_0 = arith.constant 0 : i32
    %c0_i32_1 = arith.constant 0 : i32
    return %c0_i32, %c0_i32_0 : i32, i32
  }
  func.func @transform_7(%arg0: i32) -> (i32, i32, i32) {
    %c0_i32 = arith.constant 0 : i32
    %c0_i32_0 = arith.constant 0 : i32
    %c0_i32_1 = arith.constant 0 : i32
    return %arg0, %c0_i32, %c0_i32_0 : i32, i32, i32
  }
}

</mosaic_0001>

<bundles_post_ra>
// kernel: tpu_custom_call.1
= control target key start
LH: loop header
LB: loop body
LE: loop exit
PB: predicated region body
PF: predicated region fallthrough
CT: control target
= control target key end

     0   :  { %12 = vsyncpa [#allocation7], 0  ;;  %s8290_s0 = inlined_call_operand.vmem [shape: f32[2,16,16,4], index: 0, kind: input, shape index: {}]   ;;  %s8291_s1 = inlined_call_operand.hbm [shape: f32[1152,128], index: 1, kind: input, shape index: {}]   ;;  %s8292_s2 = inlined_call_operand.hbm [shape: f32[1152,128], index: 2, kind: input, shape index: {}]   ;;  %s8293_s3 = inlined_call_operand.vmem [shape: f32[1,128], index: 3, kind: input, shape index: {}]   ;;  %s8294_s4 = inlined_call_operand.vmem [shape: f32[1,128], index: 4, kind: input, shape index: {}]   ;;  %s8295_s5 = inlined_call_operand.vmem [shape: f32[1,128], index: 5, kind: input, shape index: {}]   ;;  %s8296_s6 = inlined_call_operand.vmem [shape: f32[1,128], index: 6, kind: input, shape index: {}]   ;;  %s8297_s7 = inlined_call_operand.hbm [shape: f32[2,256,128], index: 7, kind: output, shape index: {}]  }
   0x1   :  { %13 = vsyncpa [#allocation10], 0 }
   0x2   :  { %14 = vsyncpa [#allocation8], 0 }
   0x3   :  { %16 = vsyncpa [#allocation8 + $0x1], 0  ;;  %s6584_s24 = smov 0   ;;  %s6586_s25 = smov 0  }
   0x4   :  { %s6588_s26 = smov 0   ;;  %s6590_s27 = smov 0  }
   0x5 LB: > { %s6605_s28 = sadd.s32 4294967295, %s6533_s27   ;;  %s5213_s29 = sadd.s32 4294967294, %s6533_s27   ;;  %s6533_s27 = sphi %s6590_s27, %s8411_s27   ;;  %s6529_s26 = sphi %s6588_s26, %s8410_s26   ;;  %s6525_s25 = sphi %s6586_s25, %s8409_s25   ;;  %s6521_s24 = sphi %s6584_s24, %s8408_s24  }
   0x6   : > { %s6609_s30 = sadd.s32 1, %s6533_s27   ;;  %s181_s8 = sadd.s32 1, %s6529_s26 }
   0x7   : > { %s178_s9 = ssub.s32 %s6533_s27, %s6609_s30  ;;  %p191_p0 = scmp.ne.s32.totalorder %s6529_s26, %s6525_s25 }
   0x8   : > { %p179_p1 = scmp.eq.s32.totalorder %s178_s9, 0  ;;  %p192_p2 = scmp.eq.s32.totalorder %s6605_s28, 1 }
   0x9   : > { %p197_p3 = scmp.ne.s32.totalorder %s6525_s25, %s6521_s24  ;;  %p198_p4 = scmp.eq.s32.totalorder %s5213_s29, 1 }
   0xa   : > { %s6620_s10 = scalar_select %p179_p1, %s6529_s26, %s181_s8  }
   0xb   : > { %p6622_p5 = por %p192_p2, %p191_p0  ;;  %p6626_p6 = por %p198_p4, %p197_p3 }
   0xc   : > { %8342 = sst [smem:[#allocation15_spill]] %s6620_s10  ;;  %p5214_p7 = scmp.ge.s32.totalorder %s6533_s27, 1 }
   0xd   : > { %s8343_s11 = scalar_select %p6622_p5, 1, 0 }
   0xe   : > { %s8344_s12 = scalar_select %p6626_p6, 1, 0 }
   0xf   : > { %p205_p8 = scmp.lt.s32.totalorder %s6533_s27, 3  ;;  %p8298_p9 = scmp.eq.s32.totalorder %s6605_s28, 0 }
  0x10   : > { %s6535_s14 = smov [#allocation6]   ;;  %s6536_s17 = smov [#allocation9]  }
  0x11   : > { %p6633_p10 = pnand %p5214_p7, %p205_p8  ;;  %s217_s15 = sshll.u32 %s6535_s14, 4  ;;  %s218_s15 = int_to_ptr.vmem [resolvable:$true] %s217_s15 }
  0x12   : > { %s230_s18 = sshll.u32 %s6536_s17, 4  ;;  %s6407_s21 = scalar_lea.hbm %s8291_s1, 18432  ;;  %s6645_s18 = int_to_ptr.vmem [resolvable:$true] %s230_s18 }
  0x13   : > { %s8345_s13 = scalar_select %p6633_p10, 1, 0 }
  0x14   : > { %p6349_p11 = pneg %p6633_p10  ;;  %p6408_p13 = scmp.ne.s32.totalorder %s8291_s1, %s6407_s21 }
  0x15   : > { %p6414_p3 = scmp.lt.u32.totalorder %s6407_s21, %s8291_s1 }
  0x16   : > { %p6641_p12 = pnand %p8298_p9, %p6349_p11 }
  0x18   : > { %p6409_p0 = pneg %p6641_p12 }
  0x1a   : > { %p6410_p1 = pnand %p6409_p0, %p6408_p13 }
  0x1c   : > { %p6411_p2 = pneg %p6410_p1 }
  0x1e   : > { %p6416_p4 = pnand %p6414_p3, %p6411_p2 }
  0x20   : > { %6419 = shalt.err (!%p6416_p4)
}
  0x21   : > { %s6420_s9 = scalar_lea.vmem %s218_s15, 18432  ;;  %p6428_p9 = scmp.lt.s32.totalorder %s218_s15, %s218_s15 }
  0x22   : > { %p6421_p7 = scmp.ne.s32.totalorder %s218_s15, %s6420_s9  ;;  %p6429_p6 = scmp.lt.s32.totalorder %s6420_s9, %s6420_s9 }
  0x24   : > { %p6423_p8 = pnand %p6421_p7, %p6409_p0  ;;  %p6430_p5 = por %p6429_p6, %p6428_p9 }
  0x26   : > { %p6424_p11 = pneg %p6423_p8 }
  0x28   : > { %p6431_p10 = pnand %p6430_p5, %p6424_p11 }
  0x2a   : > { %6434 = shalt.err (!%p6431_p10)
}
  0x2b   : > { %s6537_s14 = smov 128   ;;  %s6538_s17 = smov 8  }
  0x2c   : > { %6352 = dma.hbm_to_vmem [thread:$0]  (!%p6641_p12), %s8291_s1, 18432, %s218_s15, [#allocation7], %s6537_s14, %s6537_s14, %s6538_s17  }
  0x2d   : > { %s6435_s23 = scalar_lea.hbm %s8292_s2, 18432 }
  0x2e   : > { %p6436_p13 = scmp.ne.s32.totalorder %s8292_s2, %s6435_s23  ;;  %p6442_p9 = scmp.lt.u32.totalorder %s6435_s23, %s8292_s2 }
  0x30   : > { %p6438_p5 = pnand %p6436_p13, %p6409_p0 }
  0x32   : > { %p6439_p6 = pneg %p6438_p5 }
  0x34   : > { %p6444_p10 = pnand %p6442_p9, %p6439_p6 }
  0x36   : > { %6447 = shalt.err (!%p6444_p10)
}
  0x37   : > { %s6448_s15 = scalar_lea.vmem %s6645_s18, 18432  ;;  %p6456_p4 = scmp.lt.s32.totalorder %s6645_s18, %s6645_s18 }
  0x38   : > { %p6449_p1 = scmp.ne.s32.totalorder %s6645_s18, %s6448_s15  ;;  %p6457_p7 = scmp.lt.s32.totalorder %s6448_s15, %s6448_s15 }
  0x3a   : > { %p6451_p2 = pnand %p6449_p1, %p6409_p0  ;;  %p6458_p8 = por %p6457_p7, %p6456_p4 }
  0x3c   : > { %p6452_p3 = pneg %p6451_p2 }
  0x3e   : > { %p6459_p11 = pnand %p6458_p8, %p6452_p3 }
  0x40   : > { %6462 = shalt.err (!%p6459_p11)
}
  0x41   : > { %6355 = dma.hbm_to_vmem [thread:$0]  (!%p6641_p12), %s8292_s2, 18432, %s6645_s18, [#allocation10], %s6537_s14, %s6537_s14, %s6538_s17  }
  0x42   : > { %p8347_p13 = scmp.ne.s32.totalorder %s8345_s13, 0 }
  0x44   : > { %266 = sbr.rel (%p8347_p13) target bundleno = 1517 (0x5ed), region = 48 }
  0x4b   : > { %p8348_p5 = scmp.eq.s32.totalorder %s6605_s28, 0 }
  0x4d   : > { %6508 = dma.done.wait (%p8348_p5), [#allocation7], 18432   ;;  %p8349_p0 = pmov %p8348_p5 }
  0x4f   : > { %6510 = vsyncadd (%p8349_p0), [#allocation7], 4294948864  ;;  %p8350_p6 = pmov %p8349_p0 }
  0x50   : > { %p8351_p9 = pmov %p8349_p0 }
  0x51   : > { %6512 = dma.done.wait (%p8350_p6), [#allocation10], 18432  }
  0x52   : > { %6514 = vsyncadd (%p8351_p9), [#allocation10], 4294948864  ;;  %v8301_v0 = vmov 0.0|0.0   ;;  %v6540_v1 = vmov 0.0   ;;  %p302_p12 = scmp.lt.s32.totalorder %s6605_s28, 1  ;;  %v1364_v2 = vld [vmem:[#allocation6] sm:$0xff] }
  0x53   : > { %5491 = vmatprep.subr.bf16.mxu0 %v8301_v0  ;;  %347 = vst [vmem:[#allocation2] sm:$0xff] %v6540_v1  ;;  %348 = vst [vmem:[#allocation2 + $0x8] sm:$0xff] %v6540_v1  ;;  %v1365_v3 = vld [vmem:[#allocation6 + $0x8] sm:$0xff]  ;;  %v1366_v4 = vld [vmem:[#allocation6 + $0x10] sm:$0xff]  ;;  %vm434_vm0 = vcmask 31744   ;;  %s299_s9 = sand.u32 1, %s6525_s25  }
  0x54   : > { %307 = vst [vmem:[#allocation3] sm:$0xff] %v6540_v1  ;;  %308 = vst [vmem:[#allocation3 + $0x8] sm:$0xff] %v6540_v1  ;;  %v5492_v5 = vpack.c.bf16 %v1365_v3, %v1364_v2  ;;  %v1367_v6 = vld [vmem:[#allocation6 + $0x18] sm:$0xff]  ;;  %s303_s13 = scalar_select %p302_p12, %s6605_s28, 1  ;;  %v1368_v8 = vld [vmem:[#allocation6 + $0x20] sm:$0xff] }
  0x55   : > { %309 = vst [vmem:[#allocation3 + $0x10] sm:$0x3] %v6540_v1  ;;  %311 = vst [vmem:[#allocation3 + $0x198] sm:$0xff] %v6540_v1  ;;  %v5495_v7 = vpack.c.bf16 %v1367_v6, %v1366_v4  ;;  %v1369_v9 = vld [vmem:[#allocation6 + $0x28] sm:$0xff]  ;;  %v1370_v11 = vld [vmem:[#allocation6 + $0x30] sm:$0xff]  ;;  %s5221_s19 = sshll.u32 %s299_s9, 8 }
  0x56   : > { %312 = vst [vmem:[#allocation3 + $0x1a0] sm:$0xff] %v6540_v1  ;;  %313 = vst [vmem:[#allocation3 + $0x1a8] sm:$0x3] %v6540_v1  ;;  %5493 = vmatpush1.bf16.msra.mxu0 %v5492_v5  ;;  %s5233_s16 = sshll.u32 %s303_s13, 8  ;;  %v5498_v10 = vpack.c.bf16 %v1369_v9, %v1368_v8  ;;  %v1371_v12 = vld [vmem:[#allocation6 + $0x38] sm:$0xff]  ;;  %v1372_v15 = vld [vmem:[#allocation6 + $0x40] sm:$0xff] }
  0x57   : > { %315 = vst [vmem:[#allocation3 + $0x18] sm:$0x1] %v6540_v1  ;;  %316 = vst [vmem:[#allocation3 + $0x30] sm:$0x1] %v6540_v1  ;;  %5494 = vmatprep.subr.bf16.mxu0 %v8301_v0  ;;  %s6804_s17 = scalar_lea.vmem %s8290_s0, %s5233_s16  ;;  %v5501_v14 = vpack.c.bf16 %v1371_v12, %v1370_v11  ;;  %v1373_v16 = vld [vmem:[#allocation6 + $0x48] sm:$0xff]  ;;  %v1374_v24 = vld [vmem:[#allocation6 + $0x50] sm:$0xff] }
  0x58   : > { %317 = vst [vmem:[#allocation3 + $0x48] sm:$0x1] %v6540_v1  ;;  %318 = vst [vmem:[#allocation3 + $0x60] sm:$0x1] %v6540_v1  ;;  %v401_v17 = vld [vmem:[%s6804_s17] sm:$0xff]  ;;  %v402_v18 = vld [vmem:[%s6804_s17 + $0x8] sm:$0xff]  ;;  %v5504_v22 = vpack.c.bf16 %v1373_v16, %v1372_v15 }
  0x59   : > { %319 = vst [vmem:[#allocation3 + $0x78] sm:$0x1] %v6540_v1  ;;  %320 = vst [vmem:[#allocation3 + $0x90] sm:$0x1] %v6540_v1  ;;  %v403_v19 = vld [vmem:[%s6804_s17 + $0x10] sm:$0xff]  ;;  %v404_v20 = vld [vmem:[%s6804_s17 + $0x18] sm:$0xff] }
  0x5a   : > { %321 = vst [vmem:[#allocation3 + $0xa8] sm:$0x1] %v6540_v1  ;;  %322 = vst [vmem:[#allocation3 + $0xc0] sm:$0x1] %v6540_v1  ;;  %5496 = vmatpush1.bf16.msra.mxu0 %v5495_v7  ;;  %v563_v13 = vld [vmem:[#allocation2 + $0x1] sm:$0xff]  ;;  %v1375_v25 = vld [vmem:[#allocation6 + $0x58] sm:$0xff] }
  0x5b   : > { %323 = vst [vmem:[#allocation3 + $0xd8] sm:$0x1] %v6540_v1  ;;  %324 = vst [vmem:[#allocation3 + $0xf0] sm:$0x1] %v6540_v1  ;;  %5497 = vmatprep.subr.bf16.mxu0 %v8301_v0  ;;  %1572 = vmatprep.mubr.f32.mxu0 %v563_v13  ;;  %v405_v21 = vld [vmem:[%s6804_s17 + $0x20] sm:$0xff]  ;;  %v406_v23 = vld [vmem:[%s6804_s17 + $0x28] sm:$0xff]  ;;  %v5507_v31 = vpack.c.bf16 %v1375_v25, %v1374_v24 }
  0x5c   : > { %325 = vst [vmem:[#allocation3 + $0x108] sm:$0x1] %v6540_v1  ;;  %326 = vst [vmem:[#allocation3 + $0x120] sm:$0x1] %v6540_v1  ;;  %v407_v26 = vld [vmem:[%s6804_s17 + $0x30] sm:$0xff]  ;;  %v408_v27 = vld [vmem:[%s6804_s17 + $0x38] sm:$0xff] }
  0x5d   : > { %327 = vst [vmem:[#allocation3 + $0x138] sm:$0x1] %v6540_v1  ;;  %328 = vst [vmem:[#allocation3 + $0x150] sm:$0x1] %v6540_v1  ;;  %v409_v28 = vld [vmem:[%s6804_s17 + $0x40] sm:$0xff]  ;;  %v410_v29 = vld [vmem:[%s6804_s17 + $0x48] sm:$0xff] }
  0x5e   : > { %329 = vst [vmem:[#allocation3 + $0x168] sm:$0x1] %v6540_v1  ;;  %330 = vst [vmem:[#allocation3 + $0x180] sm:$0x1] %v6540_v1  ;;  %5499 = vmatpush1.bf16.msra.mxu0 %v5498_v10  ;;  %v411_v30 = vld [vmem:[%s6804_s17 + $0x50] sm:$0xff]  ;;  %v412_v32 = vld [vmem:[%s6804_s17 + $0x58] sm:$0xff] }
  0x5f   : > { %331 = vst [vmem:[#allocation3 + $0x29] sm:$0x1] %v6540_v1  ;;  %332 = vst [vmem:[#allocation3 + $0x41] sm:$0x1] %v6540_v1  ;;  %5500 = vmatprep.subr.bf16.mxu0 %v8301_v0  ;;  %v1376_v33 = vld [vmem:[#allocation6 + $0x60] sm:$0xff]  ;;  %v1377_v34 = vld [vmem:[#allocation6 + $0x68] sm:$0xff] }
  0x60   : > { %333 = vst [vmem:[#allocation3 + $0x59] sm:$0x1] %v6540_v1  ;;  %334 = vst [vmem:[#allocation3 + $0x71] sm:$0x1] %v6540_v1  ;;  %v413_v35 = vld [vmem:[%s6804_s17 + $0x60] sm:$0xff]  ;;  %v5510_v36 = vpack.c.bf16 %v1377_v34, %v1376_v33  ;;  %v1378_v37 = vld [vmem:[#allocation6 + $0x70] sm:$0xff] }
  0x61   : > { %335 = vst [vmem:[#allocation3 + $0x89] sm:$0x1] %v6540_v1  ;;  %336 = vst [vmem:[#allocation3 + $0xa1] sm:$0x1] %v6540_v1  ;;  %v1379_v38 = vld [vmem:[#allocation6 + $0x78] sm:$0xff]  ;;  %v1380_v40 = vld [vmem:[#allocation6 + $0x80] sm:$0xff] }
  0x62   : > { %337 = vst [vmem:[#allocation3 + $0xb9] sm:$0x1] %v6540_v1  ;;  %338 = vst [vmem:[#allocation3 + $0xd1] sm:$0x1] %v6540_v1  ;;  %5502 = vmatpush1.bf16.msra.mxu0 %v5501_v14  ;;  %v5513_v39 = vpack.c.bf16 %v1379_v38, %v1378_v37  ;;  %v1381_v41 = vld [vmem:[#allocation6 + $0x88] sm:$0xff]  ;;  %v415_v43 = vld [vmem:[%s6804_s17 + $0x70] sm:$0xff] }
  0x63   : > { %339 = vst [vmem:[#allocation3 + $0xe9] sm:$0x1] %v6540_v1  ;;  %340 = vst [vmem:[#allocation3 + $0x101] sm:$0x1] %v6540_v1  ;;  %5503 = vmatprep.subr.bf16.mxu0 %v8301_v0  ;;  %v414_v42 = vld [vmem:[%s6804_s17 + $0x68] sm:$0xff]  ;;  %v5516_v44 = vpack.c.bf16 %v1381_v41, %v1380_v40  ;;  %v1382_v45 = vld [vmem:[#allocation6 + $0x90] sm:$0xff] }
  0x64   : > { %341 = vst [vmem:[#allocation3 + $0x119] sm:$0x1] %v6540_v1  ;;  %342 = vst [vmem:[#allocation3 + $0x131] sm:$0x1] %v6540_v1  ;;  %v416_v46 = vld [vmem:[%s6804_s17 + $0x78] sm:$0xff]  ;;  %v417_v47 = vld [vmem:[%s6804_s17 + $0x80] sm:$0xff] }
  0x65   : > { %343 = vst [vmem:[#allocation3 + $0x149] sm:$0x1] %v6540_v1  ;;  %344 = vst [vmem:[#allocation3 + $0x161] sm:$0x1] %v6540_v1  ;;  %v1383_v48 = vld [vmem:[#allocation6 + $0x98] sm:$0xff]  ;;  %v418_v49 = vld [vmem:[%s6804_s17 + $0x88] sm:$0xff] }
  0x66   : > { %345 = vst [vmem:[#allocation3 + $0x179] sm:$0x1] %v6540_v1  ;;  %346 = vst [vmem:[#allocation3 + $0x191] sm:$0x1] %v6540_v1  ;;  %5505 = vmatpush1.bf16.msra.mxu0 %v5504_v22  ;;  %v419_v50 = vld [vmem:[%s6804_s17 + $0x90] sm:$0xff]  ;;  %v420_v51 = vld [vmem:[%s6804_s17 + $0x98] sm:$0xff]  ;;  %v5519_v53 = vpack.c.bf16 %v1383_v48, %v1382_v45 }
  0x67   : > { %349 = vst [vmem:[#allocation2 + $0x10] sm:$0x3] %v6540_v1  ;;  %350 = vst [vmem:[#allocation2 + $0x18] sm:$0xff] %v6540_v1  ;;  %5506 = vmatprep.subr.bf16.mxu0 %v8301_v0  ;;  %v421_v52 = vld [vmem:[%s6804_s17 + $0xa0] sm:$0xff]  ;;  %v422_v55 = vld [vmem:[%s6804_s17 + $0xa8] sm:$0xff]  ;;  %s8123_s13 = scalar_lea.vmem [#allocation11], %s5221_s19 }
  0x68   : > { %351 = vst [vmem:[#allocation2 + $0x20] sm:$0xff] %v6540_v1  ;;  %352 = vst [vmem:[#allocation2 + $0x28] sm:$0x3] %v6540_v1  ;;  %v1384_v54 = vld [vmem:[#allocation6 + $0xa0] sm:$0xff]  ;;  %v423_v56 = vld [vmem:[%s6804_s17 + $0xb0] sm:$0xff]  ;;  %s5234_s16 = sshll.u32 %s6605_s28, 12 }
  0x69   : > { %353 = vst [vmem:[#allocation2 + $0x30] sm:$0xff] %v6540_v1  ;;  %354 = vst [vmem:[#allocation2 + $0x38] sm:$0xff] %v6540_v1  ;;  %v1385_v57 = vld [vmem:[#allocation6 + $0xa8] sm:$0xff]  ;;  %v424_v58 = vld [vmem:[%s6804_s17 + $0xb8] sm:$0xff]  ;;  %s5129_s18 = sshll.u32 %s8123_s13, 4  ;;  %s8241_s20 = scalar_lea.hbm %s8297_s7, %s5234_s16  ;;  %s8243_s18 = int_to_ptr.vmem [resolvable:$true] %s5129_s18 }
  0x6a   : > { %355 = vst [vmem:[#allocation2 + $0x40] sm:$0x3] %v6540_v1  ;;  %356 = vst [vmem:[#allocation2 + $0x48] sm:$0xff] %v6540_v1  ;;  %5508 = vmatpush1.bf16.msra.mxu0 %v5507_v31  ;;  %v425_v59 = vld [vmem:[%s6804_s17 + $0xc0] sm:$0xff]  ;;  %v426_v60 = vld [vmem:[%s6804_s17 + $0xc8] sm:$0xff]  ;;  %v5522_v61 = vpack.c.bf16 %v1385_v57, %v1384_v54  ;;  %s8249_s28 = scalar_lea.sflag [#allocation8], %s299_s9 }
  0x6b   : > { %357 = vst [vmem:[#allocation2 + $0x50] sm:$0xff] %v6540_v1  ;;  %358 = vst [vmem:[#allocation2 + $0x58] sm:$0x3] %v6540_v1  ;;  %5509 = vmatprep.subr.bf16.mxu0 %v8301_v0  ;;  %v1386_v62 = vld [vmem:[#allocation6 + $0xb0] sm:$0xff]  ;;  %v1387_v63 = vld [vmem:[#allocation6 + $0xb8] sm:$0xff]  ;;  %s6463_s21 = scalar_lea.vmem %s8243_s18, 4096 }
  0x6c   : > { %359 = vst [vmem:[#allocation2 + $0x60] sm:$0xff] %v6540_v1  ;;  %360 = vst [vmem:[#allocation2 + $0x68] sm:$0xff] %v6540_v1  ;;  %v5525_v2 = vpack.c.bf16 %v1387_v63, %v1386_v62  ;;  %v1388_v3 = vld [vmem:[#allocation6 + $0xc0] sm:$0xff]  ;;  %v1389_v4 = vld [vmem:[#allocation6 + $0xc8] sm:$0xff]  ;;  %p6464_p10 = scmp.ne.s32.totalorder %s8243_s18, %s6463_s21  ;;  %p8405_p1 = scmp.ne.s32.totalorder %s8343_s11, 0 }
  0x6d   : > { %361 = vst [vmem:[#allocation2 + $0x70] sm:$0x3] %v6540_v1  ;;  %362 = vst [vmem:[#allocation2 + $0x78] sm:$0xff] %v6540_v1  ;;  %v5528_v5 = vpack.c.bf16 %v1389_v4, %v1388_v3  ;;  %v427_v6 = vld [vmem:[%s6804_s17 + $0xd0] sm:$0xff]  ;;  %v428_v7 = vld [vmem:[%s6804_s17 + $0xd8] sm:$0xff]  ;;  %s6541_s22 = smov [#allocation11]  }
  0x6e   : > { %363 = vst [vmem:[#allocation2 + $0x80] sm:$0xff] %v6540_v1  ;;  %364 = vst [vmem:[#allocation2 + $0x88] sm:$0x3] %v6540_v1  ;;  %5511 = vmatpush1.bf16.msra.mxu0 %v5510_v36  ;;  %v1390_v8 = vld [vmem:[#allocation6 + $0xd0] sm:$0xff]  ;;  %v1391_v9 = vld [vmem:[#allocation6 + $0xd8] sm:$0xff]  ;;  %p6465_p2 = pnand %p6464_p10, %p8405_p1  ;;  %s6467_s23 = sshll.u32 %s6541_s22, 4  ;;  %s6468_s23 = int_to_ptr.vmem [resolvable:$false] %s6467_s23 }
  0x6f   : > { %365 = vst [vmem:[#allocation2 + $0x90] sm:$0xff] %v6540_v1  ;;  %366 = vst [vmem:[#allocation2 + $0x98] sm:$0xff] %v6540_v1  ;;  %5512 = vmatprep.subr.bf16.mxu0 %v8301_v0  ;;  %v429_v10 = vld [vmem:[%s6804_s17 + $0xe0] sm:$0xff]  ;;  %v5531_v11 = vpack.c.bf16 %v1391_v9, %v1390_v8  ;;  %v1393_v13 = vld [vmem:[#allocation6 + $0xe8] sm:$0xff]  ;;  %s6469_s29 = scalar_lea.vmem %s6468_s23, 8192  ;;  %p6470_p4 = scmp.lt.s32.totalorder %s8243_s18, %s6468_s23 }
  0x70   : > { %367 = vst [vmem:[#allocation2 + $0xa0] sm:$0x3] %v6540_v1  ;;  %368 = vst [vmem:[#allocation2 + $0xa8] sm:$0xff] %v6540_v1  ;;  %v1392_v12 = vld [vmem:[#allocation6 + $0xe0] sm:$0xff]  ;;  %v430_v14 = vld [vmem:[%s6804_s17 + $0xe8] sm:$0xff]  ;;  %p6466_p3 = pneg %p6465_p2  ;;  %p6471_p7 = scmp.lt.s32.totalorder %s6469_s29, %s6463_s21 }
  0x71   : > { %369 = vst [vmem:[#allocation2 + $0xb0] sm:$0xff] %v6540_v1  ;;  %370 = vst [vmem:[#allocation2 + $0xb8] sm:$0x3] %v6540_v1  ;;  %v5534_v15 = vpack.c.bf16 %v1393_v13, %v1392_v12  ;;  %v1394_v16 = vld [vmem:[#allocation6 + $0xf0] sm:$0xff]  ;;  %v1399_v24 = vld [vmem:[#allocation6 + $0x118] sm:$0xff] }
  0x72   : > { %371 = vst [vmem:[#allocation2 + $0xc0] sm:$0xff] %v6540_v1  ;;  %372 = vst [vmem:[#allocation2 + $0xc8] sm:$0xff] %v6540_v1  ;;  %5514 = vmatpush1.bf16.msra.mxu0 %v5513_v39  ;;  %v564_v22 = vld [vmem:[#allocation2 + $0x9] sm:$0xff]  ;;  %v1403_v33 = vld [vmem:[#allocation6 + $0x138] sm:$0xff]  ;;  %p6472_p8 = por %p6471_p7, %p6470_p4 }
  0x73   : > { %373 = vst [vmem:[#allocation2 + $0xd0] sm:$0x3] %v6540_v1  ;;  %374 = vst [vmem:[#allocation2 + $0xd8] sm:$0xff] %v6540_v1  ;;  %5515 = vmatprep.subr.bf16.mxu0 %v8301_v0  ;;  %v1404_v36 = vld [vmem:[#allocation6 + $0x140] sm:$0xff]  ;;  %v1405_v37 = vld [vmem:[#allocation6 + $0x148] sm:$0xff] }
  0x74   : > { %375 = vst [vmem:[#allocation2 + $0xe0] sm:$0xff] %v6540_v1  ;;  %376 = vst [vmem:[#allocation2 + $0xe8] sm:$0x3] %v6540_v1  ;;  %v5552_v39 = vpack.c.bf16 %v1405_v37, %v1404_v36  ;;  %v1409_v48 = vld [vmem:[#allocation6 + $0x168] sm:$0xff]  ;;  %v1412_v57 = vld [vmem:[#allocation6 + $0x180] sm:$0xff]  ;;  %p6473_p11 = pnand %p6472_p8, %p6466_p3 }
  0x75   : > { %377 = vst [vmem:[#allocation2 + $0xf0] sm:$0xff] %v6540_v1  ;;  %378 = vst [vmem:[#allocation2 + $0xf8] sm:$0xff] %v6540_v1  ;;  %v1414_v62 = vld [vmem:[#allocation6 + $0x190] sm:$0xff]  ;;  %v1415_v63 = vld [vmem:[#allocation6 + $0x198] sm:$0xff] }
  0x76   : > { %379 = vst [vmem:[#allocation2 + $0x100] sm:$0x3] %v6540_v1  ;;  %380 = vst [vmem:[#allocation2 + $0x108] sm:$0xff] %v6540_v1  ;;  %5517 = vmatpush1.bf16.msra.mxu0 %v5516_v44  ;;  %v5567_v3 = vpack.c.bf16 %v1415_v63, %v1414_v62 }
  0x77   : > { %381 = vst [vmem:[#allocation2 + $0x110] sm:$0xff] %v6540_v1  ;;  %382 = vst [vmem:[#allocation2 + $0x118] sm:$0x3] %v6540_v1  ;;  %5518 = vmatprep.subr.bf16.mxu0 %v8301_v0 }
  0x78   : > { %383 = vst [vmem:[#allocation2 + $0x120] sm:$0xff] %v6540_v1  ;;  %384 = vst [vmem:[#allocation2 + $0x128] sm:$0xff] %v6540_v1 }
  0x79   : > { %385 = vst [vmem:[#allocation2 + $0x130] sm:$0x3] %v6540_v1  ;;  %386 = vst [vmem:[#allocation2 + $0x138] sm:$0xff] %v6540_v1 }
  0x7a   : > { %387 = vst [vmem:[#allocation2 + $0x140] sm:$0xff] %v6540_v1  ;;  %388 = vst [vmem:[#allocation2 + $0x148] sm:$0x3] %v6540_v1  ;;  %5520 = vmatpush1.bf16.msra.mxu0 %v5519_v53  ;;  %v1411_v53 = vld [vmem:[#allocation6 + $0x178] sm:$0xff] }
  0x7b   : > { %389 = vst [vmem:[#allocation2 + $0x150] sm:$0xff] %v6540_v1  ;;  %390 = vst [vmem:[#allocation2 + $0x158] sm:$0xff] %v6540_v1  ;;  %5521 = vmatprep.subr.bf16.mxu0 %v8301_v0 }
  0x7c   : > { %391 = vst [vmem:[#allocation2 + $0x160] sm:$0x3] %v6540_v1  ;;  %392 = vst [vmem:[#allocation2 + $0x168] sm:$0xff] %v6540_v1 }
  0x7d   : > { %393 = vst [vmem:[#allocation2 + $0x170] sm:$0xff] %v6540_v1  ;;  %394 = vst [vmem:[#allocation2 + $0x178] sm:$0x3] %v6540_v1 }
  0x7e   : > { %395 = vst [vmem:[#allocation2 + $0x180] sm:$0xff] %v6540_v1  ;;  %396 = vst [vmem:[#allocation2 + $0x188] sm:$0xff] %v6540_v1  ;;  %5523 = vmatpush1.bf16.msra.mxu0 %v5522_v61 }
  0x7f   : > { %397 = vst [vmem:[#allocation2 + $0x190] sm:$0x3] %v6540_v1  ;;  %398 = vst [vmem:[#allocation2 + $0x198] sm:$0xff] %v6540_v1  ;;  %5524 = vmatprep.subr.bf16.mxu0 %v8301_v0 }
  0x80   : > { %399 = vst [vmem:[#allocation2 + $0x1a0] sm:$0xff] %v6540_v1  ;;  %400 = vst [vmem:[#allocation2 + $0x1a8] sm:$0x3] %v6540_v1 }
  0x81   : > { %435 = vst.msk [vmem:[#allocation2 + $0x19] sm:$0xff] %vm434_vm0, %v401_v17  ;;  %467 = vst.msk [vmem:[#allocation5] sm:$0xff] %vm434_vm0, %v401_v17  ;;  %v1395_v17 = vld [vmem:[#allocation6 + $0xf8] sm:$0xff] }
  0x82   : > { %436 = vst.msk [vmem:[#allocation2 + $0x21] sm:$0xff] %vm434_vm0, %v402_v18  ;;  %468 = vst.msk [vmem:[#allocation5 + $0x8] sm:$0xff] %vm434_vm0, %v402_v18  ;;  %5526 = vmatpush1.bf16.msra.mxu0 %v5525_v2  ;;  %v5537_v18 = vpack.c.bf16 %v1395_v17, %v1394_v16  ;;  %v1421_v16 = vld [vmem:[#allocation6 + $0x1c8] sm:$0xff] }
  0x83   : > { %437 = vst.msk [vmem:[#allocation2 + $0x31] sm:$0xff] %vm434_vm0, %v403_v19  ;;  %469 = vst.msk [vmem:[#allocation5 + $0x10] sm:$0xff] %vm434_vm0, %v403_v19  ;;  %5527 = vmatprep.subr.bf16.mxu0 %v8301_v0  ;;  %v1396_v19 = vld [vmem:[#allocation6 + $0x100] sm:$0xff] }
  0x84   : > { %438 = vst.msk [vmem:[#allocation2 + $0x39] sm:$0xff] %vm434_vm0, %v404_v20  ;;  %470 = vst.msk [vmem:[#allocation5 + $0x18] sm:$0xff] %vm434_vm0, %v404_v20  ;;  %v1397_v20 = vld [vmem:[#allocation6 + $0x108] sm:$0xff] }
  0x85   : > { %439 = vst.msk [vmem:[#allocation2 + $0x49] sm:$0xff] %vm434_vm0, %v405_v21  ;;  %471 = vst.msk [vmem:[#allocation5 + $0x20] sm:$0xff] %vm434_vm0, %v405_v21  ;;  %v5540_v21 = vpack.c.bf16 %v1397_v20, %v1396_v19  ;;  %v1422_v20 = vld [vmem:[#allocation6 + $0x1d0] sm:$0xff] }
  0x86   : > { %440 = vst.msk [vmem:[#allocation2 + $0x51] sm:$0xff] %vm434_vm0, %v406_v23  ;;  %472 = vst.msk [vmem:[#allocation5 + $0x28] sm:$0xff] %vm434_vm0, %v406_v23  ;;  %5529 = vmatpush1.bf16.msra.mxu0 %v5528_v5  ;;  %v1398_v23 = vld [vmem:[#allocation6 + $0x110] sm:$0xff]  ;;  %v1416_v5 = vld [vmem:[#allocation6 + $0x1a0] sm:$0xff] }
  0x87   : > { %441 = vst.msk [vmem:[#allocation2 + $0x61] sm:$0xff] %vm434_vm0, %v407_v26  ;;  %473 = vst.msk [vmem:[#allocation5 + $0x30] sm:$0xff] %vm434_vm0, %v407_v26  ;;  %5530 = vmatprep.subr.bf16.mxu0 %v8301_v0  ;;  %v5543_v25 = vpack.c.bf16 %v1399_v24, %v1398_v23 }
  0x88   : > { %442 = vst.msk [vmem:[#allocation2 + $0x69] sm:$0xff] %vm434_vm0, %v408_v27  ;;  %474 = vst.msk [vmem:[#allocation5 + $0x38] sm:$0xff] %vm434_vm0, %v408_v27  ;;  %v6911_v26 = vld [vmem:[#allocation2 + $0x19] sm:$0xff] }
  0x89   : > { %443 = vst.msk [vmem:[#allocation2 + $0x79] sm:$0xff] %vm434_vm0, %v409_v28  ;;  %475 = vst.msk [vmem:[#allocation5 + $0x40] sm:$0xff] %vm434_vm0, %v409_v28  ;;  %v1400_v27 = vld [vmem:[#allocation6 + $0x120] sm:$0xff]  ;;  %v1401_v28 = vld [vmem:[#allocation6 + $0x128] sm:$0xff] }
  0x8a   : > { %444 = vst.msk [vmem:[#allocation2 + $0x81] sm:$0xff] %vm434_vm0, %v410_v29  ;;  %476 = vst.msk [vmem:[#allocation5 + $0x48] sm:$0xff] %vm434_vm0, %v410_v29  ;;  %5532 = vmatpush1.bf16.msra.mxu0 %v5531_v11  ;;  %v6916_v29 = vld [vmem:[#allocation2 + $0x18] sm:$0xff]  ;;  %v6918_v31 = vld [vmem:[#allocation2 + $0x21] sm:$0xff] }
  0x8b   : > { %445 = vst.msk [vmem:[#allocation2 + $0x91] sm:$0xff] %vm434_vm0, %v411_v30  ;;  %477 = vst.msk [vmem:[#allocation5 + $0x50] sm:$0xff] %vm434_vm0, %v411_v30  ;;  %5533 = vmatprep.subr.bf16.mxu0 %v8301_v0  ;;  %v5546_v30 = vpack.c.bf16 %v1401_v28, %v1400_v27  ;;  %v6923_v34 = vld [vmem:[#allocation2 + $0x20] sm:$0xff]  ;;  %v6930_v38 = vld [vmem:[#allocation2 + $0x30] sm:$0xff] }
  0x8c   : > { %446 = vst.msk [vmem:[#allocation2 + $0x99] sm:$0xff] %vm434_vm0, %v412_v32  ;;  %478 = vst.msk [vmem:[#allocation5 + $0x58] sm:$0xff] %vm434_vm0, %v412_v32  ;;  %v1402_v32 = vld [vmem:[#allocation6 + $0x130] sm:$0xff]  ;;  %v6934_v41 = vld [vmem:[#allocation2 + $0x39] sm:$0xff] }
  0x8d   : > { %447 = vst.msk [vmem:[#allocation2 + $0xa9] sm:$0xff] %vm434_vm0, %v413_v35  ;;  %479 = vst.msk [vmem:[#allocation5 + $0x60] sm:$0xff] %vm434_vm0, %v413_v35  ;;  %v6925_v35 = vld [vmem:[#allocation2 + $0x31] sm:$0xff]  ;;  %v1425_v27 = vld [vmem:[#allocation6 + $0x1e8] sm:$0xff] }
  0x8e   : > { %448 = vst.msk [vmem:[#allocation2 + $0xb1] sm:$0xff] %vm434_vm0, %v414_v42  ;;  %480 = vst.msk [vmem:[#allocation5 + $0x68] sm:$0xff] %vm434_vm0, %v414_v42  ;;  %5535 = vmatpush1.bf16.msra.mxu0 %v5534_v15  ;;  %v6932_v40 = vld [vmem:[#allocation2 + $0x32] sm:$0xff]  ;;  %v1420_v15 = vld [vmem:[#allocation6 + $0x1c0] sm:$0xff] }
  0x8f   : > { %449 = vst.msk [vmem:[#allocation2 + $0xc1] sm:$0xff] %vm434_vm0, %v415_v43  ;;  %481 = vst.msk [vmem:[#allocation5 + $0x70] sm:$0xff] %vm434_vm0, %v415_v43  ;;  %5536 = vmatprep.subr.bf16.mxu0 %v8301_v0  ;;  %v1406_v42 = vld [vmem:[#allocation6 + $0x150] sm:$0xff]  ;;  %v1407_v43 = vld [vmem:[#allocation6 + $0x158] sm:$0xff]  ;;  %5363 = vmatprep.mubr.f32.mxu1 %v6932_v40 }
  0x90   : > { %450 = vst.msk [vmem:[#allocation2 + $0xc9] sm:$0xff] %vm434_vm0, %v416_v46  ;;  %482 = vst.msk [vmem:[#allocation5 + $0x78] sm:$0xff] %vm434_vm0, %v416_v46  ;;  %v6940_v44 = vld [vmem:[#allocation2 + $0x38] sm:$0xff]  ;;  %v5555_v45 = vpack.c.bf16 %v1407_v43, %v1406_v42  ;;  %v6942_v46 = vld [vmem:[#allocation2 + $0x49] sm:$0xff] }
  0x91   : > { %451 = vst.msk [vmem:[#allocation2 + $0xd9] sm:$0xff] %vm434_vm0, %v417_v47  ;;  %483 = vst.msk [vmem:[#allocation5 + $0x80] sm:$0xff] %vm434_vm0, %v417_v47  ;;  %v1408_v47 = vld [vmem:[#allocation6 + $0x160] sm:$0xff]  ;;  %v6954_v54 = vld [vmem:[#allocation2 + $0x50] sm:$0xff] }
  0x92   : > { %452 = vst.msk [vmem:[#allocation2 + $0xe1] sm:$0xff] %vm434_vm0, %v418_v49  ;;  %484 = vst.msk [vmem:[#allocation5 + $0x88] sm:$0xff] %vm434_vm0, %v418_v49  ;;  %5538 = vmatpush1.bf16.msra.mxu0 %v5537_v18  ;;  %v6947_v49 = vld [vmem:[#allocation2 + $0x48] sm:$0xff]  ;;  %v6970_v4 = vld [vmem:[#allocation2 + $0x79] sm:$0xff]  ;;  %v5576_v18 = vpack.c.bf16 %v1421_v16, %v1420_v15 }
  0x93   : > { %453 = vst.msk [vmem:[#allocation2 + $0xf1] sm:$0xff] %vm434_vm0, %v419_v50  ;;  %485 = vst.msk [vmem:[#allocation5 + $0x90] sm:$0xff] %vm434_vm0, %v419_v50  ;;  %5539 = vmatprep.subr.bf16.mxu0 %v8301_v0  ;;  %v5558_v50 = vpack.c.bf16 %v1409_v48, %v1408_v47  ;;  %v6963_v61 = vld [vmem:[#allocation2 + $0x69] sm:$0xff]  ;;  %v6977_v9 = vld [vmem:[#allocation2 + $0x81] sm:$0xff] }
  0x94   : > { %454 = vst.msk [vmem:[#allocation2 + $0xf9] sm:$0xff] %vm434_vm0, %v420_v51  ;;  %486 = vst.msk [vmem:[#allocation5 + $0x98] sm:$0xff] %vm434_vm0, %v420_v51  ;;  %v6949_v51 = vld [vmem:[#allocation2 + $0x51] sm:$0xff]  ;;  %v6968_v2 = vld [vmem:[#allocation2 + $0x68] sm:$0xff] }
  0x95   : > { %455 = vst.msk [vmem:[#allocation2 + $0x109] sm:$0xff] %vm434_vm0, %v421_v52  ;;  %487 = vst.msk [vmem:[#allocation5 + $0xa0] sm:$0xff] %vm434_vm0, %v421_v52  ;;  %1573 = vmatmul.mubr.f32.vlgmr.msra.gmra.mrb[0].mxu0 %v6540_v1  ;;  %v1410_v52 = vld [vmem:[#allocation6 + $0x170] sm:$0xff]  ;;  %v1419_v11 = vld [vmem:[#allocation6 + $0x1b8] sm:$0xff] }
  0x96   : > { %456 = vst.msk [vmem:[#allocation2 + $0x111] sm:$0xff] %vm434_vm0, %v422_v55  ;;  %488 = vst.msk [vmem:[#allocation5 + $0xa8] sm:$0xff] %vm434_vm0, %v422_v55  ;;  %5541 = vmatpush1.bf16.msra.mxu0 %v5540_v21  ;;  %1577 = vmatprep.mubr.f32.mxu0 %v564_v22  ;;  %v5561_v55 = vpack.c.bf16 %v1411_v53, %v1410_v52  ;;  %v6982_v12 = vld [vmem:[#allocation2 + $0x80] sm:$0xff]  ;;  %v6989_v17 = vld [vmem:[#allocation2 + $0x90] sm:$0xff] }
  0x97   : > { %457 = vst.msk [vmem:[#allocation2 + $0x121] sm:$0xff] %vm434_vm0, %v423_v56  ;;  %489 = vst.msk [vmem:[#allocation5 + $0xb0] sm:$0xff] %vm434_vm0, %v423_v56  ;;  %5542 = vmatprep.subr.bf16.mxu0 %v8301_v0  ;;  %v6956_v56 = vld [vmem:[#allocation2 + $0x61] sm:$0xff]  ;;  %v6991_v19 = vld [vmem:[#allocation2 + $0x99] sm:$0xff] }
  0x98   : > { %458 = vst.msk [vmem:[#allocation2 + $0x129] sm:$0xff] %vm434_vm0, %v424_v58  ;;  %490 = vst.msk [vmem:[#allocation5 + $0xb8] sm:$0xff] %vm434_vm0, %v424_v58  ;;  %v1413_v58 = vld [vmem:[#allocation6 + $0x188] sm:$0xff]  ;;  %v1423_v21 = vld [vmem:[#allocation6 + $0x1d8] sm:$0xff] }
  0x99   : > { %459 = vst.msk [vmem:[#allocation2 + $0x139] sm:$0xff] %vm434_vm0, %v425_v59  ;;  %491 = vst.msk [vmem:[#allocation5 + $0xc0] sm:$0xff] %vm434_vm0, %v425_v59  ;;  %1578 = vmatmul.mubr.f32.gmra.mrb[2].mxu0 %v6540_v1  ;;  %v5549_v1 = vpack.c.bf16 %v1403_v33, %v1402_v32  ;;  %v6961_v59 = vld [vmem:[#allocation2 + $0x60] sm:$0xff]  ;;  %v6996_v22 = vld [vmem:[#allocation2 + $0x98] sm:$0xff]  ;;  %v5579_v23 = vpack.c.bf16 %v1423_v21, %v1422_v20 }
  0x9a   : > { %460 = vst.msk [vmem:[#allocation2 + $0x141] sm:$0xff] %vm434_vm0, %v426_v60  ;;  %492 = vst.msk [vmem:[#allocation5 + $0xc8] sm:$0xff] %vm434_vm0, %v426_v60  ;;  %1582 = vmatprep.mubr.f32.mxu0 %v6911_v26  ;;  %5544 = vmatpush1.bf16.msra.mxu0 %v5543_v25  ;;  %v5564_v60 = vpack.c.bf16 %v1413_v58, %v1412_v57  ;;  %v6998_v24 = vld [vmem:[#allocation2 + $0xa9] sm:$0xff]  ;;  %v1424_v25 = vld [vmem:[#allocation6 + $0x1e0] sm:$0xff] }
  0x9b   : > { %461 = vst.msk [vmem:[#allocation2 + $0x151] sm:$0xff] %vm434_vm0, %v427_v6  ;;  %493 = vst.msk [vmem:[#allocation5 + $0xd0] sm:$0xff] %vm434_vm0, %v427_v6  ;;  %5545 = vmatprep.subr.bf16.mxu0 %v8301_v0  ;;  %v1417_v6 = vld [vmem:[#allocation6 + $0x1a8] sm:$0xff]  ;;  %v7005_v32 = vld [vmem:[#allocation2 + $0xb1] sm:$0xff] }
  0x9c   : > { %462 = vst.msk [vmem:[#allocation2 + $0x159] sm:$0xff] %vm434_vm0, %v428_v7  ;;  %494 = vst.msk [vmem:[#allocation5 + $0xd8] sm:$0xff] %vm434_vm0, %v428_v7  ;;  %v6975_v7 = vld [vmem:[#allocation2 + $0x78] sm:$0xff]  ;;  %v5570_v8 = vpack.c.bf16 %v1417_v6, %v1416_v5  ;;  %v7003_v28 = vld [vmem:[#allocation2 + $0xa8] sm:$0xff] }
  0x9d   : > { %463 = vst.msk [vmem:[#allocation2 + $0x169] sm:$0xff] %vm434_vm0, %v429_v10  ;;  %495 = vst.msk [vmem:[#allocation5 + $0xe0] sm:$0xff] %vm434_vm0, %v429_v10  ;;  %1583 = vmatmul.mubr.f32.gmra.mrb[4].mxu0 %v6916_v29  ;;  %v1418_v10 = vld [vmem:[#allocation6 + $0x1b0] sm:$0xff]  ;;  %v7017_v42 = vld [vmem:[#allocation2 + $0xc0] sm:$0xff] }
  0x9e   : > { %464 = vst.msk [vmem:[#allocation2 + $0x171] sm:$0xff] %vm434_vm0, %v430_v14  ;;  %496 = vst.msk [vmem:[#allocation5 + $0xe8] sm:$0xff] %vm434_vm0, %v430_v14  ;;  %1587 = vmatprep.mubr.f32.mxu0 %v6918_v31  ;;  %5547 = vmatpush1.bf16.msra.mxu0 %v5546_v30  ;;  %v5573_v13 = vpack.c.bf16 %v1419_v11, %v1418_v10  ;;  %v6984_v14 = vld [vmem:[#allocation2 + $0x91] sm:$0xff]  ;;  %v5582_v30 = vpack.c.bf16 %v1425_v27, %v1424_v25  ;;  %v7019_v43 = vld [vmem:[#allocation2 + $0xc9] sm:$0xff] }
  0x9f   : > { %5548 = vmatprep.subr.bf16.mxu0 %v8301_v0  ;;  %v1426_v33 = vld [vmem:[#allocation6 + $0x1f0] sm:$0xff]  ;;  %v7026_v47 = vld [vmem:[#allocation2 + $0xd9] sm:$0xff]  ;;  %v7054_v62 = vld [vmem:[#allocation2 + $0x108] sm:$0xff] }
  0xa0   : > { %v7010_v36 = vld [vmem:[#allocation2 + $0xb0] sm:$0xff]  ;;  %v7030_v48 = vld [vmem:[#allocation2 + $0xd8] sm:$0xff]  ;;  %v7036_v52 = vld [vmem:[#allocation2 + $0xe0] sm:$0xff] }
  0xa1   : > { %1588 = vmatmul.mubr.f32.gmra.mrb[6].mxu0 %v6923_v34  ;;  %v7038_v53 = vld [vmem:[#allocation2 + $0xf1] sm:$0xff]  ;;  %v7044_v57 = vld [vmem:[#allocation2 + $0xf9] sm:$0xff]  ;;  %v7062_v5 = vld [vmem:[#allocation2 + $0x121] sm:$0xff] }
  0xa2   : > { %1592 = vmatprep.mubr.f32.mxu0 %v6925_v35  ;;  %5550 = vmatpush1.bf16.msra.mxu0 %v5549_v1  ;;  %v1427_v1 = vld [vmem:[#allocation6 + $0x1f8] sm:$0xff]  ;;  %8353 = vst [vmem:[#allocation17_spill] sm:$0xff] %v7062_v5  ;;  %v7066_v6 = vld [vmem:[#allocation2 + $0x120] sm:$0xff]  ;;  %v7072_v10 = vld [vmem:[#allocation2 + $0x128] sm:$0xff] }
  0xa3   : > { %5551 = vmatprep.subr.bf16.mxu0 %v8301_v0  ;;  %v5585_v37 = vpack.c.bf16 %v1427_v1, %v1426_v33  ;;  %v7048_v58 = vld [vmem:[#allocation2 + $0xf8] sm:$0xff]  ;;  %v7080_v15 = vld [vmem:[#allocation2 + $0x141] sm:$0xff]  ;;  %v7090_v20 = vld [vmem:[#allocation2 + $0x150] sm:$0xff] }
  0xa4   : > { %v7056_v63 = vld [vmem:[#allocation2 + $0x111] sm:$0xff]  ;;  %v7074_v11 = vld [vmem:[#allocation2 + $0x139] sm:$0xff]  ;;  %8356 = vst [vmem:[#allocation20_spill] sm:$0xff] %v7080_v15  ;;  %v7101_v27 = vld [vmem:[#allocation2 + $0x169] sm:$0xff] }
  0xa5   : > { %1593 = vmatmul.mubr.f32.gmra.mrb[8].mxu0 %v6930_v38  ;;  %8352 = vst [vmem:[#allocation16_spill] sm:$0xff] %v7056_v63  ;;  %8355 = vst [vmem:[#allocation19_spill] sm:$0xff] %v7074_v11  ;;  %v7084_v16 = vld [vmem:[#allocation2 + $0x140] sm:$0xff]  ;;  %v7099_v25 = vld [vmem:[#allocation2 + $0x158] sm:$0xff] }
  0xa6   : > { %1597 = vmatprep.mubr.f32.mxu0 %v6934_v41  ;;  %5553 = vmatpush1.bf16.msra.mxu0 %v5552_v39  ;;  %v7012_v39 = vld [vmem:[#allocation2 + $0xc1] sm:$0xff]  ;;  %v7092_v21 = vld [vmem:[#allocation2 + $0x159] sm:$0xff]  ;;  %8359 = vst [vmem:[#allocation23_spill] sm:$0xff] %v7101_v27  ;;  %v7110_v1 = vld [vmem:[#allocation2 + $0x171] sm:$0xff] }
  0xa7   : > { %5554 = vmatprep.subr.bf16.mxu0 %v8301_v0  ;;  %8358 = vst [vmem:[#allocation22_spill] sm:$0xff] %v7092_v21  ;;  %v7108_v33 = vld [vmem:[#allocation2 + $0x168] sm:$0xff]  ;;  %8360 = vst [vmem:[#allocation24_spill] sm:$0xff] %v7110_v1 }
  0xa9   : > { %1598 = vmatmul.mubr.f32.gmra.mrb[10].mxu0 %v6940_v44 }
  0xaa   : > { %1602 = vmatprep.mubr.f32.mxu0 %v6942_v46  ;;  %5556 = vmatpush1.bf16.msra.mxu0 %v5555_v45  ;;  %v7024_v45 = vld [vmem:[#allocation2 + $0xc8] sm:$0xff] }
  0xab   : > { %5557 = vmatprep.subr.bf16.mxu0 %v8301_v0 }
  0xad   : > { %1603 = vmatmul.mubr.f32.gmra.mrb[12].mxu0 %v6947_v49 }
  0xae   : > { %1607 = vmatprep.mubr.f32.mxu0 %v6949_v51  ;;  %5559 = vmatpush1.bf16.msra.mxu0 %v5558_v50  ;;  %v7032_v50 = vld [vmem:[#allocation2 + $0xe1] sm:$0xff] }
  0xaf   : > { %5560 = vmatprep.subr.bf16.mxu0 %v8301_v0 }
  0xb1   : > { %1608 = vmatmul.mubr.f32.gmra.mrb[14].mxu0 %v6954_v54 }
  0xb2   : > { %1612 = vmatprep.mubr.f32.mxu0 %v6956_v56  ;;  %5562 = vmatpush1.bf16.msra.mxu0 %v5561_v55  ;;  %v7042_v55 = vld [vmem:[#allocation2 + $0xf0] sm:$0xff] }
  0xb3   : > { %5563 = vmatprep.subr.bf16.mxu0 %v8301_v0 }
  0xb5   : > { %1613 = vmatmul.mubr.f32.gmra.mrb[16].mxu0 %v6961_v59 }
  0xb6   : > { %1617 = vmatprep.mubr.f32.mxu0 %v6963_v61  ;;  %5565 = vmatpush1.bf16.msra.mxu0 %v5564_v60  ;;  %v7050_v60 = vld [vmem:[#allocation2 + $0x109] sm:$0xff] }
  0xb7   : > { %5566 = vmatprep.subr.bf16.mxu0 %v8301_v0 }
  0xb9   : > { %1618 = vmatmul.mubr.f32.gmra.mrb[18].mxu0 %v6968_v2 }
  0xba   : > { %1622 = vmatprep.mubr.f32.mxu0 %v6970_v4  ;;  %5568 = vmatpush1.bf16.msra.mxu0 %v5567_v3  ;;  %v7060_v3 = vld [vmem:[#allocation2 + $0x110] sm:$0xff] }
  0xbb   : > { %5569 = vmatprep.subr.bf16.mxu0 %v8301_v0 }
  0xbd   : > { %1623 = vmatmul.mubr.f32.gmra.mrb[20].mxu0 %v6975_v7 }
  0xbe   : > { %1627 = vmatprep.mubr.f32.mxu0 %v6977_v9  ;;  %5571 = vmatpush1.bf16.msra.mxu0 %v5570_v8  ;;  %v7068_v8 = vld [vmem:[#allocation2 + $0x129] sm:$0xff] }
  0xbf   : > { %5572 = vmatprep.subr.bf16.mxu0 %v8301_v0  ;;  %8354 = vst [vmem:[#allocation18_spill] sm:$0xff] %v7068_v8 }
  0xc1   : > { %1628 = vmatmul.mubr.f32.gmra.mrb[22].mxu0 %v6982_v12 }
  0xc2   : > { %1632 = vmatprep.mubr.f32.mxu0 %v6984_v14  ;;  %5574 = vmatpush1.bf16.msra.mxu0 %v5573_v13  ;;  %v7078_v13 = vld [vmem:[#allocation2 + $0x138] sm:$0xff] }
  0xc3   : > { %5575 = vmatprep.subr.bf16.mxu0 %v8301_v0 }
  0xc5   : > { %1633 = vmatmul.mubr.f32.gmra.mrb[24].mxu0 %v6989_v17 }
  0xc6   : > { %1637 = vmatprep.mubr.f32.mxu0 %v6991_v19  ;;  %5577 = vmatpush1.bf16.msra.mxu0 %v5576_v18  ;;  %v7086_v18 = vld [vmem:[#allocation2 + $0x151] sm:$0xff] }
  0xc7   : > { %5578 = vmatprep.subr.bf16.mxu0 %v8301_v0  ;;  %8357 = vst [vmem:[#allocation21_spill] sm:$0xff] %v7086_v18 }
  0xc9   : > { %1638 = vmatmul.mubr.f32.gmra.mrb[26].mxu0 %v6996_v22 }
  0xca   : > { %1642 = vmatprep.mubr.f32.mxu0 %v6998_v24  ;;  %5580 = vmatpush1.bf16.msra.mxu0 %v5579_v23  ;;  %v431_v23 = vld [vmem:[%s6804_s17 + $0xf0] sm:$0xff] }
  0xcb   : > { %5581 = vmatprep.subr.bf16.mxu0 %v8301_v0  ;;  %465 = vst.msk [vmem:[#allocation2 + $0x181] sm:$0xff] %vm434_vm0, %v431_v23  ;;  %497 = vst.msk [vmem:[#allocation5 + $0xf0] sm:$0xff] %vm434_vm0, %v431_v23  ;;  %v1428_v23 = vld [vmem:[#allocation6 + $0x200] sm:$0xff] }
  0xcd   : > { %1643 = vmatmul.mubr.f32.gmra.mrb[28].mxu0 %v7003_v28 }
  0xce   : > { %1647 = vmatprep.mubr.f32.mxu0 %v7005_v32  ;;  %5583 = vmatpush1.bf16.msra.mxu0 %v5582_v30  ;;  %v432_v30 = vld [vmem:[%s6804_s17 + $0xf8] sm:$0xff] }
  0xcf   : > { %5584 = vmatprep.subr.bf16.mxu0 %v8301_v0  ;;  %466 = vst.msk [vmem:[#allocation2 + $0x189] sm:$0xff] %vm434_vm0, %v432_v30  ;;  %498 = vst.msk [vmem:[#allocation5 + $0xf8] sm:$0xff] %vm434_vm0, %v432_v30  ;;  %v627_v30 = vld [vmem:[#allocation2 + $0x2] sm:$0xff] }
  0xd1   : > { %1648 = vmatmul.mubr.f32.gmra.mrb[30].mxu0 %v7010_v36 }
  0xd2   : > { %1652 = vmatprep.mubr.f32.mxu0 %v7012_v39  ;;  %5586 = vmatpush1.bf16.msra.mxu0 %v5585_v37  ;;  %v7114_v37 = vld [vmem:[#allocation2 + $0x170] sm:$0xff] }
  0xd3   : > { %5587 = vmatprep.subr.bf16.mxu0 %v8301_v0  ;;  %v1429_v0 = vld [vmem:[#allocation6 + $0x208] sm:$0xff] }
  0xd5   : > { %1653 = vmatmul.mubr.f32.gmra.mrb[32].mxu0 %v7017_v42 }
  0xd6   : > { %1657 = vmatprep.mubr.f32.mxu0 %v7019_v43 }
  0xd9   : > { %1658 = vmatmul.mubr.f32.gmra.mrb[34].mxu0 %v7024_v45 }
  0xda   : > { %1662 = vmatprep.mubr.f32.mxu0 %v7026_v47 }
  0xdd   : > { %1663 = vmatmul.mubr.f32.gmra.mrb[36].mxu0 %v7030_v48 }
  0xde   : > { %1667 = vmatprep.mubr.f32.mxu0 %v7032_v50 }
  0xe1   : > { %1668 = vmatmul.mubr.f32.gmra.mrb[38].mxu0 %v7036_v52 }
  0xe2   : > { %1672 = vmatprep.mubr.f32.mxu0 %v7038_v53 }
  0xe5   : > { %1673 = vmatmul.mubr.f32.gmra.mrb[40].mxu0 %v7042_v55 }
  0xe6   : > { %1677 = vmatprep.mubr.f32.mxu0 %v7044_v57 }
  0xe9   : > { %1678 = vmatmul.mubr.f32.gmra.mrb[42].mxu0 %v7048_v58 }
  0xea   : > { %1682 = vmatprep.mubr.f32.mxu0 %v7050_v60 }
  0xed   : > { %1683 = vmatmul.mubr.f32.gmra.mrb[44].mxu0 %v7054_v62 }
  0xee   : > { %1687 = vmatprep.mubr.f32.mxu0 %v7056_v63  ;;  %v7121_v63 = vld [vmem:[#allocation2 + $0x1a] sm:$0xff] }
  0xf1   : > { %1688 = vmatmul.mubr.f32.gmra.mrb[46].mxu0 %v7060_v3 }
  0xf2   : > { %1692 = vmatprep.mubr.f32.mxu0 %v7062_v5  ;;  %v1433_v5 = vld [vmem:[#allocation6 + $0x228] sm:$0xff] }
  0xf5   : > { %1693 = vmatmul.mubr.f32.gmra.mrb[48].mxu0 %v7066_v6 }
  0xf6   : > { %1697 = vmatprep.mubr.f32.mxu0 %v7068_v8  ;;  %v8361_v8 = vmov 0.0|0.0  }
  0xf9   : > { %1698 = vmatmul.mubr.f32.gmra.mrb[50].mxu0 %v7072_v10 }
  0xfa   : > { %1702 = vmatprep.mubr.f32.mxu0 %v7074_v11 }
  0xfd   : > { %1703 = vmatmul.mubr.f32.gmra.mrb[52].mxu0 %v7078_v13 }
  0xfe   : > { %1707 = vmatprep.mubr.f32.mxu0 %v7080_v15  ;;  %v628_v15 = vld [vmem:[#allocation2 + $0xa] sm:$0xff] }
 0x101   : > { %1708 = vmatmul.mubr.f32.gmra.mrb[54].mxu0 %v7084_v16 }
 0x102   : > { %1712 = vmatprep.mubr.f32.mxu0 %v7086_v18  ;;  %v1430_v18 = vld [vmem:[#allocation6 + $0x210] sm:$0xff] }
 0x105   : > { %1713 = vmatmul.mubr.f32.gmra.mrb[56].mxu0 %v7090_v20 }
 0x106   : > { %1717 = vmatprep.mubr.f32.mxu0 %v7092_v21  ;;  %v5588_v21 = vpack.c.bf16 %v1429_v0, %v1428_v23  ;;  %v1434_v0 = vld [vmem:[#allocation6 + $0x230] sm:$0xff]  ;;  %v1435_v23 = vld [vmem:[#allocation6 + $0x238] sm:$0xff] }
 0x109   : > { %1718 = vmatmul.mubr.f32.gmra.mrb[58].mxu0 %v7099_v25 }
 0x10a   : > { %1722 = vmatprep.mubr.f32.mxu0 %v7101_v27  ;;  %v1431_v27 = vld [vmem:[#allocation6 + $0x218] sm:$0xff] }
 0x10b   : > { %v5591_v11 = vpack.c.bf16 %v1431_v27, %v1430_v18  ;;  %v5597_v18 = vpack.c.bf16 %v1435_v23, %v1434_v0  ;;  %v1442_v0 = vld [vmem:[#allocation6 + $0x270] sm:$0xff] }
 0x10c   : > { %v7144_v23 = vld [vmem:[#allocation2 + $0x52] sm:$0xff] }
 0x10d   : > { %1723 = vmatmul.mubr.f32.gmra.mrb[60].mxu0 %v7108_v33 }
 0x10e   : > { %1727 = vmatprep.mubr.f32.mxu0 %v7110_v1  ;;  %v1432_v1 = vld [vmem:[#allocation6 + $0x220] sm:$0xff] }
 0x111   : > { %1728 = vmatmul.mubr.f32.gmra.mrb[62].mxu0 %v7114_v37 }
 0x112   : > { %1797 = vmatprep.mubr.f32.mxu0 %v6916_v29  ;;  %v5594_v29 = vpack.c.bf16 %v1433_v5, %v1432_v1  ;;  %v1440_v1 = vld [vmem:[#allocation6 + $0x260] sm:$0xff] }
 0x115   : > { %1798 = vmatmul.mubr.f32.vlgmr.msra.gmra.mrb[0].mxu0 %v627_v30  ;;  %v1441_v30 = vld [vmem:[#allocation6 + $0x268] sm:$0xff] }
 0x116   : > { %5589 = vmatpush1.bf16.msra.mxu0 %v5588_v21  ;;  %1802 = vmatprep.mubr.f32.mxu0 %v6923_v34  ;;  %v7126_v34 = vld [vmem:[#allocation2 + $0x22] sm:$0xff]  ;;  %v1439_v21 = vld [vmem:[#allocation6 + $0x258] sm:$0xff] }
 0x117   : > { %5590 = vmatprep.subr.bf16.mxu0 %v8361_v8 }
 0x119   : > { %1803 = vmatmul.mubr.f32.gmra.mrb[2].mxu0 %v628_v15  ;;  %v1436_v15 = vld [vmem:[#allocation6 + $0x240] sm:$0xff] }
 0x11a   : > { %1807 = vmatprep.mubr.f32.mxu0 %v6930_v38  ;;  %5592 = vmatpush1.bf16.msra.mxu0 %v5591_v11  ;;  %v1437_v38 = vld [vmem:[#allocation6 + $0x248] sm:$0xff]  ;;  %v1438_v11 = vld [vmem:[#allocation6 + $0x250] sm:$0xff] }
 0x11b   : > { %5593 = vmatprep.subr.bf16.mxu0 %v8361_v8  ;;  %v5600_v5 = vpack.c.bf16 %v1437_v38, %v1436_v15  ;;  %v5603_v27 = vpack.c.bf16 %v1439_v21, %v1438_v11  ;;  %v1444_v15 = vld [vmem:[#allocation6 + $0x280] sm:$0xff]  ;;  %v1446_v11 = vld [vmem:[#allocation6 + $0x290] sm:$0xff] }
 0x11c   : > { %v7149_v38 = vld [vmem:[#allocation2 + $0x62] sm:$0xff]  ;;  %v7154_v21 = vld [vmem:[#allocation2 + $0x6a] sm:$0xff] }
 0x11d   : > { %1808 = vmatmul.mubr.f32.gmra.mrb[4].mxu0 %v7121_v63 }
 0x11e   : > { %1812 = vmatprep.mubr.f32.mxu0 %v6940_v44  ;;  %5595 = vmatpush1.bf16.msra.mxu0 %v5594_v29  ;;  %v7134_v44 = vld [vmem:[#allocation2 + $0x3a] sm:$0xff]  ;;  %v5606_v29 = vpack.c.bf16 %v1441_v30, %v1440_v1 }
 0x11f   : > { %5596 = vmatprep.subr.bf16.mxu0 %v8361_v8  ;;  %v1448_v1 = vld [vmem:[#allocation6 + $0x2a0] sm:$0xff] }
 0x120   : > { %v7159_v30 = vld [vmem:[#allocation2 + $0x7a] sm:$0xff] }
 0x121   : > { %1813 = vmatmul.mubr.f32.gmra.mrb[6].mxu0 %v7126_v34 }
 0x122   : > { %1817 = vmatprep.mubr.f32.mxu0 %v6947_v49  ;;  %5598 = vmatpush1.bf16.msra.mxu0 %v5597_v18  ;;  %v7139_v49 = vld [vmem:[#allocation2 + $0x4a] sm:$0xff] }
 0x123   : > { %5599 = vmatprep.subr.bf16.mxu0 %v8361_v8 }
 0x125   : > { %1818 = vmatmul.mubr.f32.gmra.mrb[8].mxu0 %v6932_v40 }
 0x126   : > { %1822 = vmatprep.mubr.f32.mxu0 %v6954_v54  ;;  %5601 = vmatpush1.bf16.msra.mxu0 %v5600_v5  ;;  %v1443_v54 = vld [vmem:[#allocation6 + $0x278] sm:$0xff] }
 0x127   : > { %5602 = vmatprep.subr.bf16.mxu0 %v8361_v8  ;;  %v5609_v18 = vpack.c.bf16 %v1443_v54, %v1442_v0  ;;  %v1450_v0 = vld [vmem:[#allocation6 + $0x2b0] sm:$0xff]  ;;  %v7164_v54 = vld [vmem:[#allocation2 + $0x82] sm:$0xff] }
 0x129   : > { %1823 = vmatmul.mubr.f32.gmra.mrb[10].mxu0 %v7134_v44 }
 0x12a   : > { %1827 = vmatprep.mubr.f32.mxu0 %v6961_v59  ;;  %5604 = vmatpush1.bf16.msra.mxu0 %v5603_v27  ;;  %v1445_v59 = vld [vmem:[#allocation6 + $0x288] sm:$0xff] }
 0x12b   : > { %5605 = vmatprep.subr.bf16.mxu0 %v8361_v8  ;;  %v5612_v5 = vpack.c.bf16 %v1445_v59, %v1444_v15  ;;  %v1452_v15 = vld [vmem:[#allocation6 + $0x2c0] sm:$0xff]  ;;  %v7169_v59 = vld [vmem:[#allocation2 + $0x92] sm:$0xff] }
 0x12d   : > { %1828 = vmatmul.mubr.f32.gmra.mrb[12].mxu0 %v7139_v49 }
 0x12e   : > { %1832 = vmatprep.mubr.f32.mxu0 %v6968_v2  ;;  %5607 = vmatpush1.bf16.msra.mxu0 %v5606_v29  ;;  %v1447_v2 = vld [vmem:[#allocation6 + $0x298] sm:$0xff] }
 0x12f   : > { %5608 = vmatprep.subr.bf16.mxu0 %v8361_v8  ;;  %v5615_v27 = vpack.c.bf16 %v1447_v2, %v1446_v11  ;;  %v1454_v11 = vld [vmem:[#allocation6 + $0x2d0] sm:$0xff]  ;;  %v7174_v2 = vld [vmem:[#allocation2 + $0x9a] sm:$0xff] }
 0x131   : > { %1833 = vmatmul.mubr.f32.gmra.mrb[14].mxu0 %v7144_v23 }
 0x132   : > { %1837 = vmatprep.mubr.f32.mxu0 %v6975_v7  ;;  %5610 = vmatpush1.bf16.msra.mxu0 %v5609_v18  ;;  %v1449_v7 = vld [vmem:[#allocation6 + $0x2a8] sm:$0xff] }
 0x133   : > { %5611 = vmatprep.subr.bf16.mxu0 %v8361_v8  ;;  %v5618_v29 = vpack.c.bf16 %v1449_v7, %v1448_v1  ;;  %v1456_v1 = vld [vmem:[#allocation6 + $0x2e0] sm:$0xff]  ;;  %v7179_v7 = vld [vmem:[#allocation2 + $0xaa] sm:$0xff] }
 0x135   : > { %1838 = vmatmul.mubr.f32.gmra.mrb[16].mxu0 %v7149_v38 }
 0x136   : > { %1842 = vmatprep.mubr.f32.mxu0 %v6982_v12  ;;  %5613 = vmatpush1.bf16.msra.mxu0 %v5612_v5  ;;  %v1451_v12 = vld [vmem:[#allocation6 + $0x2b8] sm:$0xff] }
 0x137   : > { %5614 = vmatprep.subr.bf16.mxu0 %v8361_v8  ;;  %v5621_v18 = vpack.c.bf16 %v1451_v12, %v1450_v0  ;;  %v1458_v0 = vld [vmem:[#allocation6 + $0x2f0] sm:$0xff] }
 0x138   : > { %v7184_v12 = vld [vmem:[#allocation2 + $0xb2] sm:$0xff] }
 0x139   : > { %1843 = vmatmul.mubr.f32.gmra.mrb[18].mxu0 %v7154_v21 }
 0x13a   : > { %1847 = vmatprep.mubr.f32.mxu0 %v6989_v17  ;;  %5616 = vmatpush1.bf16.msra.mxu0 %v5615_v27  ;;  %v1453_v17 = vld [vmem:[#allocation6 + $0x2c8] sm:$0xff] }
 0x13b   : > { %5617 = vmatprep.subr.bf16.mxu0 %v8361_v8  ;;  %v5624_v5 = vpack.c.bf16 %v1453_v17, %v1452_v15  ;;  %v7198_v15 = vld [vmem:[#allocation2 + $0xda] sm:$0xff]  ;;  %v7206_v17 = vld [vmem:[#allocation2 + $0xf2] sm:$0xff] }
 0x13d   : > { %1848 = vmatmul.mubr.f32.gmra.mrb[20].mxu0 %v7159_v30 }
 0x13e   : > { %1852 = vmatprep.mubr.f32.mxu0 %v6996_v22  ;;  %5619 = vmatpush1.bf16.msra.mxu0 %v5618_v29  ;;  %v1455_v22 = vld [vmem:[#allocation6 + $0x2d8] sm:$0xff] }
 0x13f   : > { %5620 = vmatprep.subr.bf16.mxu0 %v8361_v8  ;;  %v5627_v27 = vpack.c.bf16 %v1455_v22, %v1454_v11  ;;  %v1495_v22 = vld [vmem:[#allocation6 + $0x418] sm:$0xff] }
 0x141   : > { %1853 = vmatmul.mubr.f32.gmra.mrb[22].mxu0 %v7164_v54 }
 0x142   : > { %1857 = vmatprep.mubr.f32.mxu0 %v7003_v28  ;;  %5622 = vmatpush1.bf16.msra.mxu0 %v5621_v18  ;;  %v1457_v28 = vld [vmem:[#allocation6 + $0x2e8] sm:$0xff] }
 0x143   : > { %5623 = vmatprep.subr.bf16.mxu0 %v8361_v8  ;;  %v5630_v29 = vpack.c.bf16 %v1457_v28, %v1456_v1  ;;  %v1496_v1 = vld [vmem:[#allocation6 + $0x420] sm:$0xff]  ;;  %v1497_v28 = vld [vmem:[#allocation6 + $0x428] sm:$0xff] }
 0x145   : > { %1858 = vmatmul.mubr.f32.gmra.mrb[24].mxu0 %v7169_v59 }
 0x146   : > { %1862 = vmatprep.mubr.f32.mxu0 %v7010_v36  ;;  %5625 = vmatpush1.bf16.msra.mxu0 %v5624_v5  ;;  %v1459_v36 = vld [vmem:[#allocation6 + $0x2f8] sm:$0xff]  ;;  %v1493_v5 = vld [vmem:[#allocation6 + $0x408] sm:$0xff] }
 0x147   : > { %5626 = vmatprep.subr.bf16.mxu0 %v8361_v8  ;;  %v5633_v18 = vpack.c.bf16 %v1459_v36, %v1458_v0  ;;  %v1498_v0 = vld [vmem:[#allocation6 + $0x430] sm:$0xff]  ;;  %v1499_v36 = vld [vmem:[#allocation6 + $0x438] sm:$0xff] }
 0x149   : > { %1863 = vmatmul.mubr.f32.gmra.mrb[26].mxu0 %v7174_v2 }
 0x14a   : > { %1867 = vmatprep.mubr.f32.mxu0 %v7017_v42  ;;  %5628 = vmatpush1.bf16.msra.mxu0 %v5627_v27  ;;  %v7189_v42 = vld [vmem:[#allocation2 + $0xc2] sm:$0xff] }
 0x14b   : > { %5629 = vmatprep.subr.bf16.mxu0 %v8361_v8 }
 0x14d   : > { %1868 = vmatmul.mubr.f32.gmra.mrb[28].mxu0 %v7179_v7 }
 0x14e   : > { %1872 = vmatprep.mubr.f32.mxu0 %v7024_v45  ;;  %5631 = vmatpush1.bf16.msra.mxu0 %v5630_v29  ;;  %v7194_v45 = vld [vmem:[#allocation2 + $0xca] sm:$0xff]  ;;  %v7230_v29 = vld [vmem:[#allocation2 + $0x13a] sm:$0xff] }
 0x14f   : > { %5632 = vmatprep.subr.bf16.mxu0 %v8361_v8 }
 0x151   : > { %1873 = vmatmul.mubr.f32.gmra.mrb[30].mxu0 %v7184_v12 }
 0x152   : > { %1877 = vmatprep.mubr.f32.mxu0 %v7030_v48  ;;  %5634 = vmatpush1.bf16.msra.mxu0 %v5633_v18  ;;  %v7202_v48 = vld [vmem:[#allocation2 + $0xe2] sm:$0xff] }
 0x153   : > { %5635 = vmatprep.subr.bf16.mxu0 %v8361_v8  ;;  %v7234_v18 = vld [vmem:[#allocation2 + $0x142] sm:$0xff] }
 0x155   : > { %1878 = vmatmul.mubr.f32.gmra.mrb[32].mxu0 %v7189_v42 }
 0x156   : > { %1882 = vmatprep.mubr.f32.mxu0 %v7036_v52  ;;  %v7210_v52 = vld [vmem:[#allocation2 + $0xfa] sm:$0xff] }
 0x159   : > { %1883 = vmatmul.mubr.f32.gmra.mrb[34].mxu0 %v7194_v45 }
 0x15a   : > { %1887 = vmatprep.mubr.f32.mxu0 %v7042_v55  ;;  %v7214_v55 = vld [vmem:[#allocation2 + $0x10a] sm:$0xff] }
 0x15d   : > { %1888 = vmatmul.mubr.f32.gmra.mrb[36].mxu0 %v7198_v15 }
 0x15e   : > { %1892 = vmatprep.mubr.f32.mxu0 %v7048_v58  ;;  %v7218_v58 = vld [vmem:[#allocation2 + $0x112] sm:$0xff] }
 0x161   : > { %1893 = vmatmul.mubr.f32.gmra.mrb[38].mxu0 %v7202_v48 }
 0x162   : > { %1897 = vmatprep.mubr.f32.mxu0 %v7054_v62  ;;  %v1492_v62 = vld [vmem:[#allocation6 + $0x400] sm:$0xff] }
 0x163   : > { %v5683_v11 = vpack.c.bf16 %v1493_v5, %v1492_v62  ;;  %v1500_v62 = vld [vmem:[#allocation6 + $0x440] sm:$0xff]  ;;  %v1501_v5 = vld [vmem:[#allocation6 + $0x448] sm:$0xff] }
 0x165   : > { %1898 = vmatmul.mubr.f32.gmra.mrb[40].mxu0 %v7206_v17  ;;  %5684 = vmatprep.subr.bf16.mxu1 %v5683_v11 }
 0x166   : > { %1902 = vmatprep.mubr.f32.mxu0 %v7060_v3  ;;  %v7222_v3 = vld [vmem:[#allocation2 + $0x122] sm:$0xff]  ;;  %5686 = vmatpush3.bf16.msra.mxu1 %v5683_v11  ;;  %v7238_v11 = vld [vmem:[#allocation2 + $0x152] sm:$0xff] }
 0x169   : > { %1903 = vmatmul.mubr.f32.gmra.mrb[42].mxu0 %v7210_v52 }
 0x16a   : > { %1907 = vmatprep.mubr.f32.mxu0 %v7066_v6  ;;  %v1494_v6 = vld [vmem:[#allocation6 + $0x410] sm:$0xff] }
 0x16b   : > { %v5687_v27 = vpack.c.bf16 %v1495_v22, %v1494_v6  ;;  %v1502_v6 = vld [vmem:[#allocation6 + $0x450] sm:$0xff]  ;;  %v1503_v22 = vld [vmem:[#allocation6 + $0x458] sm:$0xff] }
 0x16d   : > { %1908 = vmatmul.mubr.f32.gmra.mrb[44].mxu0 %v7214_v55  ;;  %5688 = vmatprep.subr.bf16.mxu1 %v5687_v27 }
 0x16e   : > { %1912 = vmatprep.mubr.f32.mxu0 %v7072_v10  ;;  %v7226_v10 = vld [vmem:[#allocation2 + $0x12a] sm:$0xff]  ;;  %5690 = vmatpush3.bf16.msra.mxu1 %v5687_v27  ;;  %v7242_v27 = vld [vmem:[#allocation2 + $0x15a] sm:$0xff] }
 0x171   : > { %1913 = vmatmul.mubr.f32.gmra.mrb[46].mxu0 %v7218_v58 }
 0x172   : > { %1917 = vmatprep.mubr.f32.mxu0 %v7078_v13  ;;  %v5691_v13 = vpack.c.bf16 %v1497_v28, %v1496_v1  ;;  %v7244_v1 = vld [vmem:[#allocation2 + $0x180] sm:$0xff] }
 0x173   : > { %v1504_v28 = vld [vmem:[#allocation6 + $0x460] sm:$0xff] }
 0x174   : > { %5692 = vmatprep.subr.bf16.mxu1 %v5691_v13 }
 0x175   : > { %1918 = vmatmul.mubr.f32.gmra.mrb[48].mxu0 %v7222_v3  ;;  %5694 = vmatpush3.bf16.msra.mxu1 %v5691_v13  ;;  %v1505_v13 = vld [vmem:[#allocation6 + $0x468] sm:$0xff] }
 0x176   : > { %1922 = vmatprep.mubr.f32.mxu0 %v7084_v16  ;;  %v5695_v16 = vpack.c.bf16 %v1499_v36, %v1498_v0  ;;  %v7248_v0 = vld [vmem:[#allocation2 + $0x16a] sm:$0xff] }
 0x177   : > { %v7250_v36 = vld [vmem:[#allocation2 + $0x188] sm:$0xff] }
 0x178   : > { %5696 = vmatprep.subr.bf16.mxu1 %v5695_v16 }
 0x179   : > { %1923 = vmatmul.mubr.f32.gmra.mrb[50].mxu0 %v7226_v10  ;;  %5698 = vmatpush3.bf16.msra.mxu1 %v5695_v16  ;;  %v1507_v16 = vld [vmem:[#allocation6 + $0x478] sm:$0xff] }
 0x17a   : > { %1927 = vmatprep.mubr.f32.mxu0 %v7090_v20  ;;  %v5699_v20 = vpack.c.bf16 %v1501_v5, %v1500_v62  ;;  %v7254_v5 = vld [vmem:[#allocation2 + $0x172] sm:$0xff] }
 0x17c   : > { %5700 = vmatprep.subr.bf16.mxu1 %v5699_v20 }
 0x17d   : > { %1928 = vmatmul.mubr.f32.gmra.mrb[52].mxu0 %v7230_v29  ;;  %5702 = vmatpush3.bf16.msra.mxu1 %v5699_v20  ;;  %v1460_v20 = vld [vmem:[#allocation6 + $0x300] sm:$0xff] }
 0x17e   : > { %1932 = vmatprep.mubr.f32.mxu0 %v7099_v25  ;;  %v5703_v25 = vpack.c.bf16 %v1503_v22, %v1502_v6  ;;  %v1461_v6 = vld [vmem:[#allocation6 + $0x308] sm:$0xff] }
 0x17f   : > { %v5636_v22 = vpack.c.bf16 %v1461_v6, %v1460_v20 }
 0x180   : > { %5704 = vmatprep.subr.bf16.mxu1 %v5703_v25 }
 0x181   : > { %1933 = vmatmul.mubr.f32.gmra.mrb[54].mxu0 %v7234_v18  ;;  %5706 = vmatpush3.bf16.msra.mxu1 %v5703_v25  ;;  %v1462_v25 = vld [vmem:[#allocation6 + $0x310] sm:$0xff] }
 0x182   : > { %1937 = vmatprep.mubr.f32.mxu0 %v7108_v33  ;;  %v5707_v33 = vpack.c.bf16 %v1505_v13, %v1504_v28  ;;  %v1463_v28 = vld [vmem:[#allocation6 + $0x318] sm:$0xff] }
 0x183   : > { %v5639_v13 = vpack.c.bf16 %v1463_v28, %v1462_v25 }
 0x184   : > { %5708 = vmatprep.subr.bf16.mxu1 %v5707_v33 }
 0x185   : > { %1938 = vmatmul.mubr.f32.gmra.mrb[56].mxu0 %v7238_v11  ;;  %5710 = vmatpush3.bf16.msra.mxu1 %v5707_v33  ;;  %v1464_v33 = vld [vmem:[#allocation6 + $0x320] sm:$0xff] }
 0x186   : > { %1942 = vmatprep.mubr.f32.mxu0 %v7114_v37  ;;  %v1506_v37 = vld [vmem:[#allocation6 + $0x470] sm:$0xff] }
 0x187   : > { %v5711_v62 = vpack.c.bf16 %v1507_v16, %v1506_v37  ;;  %v1465_v37 = vld [vmem:[#allocation6 + $0x328] sm:$0xff]  ;;  %v1467_v16 = vld [vmem:[#allocation6 + $0x338] sm:$0xff] }
 0x189   : > { %1943 = vmatmul.mubr.f32.gmra.mrb[58].mxu0 %v7242_v27  ;;  %5712 = vmatprep.subr.bf16.mxu1 %v5711_v62 }
 0x18a   : > { %1947 = vmatprep.mubr.f32.mxu0 %v7244_v1  ;;  %5714 = vmatpush3.bf16.msra.mxu1 %v5711_v62 }
 0x18b   : > { %5715 = vmatprep.subr.bf16.mxu1 %v8361_v8 }
 0x18d   : > { %1948 = vmatmul.mubr.f32.gmra.mrb[60].mxu0 %v7248_v0  ;;  %5364 = vmatmul.mubr.f32.vlgmr.msra.gmra.mrb[0].mxu1 %v7134_v44 }
 0x18e   : > { %1952 = vmatprep.mubr.f32.mxu0 %v7250_v36  ;;  %5366 = vmatprep.mubr.f32.mxu1 %v7139_v49 }
 0x191   : > { %1953 = vmatmul.mubr.f32.gmra.mrb[62].mxu0 %v7254_v5  ;;  %5367 = vmatmul.mubr.f32.gmra.mrb[2].mxu1 %v7144_v23 }
 0x192   : > { %2022 = vmatprep.mubr.f32.mxu0 %v7121_v63  ;;  %5369 = vmatprep.mubr.f32.mxu1 %v7149_v38  ;;  %v5642_v63 = vpack.c.bf16 %v1465_v37, %v1464_v33 }
 0x195   : > { %2023 = vmatmul.mubr.f32.vlgmr.msra.gmra.mrb[0].mxu0 %v6911_v26  ;;  %v1466_v26 = vld [vmem:[#allocation6 + $0x330] sm:$0xff]  ;;  %5370 = vmatmul.mubr.f32.gmra.mrb[4].mxu1 %v7154_v21 }
 0x196   : > { %5637 = vmatpush1.bf16.msra.mxu0 %v5636_v22  ;;  %2027 = vmatprep.mubr.f32.mxu0 %v7126_v34  ;;  %v5645_v34 = vpack.c.bf16 %v1467_v16, %v1466_v26  ;;  %v849_v26 = vld [vmem:[#allocation2 + $0x182] sm:$0xff] }
 0x197   : > { %5638 = vmatprep.subr.bf16.mxu0 %v8361_v8  ;;  %5372 = vmatprep.mubr.f32.mxu1 %v7159_v30 }
 0x199   : > { %2028 = vmatmul.mubr.f32.gmra.mrb[2].mxu0 %v6918_v31  ;;  %v1468_v31 = vld [vmem:[#allocation6 + $0x340] sm:$0xff]  ;;  %5373 = vmatmul.mubr.f32.gmra.mrb[6].mxu1 %v7164_v54 }
 0x19a   : > { %2032 = vmatprep.mubr.f32.mxu0 %v6932_v40  ;;  %5640 = vmatpush1.bf16.msra.mxu0 %v5639_v13  ;;  %v1469_v40 = vld [vmem:[#allocation6 + $0x348] sm:$0xff] }
 0x19b   : > { %5641 = vmatprep.subr.bf16.mxu0 %v8361_v8  ;;  %5375 = vmatprep.mubr.f32.mxu1 %v7169_v59  ;;  %v5648_v62 = vpack.c.bf16 %v1469_v40, %v1468_v31  ;;  %v885_v40 = vld [vmem:[#allocation2 + $0x38] sm:$0xff] }
 0x19d   : > { %2033 = vmatmul.mubr.f32.gmra.mrb[4].mxu0 %v6925_v35  ;;  %v1470_v35 = vld [vmem:[#allocation6 + $0x350] sm:$0xff]  ;;  %5376 = vmatmul.mubr.f32.gmra.mrb[8].mxu1 %v7174_v2 }
 0x19e   : > { %2037 = vmatprep.mubr.f32.mxu0 %v7134_v44  ;;  %5643 = vmatpush1.bf16.msra.mxu0 %v5642_v63  ;;  %v1471_v44 = vld [vmem:[#allocation6 + $0x358] sm:$0xff] }
 0x19f   : > { %5644 = vmatprep.subr.bf16.mxu0 %v8361_v8  ;;  %5378 = vmatprep.mubr.f32.mxu1 %v7179_v7  ;;  %v5651_v20 = vpack.c.bf16 %v1471_v44, %v1470_v35  ;;  %v3646_v44 = vld [vmem:[#allocation9 + $0x30] sm:$0xff] }
 0x1a1   : > { %2038 = vmatmul.mubr.f32.gmra.mrb[6].mxu0 %v6934_v41  ;;  %v1472_v41 = vld [vmem:[#allocation6 + $0x360] sm:$0xff]  ;;  %5379 = vmatmul.mubr.f32.gmra.mrb[10].mxu1 %v7184_v12 }
 0x1a2   : > { %2042 = vmatprep.mubr.f32.mxu0 %v7139_v49  ;;  %5646 = vmatpush1.bf16.msra.mxu0 %v5645_v34  ;;  %v1473_v49 = vld [vmem:[#allocation6 + $0x368] sm:$0xff] }
 0x1a3   : > { %5647 = vmatprep.subr.bf16.mxu0 %v8361_v8  ;;  %5381 = vmatprep.mubr.f32.mxu1 %v7189_v42  ;;  %v5654_v6 = vpack.c.bf16 %v1473_v49, %v1472_v41  ;;  %v850_v34 = vld [vmem:[#allocation2 + $0x18a] sm:$0xff]  ;;  %v3768_v41 = vld [vmem:[#allocation9 + $0x400] sm:$0xff] }
 0x1a4   : > { %v886_v49 = vld [vmem:[#allocation2 + $0x48] sm:$0xff] }
 0x1a5   : > { %2043 = vmatmul.mubr.f32.gmra.mrb[8].mxu0 %v6942_v46  ;;  %v1474_v46 = vld [vmem:[#allocation6 + $0x370] sm:$0xff]  ;;  %5382 = vmatmul.mubr.f32.gmra.mrb[12].mxu1 %v7194_v45 }
 0x1a6   : > { %2047 = vmatprep.mubr.f32.mxu0 %v7144_v23  ;;  %5649 = vmatpush1.bf16.msra.mxu0 %v5648_v62  ;;  %v1475_v23 = vld [vmem:[#allocation6 + $0x378] sm:$0xff]  ;;  %v950_v62 = vld [vmem:[#allocation2 + $0x49] sm:$0xff] }
 0x1a7   : > { %5650 = vmatprep.subr.bf16.mxu0 %v8361_v8  ;;  %5384 = vmatprep.mubr.f32.mxu1 %v7198_v15  ;;  %v5657_v22 = vpack.c.bf16 %v1475_v23, %v1474_v46  ;;  %v951_v46 = vld [vmem:[#allocation2 + $0x51] sm:$0xff] }
 0x1a9   : > { %2048 = vmatmul.mubr.f32.gmra.mrb[10].mxu0 %v6949_v51  ;;  %v1476_v51 = vld [vmem:[#allocation6 + $0x380] sm:$0xff]  ;;  %5385 = vmatmul.mubr.f32.gmra.mrb[14].mxu1 %v7202_v48 }
 0x1aa   : > { %2052 = vmatprep.mubr.f32.mxu0 %v7149_v38  ;;  %5652 = vmatpush1.bf16.msra.mxu0 %v5651_v20  ;;  %v1477_v38 = vld [vmem:[#allocation6 + $0x388] sm:$0xff]  ;;  %v3647_v20 = vld [vmem:[#allocation9 + $0x38] sm:$0xff] }
 0x1ab   : > { %5653 = vmatprep.subr.bf16.mxu0 %v8361_v8  ;;  %5387 = vmatprep.mubr.f32.mxu1 %v7206_v17  ;;  %v5660_v25 = vpack.c.bf16 %v1477_v38, %v1476_v51  ;;  %v3648_v51 = vld [vmem:[#allocation9 + $0x40] sm:$0xff]  ;;  %v3649_v38 = vld [vmem:[#allocation9 + $0x48] sm:$0xff] }
 0x1ad   : > { %2053 = vmatmul.mubr.f32.gmra.mrb[12].mxu0 %v6956_v56  ;;  %v1478_v56 = vld [vmem:[#allocation6 + $0x390] sm:$0xff]  ;;  %5388 = vmatmul.mubr.f32.gmra.mrb[16].mxu1 %v7210_v52 }
 0x1ae   : > { %2057 = vmatprep.mubr.f32.mxu0 %v7154_v21  ;;  %5655 = vmatpush1.bf16.msra.mxu0 %v5654_v6  ;;  %v1479_v21 = vld [vmem:[#allocation6 + $0x398] sm:$0xff]  ;;  %v3769_v6 = vld [vmem:[#allocation9 + $0x408] sm:$0xff] }
 0x1af   : > { %5656 = vmatprep.subr.bf16.mxu0 %v8361_v8  ;;  %5390 = vmatprep.mubr.f32.mxu1 %v7214_v55  ;;  %v5663_v28 = vpack.c.bf16 %v1479_v21, %v1478_v56  ;;  %v7368_v23 = vpack.c.bf16 %v3769_v6, %v3768_v41  ;;  %v952_v56 = vld [vmem:[#allocation2 + $0x61] sm:$0xff]  ;;  %v5728_v21 = vpack.c.bf16 %v3649_v38, %v3648_v51  ;;  %v964_v6 = vld [vmem:[#allocation2 + $0xf1] sm:$0xff]  ;;  %v966_v38 = vld [vmem:[#allocation2 + $0x109] sm:$0xff] }
 0x1b0   : > { %v963_v41 = vld [vmem:[#allocation2 + $0xe1] sm:$0xff]  ;;  %v901_v51 = vld [vmem:[#allocation2 + $0xf8] sm:$0xff] }
 0x1b1   : > { %2058 = vmatmul.mubr.f32.gmra.mrb[14].mxu0 %v6963_v61  ;;  %v1480_v61 = vld [vmem:[#allocation6 + $0x3a0] sm:$0xff]  ;;  %5391 = vmatmul.mubr.f32.gmra.mrb[18].mxu1 %v7218_v58 }
 0x1b2   : > { %2062 = vmatprep.mubr.f32.mxu0 %v7159_v30  ;;  %5658 = vmatpush1.bf16.msra.mxu0 %v5657_v22  ;;  %v1481_v30 = vld [vmem:[#allocation6 + $0x3a8] sm:$0xff]  ;;  %v5725_v22 = vpack.c.bf16 %v3647_v20, %v3646_v44  ;;  %v962_v44 = vld [vmem:[#allocation2 + $0xd9] sm:$0xff] }
 0x1b3   : > { %5659 = vmatprep.subr.bf16.mxu0 %v8361_v8  ;;  %5393 = vmatprep.mubr.f32.mxu1 %v7222_v3  ;;  %v5666_v13 = vpack.c.bf16 %v1481_v30, %v1480_v61  ;;  %v3651_v61 = vld [vmem:[#allocation9 + $0x58] sm:$0xff]  ;;  %v888_v30 = vld [vmem:[#allocation2 + $0x60] sm:$0xff] }
 0x1b4   : > { %v898_v20 = vld [vmem:[#allocation2 + $0xd8] sm:$0xff] }
 0x1b5   : > { %2063 = vmatmul.mubr.f32.gmra.mrb[16].mxu0 %v6970_v4  ;;  %v1482_v4 = vld [vmem:[#allocation6 + $0x3b0] sm:$0xff]  ;;  %5394 = vmatmul.mubr.f32.gmra.mrb[20].mxu1 %v7226_v10 }
 0x1b6   : > { %2067 = vmatprep.mubr.f32.mxu0 %v7164_v54  ;;  %5661 = vmatpush1.bf16.msra.mxu0 %v5660_v25  ;;  %v1483_v54 = vld [vmem:[#allocation6 + $0x3b8] sm:$0xff]  ;;  %v887_v25 = vld [vmem:[#allocation2 + $0x50] sm:$0xff] }
 0x1b7   : > { %5662 = vmatprep.subr.bf16.mxu0 %v8361_v8  ;;  %5396 = vmatprep.mubr.f32.mxu1 %v7230_v29  ;;  %v5669_v33 = vpack.c.bf16 %v1483_v54, %v1482_v4  ;;  %v3652_v54 = vld [vmem:[#allocation9 + $0x60] sm:$0xff] }
 0x1b9   : > { %2068 = vmatmul.mubr.f32.gmra.mrb[18].mxu0 %v6977_v9  ;;  %v1484_v9 = vld [vmem:[#allocation6 + $0x3c0] sm:$0xff]  ;;  %5397 = vmatmul.mubr.f32.gmra.mrb[22].mxu1 %v7234_v18 }
 0x1ba   : > { %2072 = vmatprep.mubr.f32.mxu0 %v7169_v59  ;;  %5664 = vmatpush1.bf16.msra.mxu0 %v5663_v28  ;;  %v1485_v59 = vld [vmem:[#allocation6 + $0x3c8] sm:$0xff]  ;;  %v3650_v28 = vld [vmem:[#allocation9 + $0x50] sm:$0xff] }
 0x1bb   : > { %5665 = vmatprep.subr.bf16.mxu0 %v8361_v8  ;;  %5399 = vmatprep.mubr.f32.mxu1 %v7238_v11  ;;  %v5672_v37 = vpack.c.bf16 %v1485_v59, %v1484_v9  ;;  %v5731_v4 = vpack.c.bf16 %v3651_v61, %v3650_v28  ;;  %v889_v9 = vld [vmem:[#allocation2 + $0x68] sm:$0xff]  ;;  %v954_v59 = vld [vmem:[#allocation2 + $0x79] sm:$0xff] }
 0x1bc   : > { %v968_v28 = vld [vmem:[#allocation2 + $0x121] sm:$0xff] }
 0x1bd   : > { %2073 = vmatmul.mubr.f32.gmra.mrb[20].mxu0 %v6984_v14  ;;  %v1486_v14 = vld [vmem:[#allocation6 + $0x3d0] sm:$0xff]  ;;  %5400 = vmatmul.mubr.f32.gmra.mrb[24].mxu1 %v7242_v27  ;;  %v904_v61 = vld [vmem:[#allocation2 + $0x120] sm:$0xff] }
 0x1be   : > { %2077 = vmatprep.mubr.f32.mxu0 %v7174_v2  ;;  %5667 = vmatpush1.bf16.msra.mxu0 %v5666_v13  ;;  %v1487_v2 = vld [vmem:[#allocation6 + $0x3d8] sm:$0xff]  ;;  %v953_v13 = vld [vmem:[#allocation2 + $0x69] sm:$0xff] }
 0x1bf   : > { %5668 = vmatprep.subr.bf16.mxu0 %v8361_v8  ;;  %5402 = vmatprep.mubr.f32.mxu1 %v7248_v0  ;;  %v5675_v63 = vpack.c.bf16 %v1487_v2, %v1486_v14  ;;  %v3654_v14 = vld [vmem:[#allocation9 + $0x70] sm:$0xff]  ;;  %v3655_v2 = vld [vmem:[#allocation9 + $0x78] sm:$0xff] }
 0x1c1   : > { %2078 = vmatmul.mubr.f32.gmra.mrb[22].mxu0 %v6991_v19  ;;  %v1488_v19 = vld [vmem:[#allocation6 + $0x3e0] sm:$0xff]  ;;  %5403 = vmatmul.mubr.f32.gmra.mrb[26].mxu1 %v7254_v5 }
 0x1c2   : > { %2082 = vmatprep.mubr.f32.mxu0 %v7179_v7  ;;  %5670 = vmatpush1.bf16.msra.mxu0 %v5669_v33  ;;  %v1489_v7 = vld [vmem:[#allocation6 + $0x3e8] sm:$0xff] }
 0x1c3   : > { %5671 = vmatprep.subr.bf16.mxu0 %v8361_v8  ;;  %5405 = vmatprep.mubr.f32.mxu1 %v849_v26  ;;  %v5678_v16 = vpack.c.bf16 %v1489_v7, %v1488_v19  ;;  %v3653_v33 = vld [vmem:[#allocation9 + $0x68] sm:$0xff]  ;;  %v5737_v7 = vpack.c.bf16 %v3655_v2, %v3654_v14  ;;  %v970_v14 = vld [vmem:[#allocation2 + $0x139] sm:$0xff] }
 0x1c4   : > { %v955_v19 = vld [vmem:[#allocation2 + $0x81] sm:$0xff] }
 0x1c5   : > { %2083 = vmatmul.mubr.f32.gmra.mrb[24].mxu0 %v6998_v24  ;;  %v1490_v24 = vld [vmem:[#allocation6 + $0x3f0] sm:$0xff]  ;;  %5406 = vmatmul.mubr.f32.gmra.mrb[28].mxu1 %v850_v34 }
 0x1c6   : > { %2087 = vmatprep.mubr.f32.mxu0 %v7184_v12  ;;  %5673 = vmatpush1.bf16.msra.mxu0 %v5672_v37  ;;  %v1491_v12 = vld [vmem:[#allocation6 + $0x3f8] sm:$0xff]  ;;  %v5734_v37 = vpack.c.bf16 %v3653_v33, %v3652_v54  ;;  %v905_v33 = vld [vmem:[#allocation2 + $0x128] sm:$0xff] }
 0x1c7   : > { %5674 = vmatprep.subr.bf16.mxu0 %v8361_v8  ;;  %v5681_v31 = vpack.c.bf16 %v1491_v12, %v1490_v24  ;;  %v956_v24 = vld [vmem:[#allocation2 + $0x91] sm:$0xff] }
 0x1c9   : > { %2088 = vmatmul.mubr.f32.gmra.mrb[26].mxu0 %v7005_v32  ;;  %v8362_v32 = vld [vmem:[#allocation16_spill] sm:$0xff] }
 0x1ca   : > { %2092 = vmatprep.mubr.f32.mxu0 %v7189_v42  ;;  %5676 = vmatpush1.bf16.msra.mxu0 %v5675_v63  ;;  %v8370_v42 = vld [vmem:[#allocation24_spill] sm:$0xff]  ;;  %8371 = vst [vmem:[#allocation16_spill] sm:$0xff] %v7368_v23  ;;  %v890_v63 = vld [vmem:[#allocation2 + $0x78] sm:$0xff] }
 0x1cb   : > { %5677 = vmatprep.subr.bf16.mxu0 %v8361_v8 }
 0x1cd   : > { %2093 = vmatmul.mubr.f32.gmra.mrb[28].mxu0 %v7012_v39  ;;  %v8363_v39 = vld [vmem:[#allocation17_spill] sm:$0xff] }
 0x1ce   : > { %2097 = vmatprep.mubr.f32.mxu0 %v7194_v45  ;;  %5679 = vmatpush1.bf16.msra.mxu0 %v5678_v16  ;;  %v1042_v45 = vld [vmem:[#allocation2 + $0x19a] sm:$0xff]  ;;  %v3657_v16 = vld [vmem:[#allocation9 + $0x88] sm:$0xff] }
 0x1cf   : > { %5680 = vmatprep.subr.bf16.mxu0 %v8361_v8  ;;  %5408 = vmatprep.mubr.f32.mxu1 %v1042_v45  ;;  %v3662_v45 = vld [vmem:[#allocation9 + $0xb0] sm:$0xff] }
 0x1d1   : > { %2098 = vmatmul.mubr.f32.gmra.mrb[30].mxu0 %v7019_v43  ;;  %v8364_v43 = vld [vmem:[#allocation18_spill] sm:$0xff] }
 0x1d2   : > { %2102 = vmatprep.mubr.f32.mxu0 %v7198_v15  ;;  %5682 = vmatpush1.bf16.msra.mxu0 %v5681_v31  ;;  %v7360_v15 = vld [vmem:[#allocation2 + $0x181] sm:$0xff]  ;;  %v3658_v31 = vld [vmem:[#allocation9 + $0x90] sm:$0xff] }
 0x1d3   : > { %5908 = vmatprep.subr.bf16.mxu0 %v7368_v23 }
 0x1d5   : > { %2103 = vmatmul.mubr.f32.gmra.mrb[32].mxu0 %v7026_v47  ;;  %v8365_v47 = vld [vmem:[#allocation19_spill] sm:$0xff] }
 0x1d6   : > { %2107 = vmatprep.mubr.f32.mxu0 %v7202_v48  ;;  %v1043_v48 = vld [vmem:[#allocation2 + $0x1a2] sm:$0xff] }
 0x1d7   : > { %5409 = vmatmul.mubr.f32.gmra.mrb[30].mxu1 %v1043_v48  ;;  %v3663_v48 = vld [vmem:[#allocation9 + $0xb8] sm:$0xff] }
 0x1d9   : > { %2108 = vmatmul.mubr.f32.gmra.mrb[34].mxu0 %v7032_v50  ;;  %v8366_v50 = vld [vmem:[#allocation20_spill] sm:$0xff] }
 0x1da   : > { %2112 = vmatprep.mubr.f32.mxu0 %v7206_v17  ;;  %v7363_v17 = vld [vmem:[#allocation2 + $0x189] sm:$0xff] }
 0x1dd   : > { %2113 = vmatmul.mubr.f32.gmra.mrb[36].mxu0 %v7038_v53  ;;  %v8367_v53 = vld [vmem:[#allocation21_spill] sm:$0xff] }
 0x1de   : > { %2117 = vmatprep.mubr.f32.mxu0 %v7210_v52  ;;  %v948_v52 = vld [vmem:[#allocation2 + $0x31] sm:$0xff] }
 0x1e1   : > { %2118 = vmatmul.mubr.f32.gmra.mrb[38].mxu0 %v7044_v57  ;;  %v8368_v57 = vld [vmem:[#allocation22_spill] sm:$0xff] }
 0x1e2   : > { %2122 = vmatprep.mubr.f32.mxu0 %v7214_v55  ;;  %v3640_v55 = vld [vmem:[#allocation9] sm:$0xff] }
 0x1e5   : > { %2123 = vmatmul.mubr.f32.gmra.mrb[40].mxu0 %v7050_v60  ;;  %v8369_v60 = vld [vmem:[#allocation23_spill] sm:$0xff] }
 0x1e6   : > { %2127 = vmatprep.mubr.f32.mxu0 %v7218_v58  ;;  %v3641_v58 = vld [vmem:[#allocation9 + $0x8] sm:$0xff] }
 0x1e9   : > { %2128 = vmatmul.mubr.f32.gmra.mrb[42].mxu0 %v8362_v32  ;;  %v3659_v32 = vld [vmem:[#allocation9 + $0x98] sm:$0xff] }
 0x1ea   : > { %2132 = vmatprep.mubr.f32.mxu0 %v7222_v3  ;;  %v3642_v3 = vld [vmem:[#allocation9 + $0x10] sm:$0xff] }
 0x1ed   : > { %2133 = vmatmul.mubr.f32.gmra.mrb[44].mxu0 %v8363_v39  ;;  %v892_v39 = vld [vmem:[#allocation2 + $0x90] sm:$0xff] }
 0x1ee   : > { %2137 = vmatprep.mubr.f32.mxu0 %v7226_v10  ;;  %v884_v10 = vld [vmem:[#allocation2 + $0x30] sm:$0xff] }
 0x1f1   : > { %2138 = vmatmul.mubr.f32.gmra.mrb[46].mxu0 %v8364_v43  ;;  %v957_v43 = vld [vmem:[#allocation2 + $0x99] sm:$0xff] }
 0x1f2   : > { %2142 = vmatprep.mubr.f32.mxu0 %v7230_v29  ;;  %v5716_v29 = vpack.c.bf16 %v3641_v58, %v3640_v55  ;;  %v959_v55 = vld [vmem:[#allocation2 + $0xb1] sm:$0xff]  ;;  %v5749_v58 = vpack.c.bf16 %v3663_v48, %v3662_v45 }
 0x1f3   : > { %v908_v48 = vld [vmem:[#allocation2 + $0x150] sm:$0xff] }
 0x1f4   : > { %5717 = vmatpush1.bf16.msra.mxu1 %v5716_v29  ;;  %v895_v29 = vld [vmem:[#allocation2 + $0xb0] sm:$0xff] }
 0x1f5   : > { %2143 = vmatmul.mubr.f32.gmra.mrb[48].mxu0 %v8365_v47  ;;  %5718 = vmatprep.subr.bf16.mxu1 %v8361_v8  ;;  %v5743_v47 = vpack.c.bf16 %v3659_v32, %v3658_v31  ;;  %v3773_v31 = vld [vmem:[#allocation9 + $0x428] sm:$0xff] }
 0x1f6   : > { %2147 = vmatprep.mubr.f32.mxu0 %v7234_v18  ;;  %v3643_v18 = vld [vmem:[#allocation9 + $0x18] sm:$0xff] }
 0x1f9   : > { %2148 = vmatmul.mubr.f32.gmra.mrb[50].mxu0 %v8366_v50  ;;  %v3660_v50 = vld [vmem:[#allocation9 + $0xa0] sm:$0xff] }
 0x1fa   : > { %2152 = vmatprep.mubr.f32.mxu0 %v7238_v11  ;;  %v949_v11 = vld [vmem:[#allocation2 + $0x39] sm:$0xff] }
 0x1fd   : > { %2153 = vmatmul.mubr.f32.gmra.mrb[52].mxu0 %v8367_v53  ;;  %v3661_v53 = vld [vmem:[#allocation9 + $0xa8] sm:$0xff] }
 0x1fe   : > { %2157 = vmatprep.mubr.f32.mxu0 %v7242_v27  ;;  %v5719_v27 = vpack.c.bf16 %v3643_v18, %v3642_v3  ;;  %v3664_v3 = vld [vmem:[#allocation9 + $0xc0] sm:$0xff] }
 0x1ff   : > { %v960_v18 = vld [vmem:[#allocation2 + $0xc1] sm:$0xff] }
 0x200   : > { %5720 = vmatpush1.bf16.msra.mxu1 %v5719_v27  ;;  %v3666_v27 = vld [vmem:[#allocation9 + $0xd0] sm:$0xff] }
 0x201   : > { %2158 = vmatmul.mubr.f32.gmra.mrb[54].mxu0 %v8368_v57  ;;  %5721 = vmatprep.subr.bf16.mxu1 %v8361_v8  ;;  %v893_v57 = vld [vmem:[#allocation2 + $0x98] sm:$0xff] }
 0x202   : > { %2162 = vmatprep.mubr.f32.mxu0 %v7248_v0  ;;  %v3644_v0 = vld [vmem:[#allocation9 + $0x20] sm:$0xff] }
 0x205   : > { %2163 = vmatmul.mubr.f32.gmra.mrb[56].mxu0 %v8369_v60  ;;  %v958_v60 = vld [vmem:[#allocation2 + $0xa9] sm:$0xff] }
 0x206   : > { %2167 = vmatprep.mubr.f32.mxu0 %v7254_v5  ;;  %v3645_v5 = vld [vmem:[#allocation9 + $0x28] sm:$0xff] }
 0x207   : > { %v5722_v35 = vpack.c.bf16 %v3645_v5, %v3644_v0  ;;  %v3667_v0 = vld [vmem:[#allocation9 + $0xd8] sm:$0xff]  ;;  %v896_v5 = vld [vmem:[#allocation2 + $0xc0] sm:$0xff] }
 0x209   : > { %2168 = vmatmul.mubr.f32.gmra.mrb[58].mxu0 %v8370_v42  ;;  %5723 = vmatpush1.bf16.msra.mxu1 %v5722_v35  ;;  %v5746_v42 = vpack.c.bf16 %v3661_v53, %v3660_v50  ;;  %v897_v35 = vld [vmem:[#allocation2 + $0xc8] sm:$0xff]  ;;  %v2840_v50 = vld [vmem:[#allocation3 + $0x9] sm:$0xff]  ;;  %v972_v53 = vld [vmem:[#allocation2 + $0x151] sm:$0xff] }
 0x20a   : > { %2172 = vmatprep.mubr.f32.mxu0 %v849_v26  ;;  %5724 = vmatprep.subr.bf16.mxu1 %v8361_v8  ;;  %v3656_v26 = vld [vmem:[#allocation9 + $0x80] sm:$0xff] }
 0x20b   : > { %v5740_v12 = vpack.c.bf16 %v3657_v16, %v3656_v26  ;;  %v906_v16 = vld [vmem:[#allocation2 + $0x138] sm:$0xff] }
 0x20d   : > { %2173 = vmatmul.mubr.f32.gmra.mrb[60].mxu0 %v7360_v15  ;;  %5726 = vmatpush1.bf16.msra.mxu1 %v5725_v22  ;;  %v965_v22 = vld [vmem:[#allocation2 + $0xf9] sm:$0xff] }
 0x20e   : > { %2177 = vmatprep.mubr.f32.mxu0 %v850_v34  ;;  %5727 = vmatprep.subr.bf16.mxu1 %v8361_v8  ;;  %v891_v34 = vld [vmem:[#allocation2 + $0x80] sm:$0xff] }
 0x211   : > { %2178 = vmatmul.mubr.f32.gmra.mrb[62].mxu0 %v7363_v17  ;;  %5729 = vmatpush1.bf16.msra.mxu1 %v5728_v21  ;;  %v903_v21 = vld [vmem:[#allocation2 + $0x110] sm:$0xff] }
 0x212   : > { %2247 = vmatprep.mubr.f32.mxu0 %v948_v52  ;;  %5730 = vmatprep.subr.bf16.mxu1 %v8361_v8  ;;  %v894_v52 = vld [vmem:[#allocation2 + $0xa8] sm:$0xff] }
 0x215   : > { %2248 = vmatmul.mubr.f32.vlgmr.msra.gmra.mrb[0].mxu0 %v884_v10  ;;  %5732 = vmatpush1.bf16.msra.mxu1 %v5731_v4  ;;  %v3665_v10 = vld [vmem:[#allocation9 + $0xc8] sm:$0xff] }
 0x216   : > { %2252 = vmatprep.mubr.f32.mxu0 %v949_v11  ;;  %5910 = vmatpush3.bf16.msra.mxu0 %v7368_v23  ;;  %v5752_v11 = vpack.c.bf16 %v3665_v10, %v3664_v3  ;;  %v969_v4 = vld [vmem:[#allocation2 + $0x129] sm:$0xff]  ;;  %v909_v10 = vld [vmem:[#allocation2 + $0x158] sm:$0xff] }
 0x217   : > { %5733 = vmatprep.subr.bf16.mxu1 %v8361_v8 }
 0x219   : > { %2253 = vmatmul.mubr.f32.gmra.mrb[2].mxu0 %v885_v40  ;;  %5735 = vmatpush1.bf16.msra.mxu1 %v5734_v37  ;;  %v961_v40 = vld [vmem:[#allocation2 + $0xc9] sm:$0xff]  ;;  %v3671_v37 = vld [vmem:[#allocation9 + $0xf8] sm:$0xff] }
 0x21a   : > { %2257 = vmatprep.mubr.f32.mxu0 %v950_v62  ;;  %5736 = vmatprep.subr.bf16.mxu1 %v8361_v8  ;;  %v5755_v62 = vpack.c.bf16 %v3667_v0, %v3666_v27  ;;  %v3778_v27 = vld [vmem:[#allocation9 + $0x450] sm:$0xff]  ;;  %v3779_v0 = vld [vmem:[#allocation9 + $0x458] sm:$0xff] }
 0x21d   : > { %2258 = vmatmul.mubr.f32.gmra.mrb[4].mxu0 %v886_v49  ;;  %5738 = vmatpush1.bf16.msra.mxu1 %v5737_v7  ;;  %v899_v49 = vld [vmem:[#allocation2 + $0xe0] sm:$0xff] }
 0x21e   : > { %2262 = vmatprep.mubr.f32.mxu0 %v951_v46  ;;  %5739 = vmatprep.subr.bf16.mxu1 %v8361_v8  ;;  %v900_v46 = vld [vmem:[#allocation2 + $0xf0] sm:$0xff] }
 0x221   : > { %2263 = vmatmul.mubr.f32.gmra.mrb[6].mxu0 %v887_v25  ;;  %5741 = vmatpush1.bf16.msra.mxu1 %v5740_v12  ;;  %v902_v25 = vld [vmem:[#allocation2 + $0x108] sm:$0xff]  ;;  %v3772_v12 = vld [vmem:[#allocation9 + $0x420] sm:$0xff] }
 0x222   : > { %2267 = vmatprep.mubr.f32.mxu0 %v952_v56  ;;  %5742 = vmatprep.subr.bf16.mxu1 %v8361_v8  ;;  %v967_v56 = vld [vmem:[#allocation2 + $0x111] sm:$0xff]  ;;  %v7393_v32 = vpack.c.bf16 %v3773_v31, %v3772_v12 }
 0x223   : > { %v3682_v31 = vld [vmem:[#allocation9 + $0x150] sm:$0xff] }
 0x224   : > { %8373 = vst [vmem:[#allocation18_spill] sm:$0xff] %v7393_v32 }
 0x225   : > { %2268 = vmatmul.mubr.f32.gmra.mrb[8].mxu0 %v888_v30  ;;  %5744 = vmatpush1.bf16.msra.mxu1 %v5743_v47  ;;  %v3668_v30 = vld [vmem:[#allocation9 + $0xe0] sm:$0xff] }
 0x226   : > { %2272 = vmatprep.mubr.f32.mxu0 %v953_v13  ;;  %5745 = vmatprep.subr.bf16.mxu1 %v8361_v8  ;;  %v3669_v13 = vld [vmem:[#allocation9 + $0xe8] sm:$0xff] }
 0x227   : > { %v5758_v54 = vpack.c.bf16 %v3669_v13, %v3668_v30  ;;  %v978_v13 = vld [vmem:[#allocation2 + $0x199] sm:$0xff] }
 0x229   : > { %2273 = vmatmul.mubr.f32.gmra.mrb[10].mxu0 %v889_v9  ;;  %5747 = vmatpush1.bf16.msra.mxu1 %v5746_v42  ;;  %v3775_v42 = vld [vmem:[#allocation9 + $0x438] sm:$0xff] }
 0x22a   : > { %2277 = vmatprep.mubr.f32.mxu0 %v954_v59  ;;  %5748 = vmatprep.subr.bf16.mxu1 %v8361_v8  ;;  %v3670_v59 = vld [vmem:[#allocation9 + $0xf0] sm:$0xff] }
 0x22b   : > { %v5761_v7 = vpack.c.bf16 %v3671_v37, %v3670_v59  ;;  %v979_v59 = vld [vmem:[#allocation2 + $0x1a1] sm:$0xff]  ;;  %v3678_v37 = vld [vmem:[#allocation9 + $0x130] sm:$0xff] }
 0x22d   : > { %2278 = vmatmul.mubr.f32.gmra.mrb[12].mxu0 %v890_v63  ;;  %5750 = vmatpush1.bf16.msra.mxu1 %v5749_v58  ;;  %v3770_v63 = vld [vmem:[#allocation9 + $0x410] sm:$0xff]  ;;  %v3777_v58 = vld [vmem:[#allocation9 + $0x448] sm:$0xff] }
 0x22e   : > { %2282 = vmatprep.mubr.f32.mxu0 %v955_v19  ;;  %5751 = vmatprep.subr.bf16.mxu1 %v8361_v8  ;;  %v3771_v19 = vld [vmem:[#allocation9 + $0x418] sm:$0xff] }
 0x22f   : > { %v7389_v26 = vpack.c.bf16 %v3771_v19, %v3770_v63 }
 0x231   : > { %2283 = vmatmul.mubr.f32.gmra.mrb[14].mxu0 %v891_v34  ;;  %5753 = vmatpush1.bf16.msra.mxu1 %v5752_v11  ;;  %8372 = vst [vmem:[#allocation17_spill] sm:$0xff] %v7389_v26  ;;  %v2839_v34 = vld [vmem:[#allocation3 + $0x1] sm:$0xff] }
 0x232   : > { %2287 = vmatprep.mubr.f32.mxu0 %v956_v24  ;;  %5754 = vmatprep.subr.bf16.mxu1 %v8361_v8  ;;  %v971_v24 = vld [vmem:[#allocation2 + $0x141] sm:$0xff] }
 0x233   : > { %5912 = vmatprep.subr.bf16.mxu0 %v7389_v26  ;;  %3848 = vmatprep.mubr.f32.mxu1 %v2839_v34 }
 0x234   : > { %5914 = vmatpush3.bf16.msra.mxu0 %v7389_v26 }
 0x235   : > { %2288 = vmatmul.mubr.f32.gmra.mrb[16].mxu0 %v892_v39  ;;  %5756 = vmatpush1.bf16.msra.mxu1 %v5755_v62  ;;  %v7395_v39 = vld [vmem:[#allocation2] sm:$0xff]  ;;  %v3673_v62 = vld [vmem:[#allocation9 + $0x108] sm:$0xff] }
 0x236   : > { %2292 = vmatprep.mubr.f32.mxu0 %v957_v43  ;;  %5757 = vmatprep.subr.bf16.mxu1 %v8361_v8  ;;  %v907_v43 = vld [vmem:[#allocation2 + $0x140] sm:$0xff] }
 0x237   : > { %5916 = vmatprep.subr.bf16.mxu0 %v7393_v32 }
 0x238   : > { %5918 = vmatpush3.bf16.msra.mxu0 %v7393_v32 }
 0x239   : > { %2293 = vmatmul.mubr.f32.gmra.mrb[18].mxu0 %v893_v57  ;;  %5759 = vmatpush1.bf16.msra.mxu1 %v5758_v54  ;;  %v3677_v54 = vld [vmem:[#allocation9 + $0x128] sm:$0xff] }
 0x23a   : > { %2297 = vmatprep.mubr.f32.mxu0 %v958_v60  ;;  %5760 = vmatprep.subr.bf16.mxu1 %v8361_v8  ;;  %v3774_v60 = vld [vmem:[#allocation9 + $0x430] sm:$0xff] }
 0x23b   : > { %v7405_v45 = vpack.c.bf16 %v3775_v42, %v3774_v60  ;;  %v3684_v60 = vld [vmem:[#allocation9 + $0x160] sm:$0xff]  ;;  %v3685_v42 = vld [vmem:[#allocation9 + $0x168] sm:$0xff] }
 0x23d   : > { %2298 = vmatmul.mubr.f32.gmra.mrb[20].mxu0 %v894_v52  ;;  %5762 = vmatpush1.bf16.msra.mxu1 %v5761_v7  ;;  %8374 = vst [vmem:[#allocation19_spill] sm:$0xff] %v7405_v45  ;;  %v973_v52 = vld [vmem:[#allocation2 + $0x159] sm:$0xff] }
 0x23e   : > { %2302 = vmatprep.mubr.f32.mxu0 %v959_v55  ;;  %5763 = vmatprep.subr.bf16.mxu1 %v8361_v8  ;;  %v3776_v55 = vld [vmem:[#allocation9 + $0x440] sm:$0xff] }
 0x23f   : > { %5920 = vmatprep.subr.bf16.mxu0 %v7405_v45  ;;  %v7410_v3 = vpack.c.bf16 %v3777_v58, %v3776_v55  ;;  %v3680_v7 = vld [vmem:[#allocation9 + $0x140] sm:$0xff]  ;;  %v3686_v58 = vld [vmem:[#allocation9 + $0x170] sm:$0xff] }
 0x240   : > { %3849 = vmatmul.mubr.f32.vlgmr.msra.gmra.mrb[32].mxu1 %v7395_v39  ;;  %5922 = vmatpush3.bf16.msra.mxu0 %v7405_v45 }
 0x241   : > { %2303 = vmatmul.mubr.f32.gmra.mrb[22].mxu0 %v895_v29  ;;  %3853 = vmatprep.mubr.f32.mxu1 %v2840_v50  ;;  %8375 = vst [vmem:[#allocation20_spill] sm:$0xff] %v7410_v3 }
 0x242   : > { %2307 = vmatprep.mubr.f32.mxu0 %v960_v18  ;;  %5924 = vmatprep.subr.bf16.mxu0 %v7410_v3  ;;  %v974_v18 = vld [vmem:[#allocation2 + $0x169] sm:$0xff] }
 0x244   : > { %3854 = vmatmul.mubr.f32.gmra.mrb[34].mxu1 %v7395_v39  ;;  %5926 = vmatpush3.bf16.msra.mxu0 %v7410_v3 }
 0x245   : > { %2308 = vmatmul.mubr.f32.gmra.mrb[24].mxu0 %v896_v5  ;;  %v7418_v5 = vpack.c.bf16 %v3779_v0, %v3778_v27 }
 0x246   : > { %2312 = vmatprep.mubr.f32.mxu0 %v961_v40  ;;  %v3672_v40 = vld [vmem:[#allocation9 + $0x100] sm:$0xff] }
 0x247   : > { %8376 = vst [vmem:[#allocation21_spill] sm:$0xff] %v7418_v5  ;;  %5928 = vmatprep.subr.bf16.mxu0 %v7418_v5 }
 0x248   : > { %5930 = vmatpush3.bf16.msra.mxu0 %v7418_v5 }
 0x249   : > { %2313 = vmatmul.mubr.f32.gmra.mrb[26].mxu0 %v897_v35  ;;  %v910_v35 = vld [vmem:[#allocation2 + $0x168] sm:$0xff] }
 0x24a   : > { %2317 = vmatprep.mubr.f32.mxu0 %v962_v44  ;;  %v5764_v44 = vpack.c.bf16 %v3673_v62, %v3672_v40  ;;  %v3688_v40 = vld [vmem:[#allocation9 + $0x180] sm:$0xff]  ;;  %v3689_v62 = vld [vmem:[#allocation9 + $0x188] sm:$0xff] }
 0x24c   : > { %5765 = vmatpush1.bf16.msra.mxu1 %v5764_v44 }
 0x24d   : > { %2318 = vmatmul.mubr.f32.gmra.mrb[28].mxu0 %v898_v20  ;;  %v975_v20 = vld [vmem:[#allocation2 + $0x171] sm:$0xff]  ;;  %5766 = vmatprep.subr.bf16.mxu1 %v8361_v8 }
 0x24e   : > { %2322 = vmatprep.mubr.f32.mxu0 %v963_v41  ;;  %v3780_v41 = vld [vmem:[#allocation9 + $0x460] sm:$0xff] }
 0x251   : > { %2323 = vmatmul.mubr.f32.gmra.mrb[30].mxu0 %v899_v49  ;;  %v3781_v49 = vld [vmem:[#allocation9 + $0x468] sm:$0xff] }
 0x252   : > { %2327 = vmatprep.mubr.f32.mxu0 %v964_v6  ;;  %v7422_v6 = vpack.c.bf16 %v3781_v49, %v3780_v41  ;;  %v3690_v41 = vld [vmem:[#allocation9 + $0x190] sm:$0xff]  ;;  %v3691_v49 = vld [vmem:[#allocation9 + $0x198] sm:$0xff] }
 0x254   : > { %8377 = vst [vmem:[#allocation22_spill] sm:$0xff] %v7422_v6  ;;  %5932 = vmatprep.subr.bf16.mxu0 %v7422_v6 }
 0x255   : > { %2328 = vmatmul.mubr.f32.gmra.mrb[32].mxu0 %v900_v46  ;;  %v911_v46 = vld [vmem:[#allocation2 + $0x170] sm:$0xff] }
 0x256   : > { %2332 = vmatprep.mubr.f32.mxu0 %v965_v22  ;;  %5934 = vmatpush3.bf16.msra.mxu0 %v7422_v6 }
 0x259   : > { %2333 = vmatmul.mubr.f32.gmra.mrb[34].mxu0 %v901_v51 }
 0x25a   : > { %2337 = vmatprep.mubr.f32.mxu0 %v966_v38  ;;  %v3782_v38 = vld [vmem:[#allocation9 + $0x470] sm:$0xff] }
 0x25d   : > { %2338 = vmatmul.mubr.f32.gmra.mrb[36].mxu0 %v902_v25  ;;  %v3783_v25 = vld [vmem:[#allocation9 + $0x478] sm:$0xff] }
 0x25e   : > { %2342 = vmatprep.mubr.f32.mxu0 %v967_v56  ;;  %v7431_v56 = vpack.c.bf16 %v3783_v25, %v3782_v38 }
 0x260   : > { %v7384_v9 = vpop.f32.mrb[0].mxu1  ;;  %8378 = vst [vmem:[#allocation23_spill] sm:$0xff] %v7431_v56  ;;  %5936 = vmatprep.subr.bf16.mxu0 %v7431_v56 }
 0x261   : > { %2343 = vmatmul.mubr.f32.gmra.mrb[38].mxu0 %v903_v21  ;;  %v7387_v2 = vpop.f32.mrb[1].mxu1  ;;  %v3674_v21 = vld [vmem:[#allocation9 + $0x110] sm:$0xff] }
 0x262   : > { %2347 = vmatprep.mubr.f32.mxu0 %v968_v28  ;;  %v3675_v28 = vld [vmem:[#allocation9 + $0x118] sm:$0xff]  ;;  %5938 = vmatpush3.bf16.msra.mxu0 %v7431_v56 }
 0x264   : > { %v7400_v47 = vpop.f32.mrb[2].mxu1 }
 0x265   : > { %2348 = vmatmul.mubr.f32.gmra.mrb[40].mxu0 %v904_v61  ;;  %v7403_v57 = vpop.f32.mrb[3].mxu1  ;;  %v5767_v61 = vpack.c.bf16 %v3675_v28, %v3674_v21  ;;  %v3692_v21 = vld [vmem:[#allocation9 + $0x1a0] sm:$0xff]  ;;  %v3693_v28 = vld [vmem:[#allocation9 + $0x1a8] sm:$0xff] }
 0x266   : > { %2352 = vmatprep.mubr.f32.mxu0 %v969_v4 }
 0x267   : > { %5768 = vmatpush1.bf16.msra.mxu1 %v5767_v61  ;;  %v5794_v61 = vpack.c.bf16 %v3693_v28, %v3692_v21 }
 0x268   : > { %v7413_v29 = vpop.f32.mrb[4].mxu1  ;;  %5769 = vmatprep.subr.bf16.mxu1 %v8361_v8 }
 0x269   : > { %2353 = vmatmul.mubr.f32.gmra.mrb[42].mxu0 %v905_v33  ;;  %v7416_v11 = vpop.f32.mrb[5].mxu1 }
 0x26a   : > { %2357 = vmatprep.mubr.f32.mxu0 %v970_v14  ;;  %v3679_v14 = vld [vmem:[#allocation9 + $0x138] sm:$0xff] }
 0x26c   : > { %v7426_v22 = vpop.f32.mrb[6].mxu1 }
 0x26d   : > { %2358 = vmatmul.mubr.f32.gmra.mrb[44].mxu0 %v906_v16  ;;  %v7429_v51 = vpop.f32.mrb[7].mxu1  ;;  %v3681_v16 = vld [vmem:[#allocation9 + $0x148] sm:$0xff] }
 0x26e   : > { %2362 = vmatprep.mubr.f32.mxu0 %v971_v24  ;;  %v5776_v34 = vpack.c.bf16 %v3681_v16, %v3680_v7  ;;  %v3697_v7 = vld [vmem:[#allocation9 + $0x1c8] sm:$0xff] }
 0x270   : > { %v7439_v30 = vpop.f32.mrb[8].mxu1 }
 0x271   : > { %2363 = vmatmul.mubr.f32.gmra.mrb[46].mxu0 %v907_v43  ;;  %v7441_v4 = vpop.f32.mrb[9].mxu1 }
 0x272   : > { %2367 = vmatprep.mubr.f32.mxu0 %v972_v53 }
 0x275   : > { %2368 = vmatmul.mubr.f32.gmra.mrb[48].mxu0 %v908_v48  ;;  %v5782_v48 = vpack.c.bf16 %v3685_v42, %v3684_v60  ;;  %v3700_v42 = vld [vmem:[#allocation9 + $0x1e0] sm:$0xff] }
 0x276   : > { %2372 = vmatprep.mubr.f32.mxu0 %v973_v52 }
 0x279   : > { %2373 = vmatmul.mubr.f32.gmra.mrb[50].mxu0 %v909_v10  ;;  %v3687_v10 = vld [vmem:[#allocation9 + $0x178] sm:$0xff] }
 0x27a   : > { %2377 = vmatprep.mubr.f32.mxu0 %v974_v18  ;;  %v5785_v18 = vpack.c.bf16 %v3687_v10, %v3686_v58  ;;  %v7505_v10 = vld [vmem:[%s8293_s3] ss:$0 sm:$0xff] }
 0x27d   : > { %2378 = vmatmul.mubr.f32.gmra.mrb[52].mxu0 %v910_v35  ;;  %v5788_v35 = vpack.c.bf16 %v3689_v62, %v3688_v40 }
 0x27e   : > { %2382 = vmatprep.mubr.f32.mxu0 %v975_v20 }
 0x281   : > { %2383 = vmatmul.mubr.f32.gmra.mrb[54].mxu0 %v911_v46  ;;  %v5791_v46 = vpack.c.bf16 %v3691_v49, %v3690_v41  ;;  %v3702_v49 = vld [vmem:[#allocation9 + $0x1f0] sm:$0xff] }
 0x282   : > { %2387 = vmatprep.mubr.f32.mxu0 %v7360_v15  ;;  %v3676_v15 = vld [vmem:[#allocation9 + $0x120] sm:$0xff] }
 0x283   : > { %v5770_v33 = vpack.c.bf16 %v3677_v54, %v3676_v15  ;;  %v3694_v54 = vld [vmem:[#allocation9 + $0x1b0] sm:$0xff] }
 0x285   : > { %2388 = vmatmul.mubr.f32.gmra.mrb[56].mxu0 %v7244_v1  ;;  %5771 = vmatpush1.bf16.msra.mxu1 %v5770_v33  ;;  %v7446_v1 = vpop.f32.mrb[10].mxu1  ;;  %v3695_v33 = vld [vmem:[#allocation9 + $0x1b8] sm:$0xff] }
 0x286   : > { %2392 = vmatprep.mubr.f32.mxu0 %v7363_v17  ;;  %5772 = vmatprep.subr.bf16.mxu1 %v8361_v8  ;;  %v7448_v17 = vpop.f32.mrb[11].mxu1 }
 0x287   : > { %v7452_v63 = vpop.f32.mrb[12].mxu1 }
 0x288   : > { %v7454_v19 = vpop.f32.mrb[13].mxu1 }
 0x289   : > { %2393 = vmatmul.mubr.f32.gmra.mrb[58].mxu0 %v7250_v36  ;;  %v5773_v36 = vpack.c.bf16 %v3679_v14, %v3678_v37  ;;  %v7457_v24 = vpop.f32.mrb[14].mxu1 }
 0x28a   : > { %2397 = vmatprep.mubr.f32.mxu0 %v978_v13  ;;  %v7459_v12 = vpop.f32.mrb[15].mxu1 }
 0x28b   : > { %5774 = vmatpush1.bf16.msra.mxu1 %v5773_v36  ;;  %v7462_v50 = vpop.f32.mrb[16].mxu1  ;;  %v3696_v36 = vld [vmem:[#allocation9 + $0x1c0] sm:$0xff] }
 0x28c   : > { %5775 = vmatprep.subr.bf16.mxu1 %v8361_v8  ;;  %v7464_v53 = vpop.f32.mrb[17].mxu1  ;;  %v5800_v16 = vpack.c.bf16 %v3697_v7, %v3696_v36 }
 0x28d   : > { %2398 = vmatmul.mubr.f32.gmra.mrb[60].mxu0 %v7395_v39  ;;  %v7467_v52 = vpop.f32.mrb[18].mxu1 }
 0x28e   : > { %2402 = vmatprep.mubr.f32.mxu0 %v979_v59  ;;  %v7469_v55 = vpop.f32.mrb[19].mxu1  ;;  %v5797_v59 = vpack.c.bf16 %v3695_v33, %v3694_v54 }
 0x28f   : > { %5777 = vmatpush1.bf16.msra.mxu1 %v5776_v34  ;;  %v7472_v27 = vpop.f32.mrb[20].mxu1 }
 0x290   : > { %5778 = vmatprep.subr.bf16.mxu1 %v8361_v8  ;;  %v7474_v0 = vpop.f32.mrb[21].mxu1 }
 0x291   : > { %2403 = vmatmul.mubr.f32.gmra.mrb[62].mxu0 %v7395_v39  ;;  %v3683_v39 = vld [vmem:[#allocation9 + $0x158] sm:$0xff]  ;;  %v7477_v44 = vpop.f32.mrb[22].mxu1 }
 0x292   : > { %v5779_v43 = vpack.c.bf16 %v3683_v39, %v3682_v31  ;;  %v7479_v20 = vpop.f32.mrb[23].mxu1  ;;  %v3698_v39 = vld [vmem:[#allocation9 + $0x1d0] sm:$0xff] }
 0x293   : > { %v7482_v38 = vpop.f32.mrb[24].mxu1 }
 0x294   : > { %5780 = vmatpush1.bf16.msra.mxu1 %v5779_v43  ;;  %v7484_v25 = vpop.f32.mrb[25].mxu1  ;;  %v3699_v43 = vld [vmem:[#allocation9 + $0x1d8] sm:$0xff] }
 0x295   : > { %5781 = vmatprep.subr.bf16.mxu1 %v8361_v8  ;;  %v7487_v13 = vpop.f32.mrb[26].mxu1  ;;  %v5803_v60 = vpack.c.bf16 %v3699_v43, %v3698_v39 }
 0x296   : > { %v7489_v15 = vpop.f32.mrb[27].mxu1 }
 0x298   : > { %5783 = vmatpush1.bf16.msra.mxu1 %v5782_v48  ;;  %v7492_v37 = vpop.f32.mrb[28].mxu1  ;;  %v3701_v48 = vld [vmem:[#allocation9 + $0x1e8] sm:$0xff] }
 0x299   : > { %5784 = vmatprep.subr.bf16.mxu1 %v8361_v8  ;;  %v7494_v14 = vpop.f32.mrb[29].mxu1 }
 0x29c   : > { %5786 = vmatpush1.bf16.msra.mxu1 %v5785_v18  ;;  %v5806_v18 = vpack.c.bf16 %v3701_v48, %v3700_v42 }
 0x29d   : > { %5787 = vmatprep.subr.bf16.mxu1 %v8361_v8 }
 0x2a0   : > { %5789 = vmatpush1.bf16.msra.mxu1 %v5788_v35  ;;  %v7511_v35 = vld [vmem:[%s8294_s4] ss:$0 sm:$0xff] }
 0x2a1   : > { %5790 = vmatprep.subr.bf16.mxu1 %v8361_v8 }
 0x2a4   : > { %5792 = vmatpush1.bf16.msra.mxu1 %v5791_v46  ;;  %v3703_v46 = vld [vmem:[#allocation9 + $0x1f8] sm:$0xff] }
 0x2a5   : > { %5793 = vmatprep.subr.bf16.mxu1 %v8361_v8  ;;  %v5809_v28 = vpack.c.bf16 %v3703_v46, %v3702_v49 }
 0x2a8   : > { %5795 = vmatpush1.bf16.msra.mxu1 %v5794_v61 }
 0x2a9   : > { %5796 = vmatprep.subr.bf16.mxu1 %v8361_v8 }
 0x2aa   : > { %v7497_v34 = vpop.f32.mrb[30].mxu1 }
 0x2ab   : > { %v7499_v31 = vpop.f32.mrb[31].mxu1 }
 0x2ac   : > { %5798 = vmatpush1.bf16.msra.mxu1 %v5797_v59 }
 0x2ad   : > { %5799 = vmatprep.subr.bf16.mxu1 %v8361_v8 }
 0x2b0   : > { %5801 = vmatpush1.bf16.msra.mxu1 %v5800_v16 }
 0x2b1   : > { %5802 = vmatprep.subr.bf16.mxu1 %v8361_v8 }
 0x2b4   : > { %5804 = vmatpush1.bf16.msra.mxu1 %v5803_v60 }
 0x2b5   : > { %5805 = vmatprep.subr.bf16.mxu1 %v8361_v8 }
 0x2b8   : > { %5807 = vmatpush1.bf16.msra.mxu1 %v5806_v18 }
 0x2b9   : > { %5808 = vmatprep.subr.bf16.mxu1 %v8361_v8 }
 0x2bc   : > { %5810 = vmatpush1.bf16.msra.mxu1 %v5809_v28 }
 0x2bd   : > { %5811 = vmatprep.subr.bf16.mxu1 %v8361_v8 }
 0x2e8   : > { %v2249_v58 = vpop.f32.mrb[0].mxu0 }
 0x2e9   : > { %v2475_v40 = vadd.f32 %v7387_v2, %v2249_v58  ;;  %v2251_v62 = vpop.f32.mrb[1].mxu0 }
 0x2eb   : > { %v2640_v41 = vmul.f32 %v7505_v10, %v2475_v40 }
 0x2ec   : > { %v2254_v21 = vpop.f32.mrb[2].mxu0 }
 0x2ed   : > { %v2679_v61 = vadd.f32 %v7511_v35, %v2640_v41  ;;  %v2480_v54 = vadd.f32 %v7384_v9, %v2254_v21  ;;  %v2256_v2 = vpop.f32.mrb[3].mxu0 }
 0x2ef   : > { %v2711_v33 = vmax.f32 %v2679_v61, 0.0  ;;  %v2641_v59 = vmul.f32 %v7505_v10, %v2480_v54 }
 0x2f0   : > { %v2259_v36 = vpop.f32.mrb[4].mxu0 }
 0x2f1   : > { %2743 = vst [vmem:[#allocation3 + $0x19] sm:$0xff] %v2711_v33  ;;  %v2680_v7 = vadd.f32 %v7511_v35, %v2641_v59  ;;  %v2485_v16 = vadd.f32 %v7403_v57, %v2259_v36  ;;  %v2261_v39 = vpop.f32.mrb[5].mxu0  ;;  %3858 = vmatprep.mubr.f32.mxu1 %v2711_v33 }
 0x2f3   : > { %v2712_v43 = vmax.f32 %v2680_v7, 0.0  ;;  %v2642_v60 = vmul.f32 %v7505_v10, %v2485_v16 }
 0x2f4   : > { %v2264_v42 = vpop.f32.mrb[6].mxu0 }
 0x2f5   : > { %2744 = vst [vmem:[#allocation3 + $0x21] sm:$0xff] %v2712_v43  ;;  %v2681_v9 = vadd.f32 %v7511_v35, %v2642_v60  ;;  %v2490_v48 = vadd.f32 %v7400_v47, %v2264_v42  ;;  %v2266_v58 = vpop.f32.mrb[7].mxu0 }
 0x2f7   : > { %v2713_v18 = vmax.f32 %v2681_v9, 0.0  ;;  %v2643_v40 = vmul.f32 %v7505_v10, %v2490_v48 }
 0x2f8   : > { %v2269_v62 = vpop.f32.mrb[8].mxu0  ;;  %v7525_v41 = vld [vmem:[#allocation3 + $0x18] sm:$0xff] }
 0x2f9   : > { %2745 = vst [vmem:[#allocation3 + $0x31] sm:$0xff] %v2713_v18  ;;  %v2682_v57 = vadd.f32 %v7511_v35, %v2643_v40  ;;  %v2495_v49 = vadd.f32 %v7416_v11, %v2269_v62  ;;  %v2271_v46 = vpop.f32.mrb[9].mxu0  ;;  %3859 = vmatmul.mubr.f32.gmra.mrb[36].mxu1 %v7525_v41 }
 0x2fa   : > { %3863 = vmatprep.mubr.f32.mxu1 %v2712_v43 }
 0x2fb   : > { %v2714_v21 = vmax.f32 %v2682_v57, 0.0  ;;  %v2644_v28 = vmul.f32 %v7505_v10, %v2495_v49 }
 0x2fc   : > { %v2274_v47 = vpop.f32.mrb[10].mxu0  ;;  %v7531_v61 = vld [vmem:[#allocation3 + $0x20] sm:$0xff] }
 0x2fd   : > { %2746 = vst [vmem:[#allocation3 + $0x39] sm:$0xff] %v2714_v21  ;;  %v2683_v54 = vadd.f32 %v7511_v35, %v2644_v28  ;;  %v2500_v2 = vadd.f32 %v7413_v29, %v2274_v47  ;;  %v2276_v33 = vpop.f32.mrb[11].mxu0  ;;  %3864 = vmatmul.mubr.f32.gmra.mrb[38].mxu1 %v7531_v61 }
 0x2fe   : > { %3868 = vmatprep.mubr.f32.mxu1 %v2713_v18 }
 0x2ff   : > { %v2715_v11 = vmax.f32 %v2683_v54, 0.0  ;;  %v2645_v59 = vmul.f32 %v7505_v10, %v2500_v2 }
 0x300   : > { %v2279_v36 = vpop.f32.mrb[12].mxu0  ;;  %v7537_v7 = vld [vmem:[#allocation3 + $0x30] sm:$0xff] }
 0x301   : > { %2747 = vst [vmem:[#allocation3 + $0x49] sm:$0xff] %v2715_v11  ;;  %v2684_v16 = vadd.f32 %v7511_v35, %v2645_v59  ;;  %v2505_v39 = vadd.f32 %v7429_v51, %v2279_v36  ;;  %v2281_v43 = vpop.f32.mrb[13].mxu0  ;;  %3869 = vmatmul.mubr.f32.gmra.mrb[40].mxu1 %v7537_v7 }
 0x302   : > { %3873 = vmatprep.mubr.f32.mxu1 %v2714_v21 }
 0x303   : > { %v2716_v29 = vmax.f32 %v2684_v16, 0.0  ;;  %v2646_v60 = vmul.f32 %v7505_v10, %v2505_v39 }
 0x304   : > { %v2284_v42 = vpop.f32.mrb[14].mxu0  ;;  %v7543_v9 = vld [vmem:[#allocation3 + $0x32] sm:$0xff]  ;;  %v7547_v58 = vld [vmem:[#allocation3 + $0x3a] sm:$0xff] }
 0x305   : > { %v7545_v48 = vld [vmem:[#allocation3 + $0x38] sm:$0xff]  ;;  %2748 = vst [vmem:[#allocation3 + $0x51] sm:$0xff] %v2716_v29  ;;  %v2685_v18 = vadd.f32 %v7511_v35, %v2646_v60  ;;  %v2510_v40 = vadd.f32 %v7426_v22, %v2284_v42  ;;  %v2286_v51 = vpop.f32.mrb[15].mxu0  ;;  %5443 = vmatprep.mubr.f32.mxu0 %v7543_v9 }
 0x306   : > { %3874 = vmatmul.mubr.f32.gmra.mrb[42].mxu1 %v7545_v48  ;;  %5444 = vmatmul.mubr.f32.vlgmr.msra.gmra.mrb[64].mxu0 %v7547_v58 }
 0x307   : > { %3878 = vmatprep.mubr.f32.mxu1 %v2715_v11  ;;  %v2717_v62 = vmax.f32 %v2685_v18, 0.0  ;;  %v2647_v57 = vmul.f32 %v7505_v10, %v2510_v40 }
 0x308   : > { %v2289_v49 = vpop.f32.mrb[16].mxu0  ;;  %v7555_v46 = vld [vmem:[#allocation3 + $0x48] sm:$0xff] }
 0x309   : > { %2749 = vst [vmem:[#allocation3 + $0x61] sm:$0xff] %v2717_v62  ;;  %v2686_v21 = vadd.f32 %v7511_v35, %v2647_v57  ;;  %v2515_v28 = vadd.f32 %v7441_v4, %v2289_v49  ;;  %v2291_v22 = vpop.f32.mrb[17].mxu0 }
 0x30a   : > { %3879 = vmatmul.mubr.f32.gmra.mrb[44].mxu1 %v7555_v46 }
 0x30b   : > { %3883 = vmatprep.mubr.f32.mxu1 %v2716_v29  ;;  %v2718_v47 = vmax.f32 %v2686_v21, 0.0  ;;  %v2648_v54 = vmul.f32 %v7505_v10, %v2515_v28 }
 0x30c   : > { %v2294_v2 = vpop.f32.mrb[18].mxu0  ;;  %v7561_v33 = vld [vmem:[#allocation3 + $0x4a] sm:$0xff]  ;;  %v7565_v59 = vld [vmem:[#allocation3 + $0x52] sm:$0xff] }
 0x30d   : > { %v7563_v11 = vld [vmem:[#allocation3 + $0x50] sm:$0xff]  ;;  %2750 = vst [vmem:[#allocation3 + $0x69] sm:$0xff] %v2718_v47  ;;  %v2687_v36 = vadd.f32 %v7511_v35, %v2648_v54  ;;  %v2520_v16 = vadd.f32 %v7439_v30, %v2294_v2  ;;  %v2296_v4 = vpop.f32.mrb[19].mxu0  ;;  %5446 = vmatprep.mubr.f32.mxu0 %v7561_v33 }
 0x30e   : > { %3884 = vmatmul.mubr.f32.gmra.mrb[46].mxu1 %v7563_v11  ;;  %5447 = vmatmul.mubr.f32.gmra.mrb[66].mxu0 %v7565_v59 }
 0x30f   : > { %3888 = vmatprep.mubr.f32.mxu1 %v2717_v62  ;;  %v2719_v39 = vmax.f32 %v2687_v36, 0.0  ;;  %v2649_v43 = vmul.f32 %v7505_v10, %v2520_v16 }
 0x310   : > { %v2299_v29 = vpop.f32.mrb[20].mxu0  ;;  %v7573_v60 = vld [vmem:[#allocation3 + $0x60] sm:$0xff] }
 0x311   : > { %2751 = vst [vmem:[#allocation3 + $0x79] sm:$0xff] %v2719_v39  ;;  %v2688_v42 = vadd.f32 %v7511_v35, %v2649_v43  ;;  %v2525_v18 = vadd.f32 %v7448_v17, %v2299_v29  ;;  %v2301_v30 = vpop.f32.mrb[21].mxu0 }
 0x312   : > { %3889 = vmatmul.mubr.f32.gmra.mrb[48].mxu1 %v7573_v60 }
 0x313   : > { %3893 = vmatprep.mubr.f32.mxu1 %v2718_v47  ;;  %v2720_v40 = vmax.f32 %v2688_v42, 0.0  ;;  %v2650_v51 = vmul.f32 %v7505_v10, %v2525_v18 }
 0x314   : > { %v2304_v57 = vpop.f32.mrb[22].mxu0  ;;  %v7579_v62 = vld [vmem:[#allocation3 + $0x62] sm:$0xff]  ;;  %v7583_v21 = vld [vmem:[#allocation3 + $0x6a] sm:$0xff] }
 0x315   : > { %v7581_v49 = vld [vmem:[#allocation3 + $0x68] sm:$0xff]  ;;  %2752 = vst [vmem:[#allocation3 + $0x81] sm:$0xff] %v2720_v40  ;;  %v2689_v28 = vadd.f32 %v7511_v35, %v2650_v51  ;;  %v2530_v22 = vadd.f32 %v7446_v1, %v2304_v57  ;;  %v2306_v17 = vpop.f32.mrb[23].mxu0  ;;  %5449 = vmatprep.mubr.f32.mxu0 %v7579_v62 }
 0x316   : > { %3894 = vmatmul.mubr.f32.gmra.mrb[50].mxu1 %v7581_v49  ;;  %5450 = vmatmul.mubr.f32.gmra.mrb[68].mxu0 %v7583_v21 }
 0x317   : > { %3898 = vmatprep.mubr.f32.mxu1 %v2719_v39  ;;  %v2721_v47 = vmax.f32 %v2689_v28, 0.0  ;;  %v2651_v54 = vmul.f32 %v7505_v10, %v2530_v22 }
 0x318   : > { %v2309_v2 = vpop.f32.mrb[24].mxu0  ;;  %v7591_v36 = vld [vmem:[#allocation3 + $0x78] sm:$0xff] }
 0x319   : > { %2753 = vst [vmem:[#allocation3 + $0x91] sm:$0xff] %v2721_v47  ;;  %v2690_v16 = vadd.f32 %v7511_v35, %v2651_v54  ;;  %v2535_v4 = vadd.f32 %v7454_v19, %v2309_v2  ;;  %v2311_v1 = vpop.f32.mrb[25].mxu0 }
 0x31a   : > { %3899 = vmatmul.mubr.f32.gmra.mrb[52].mxu1 %v7591_v36 }
 0x31b   : > { %3903 = vmatprep.mubr.f32.mxu1 %v2720_v40  ;;  %v2722_v43 = vmax.f32 %v2690_v16, 0.0  ;;  %v2652_v29 = vmul.f32 %v7505_v10, %v2535_v4 }
 0x31c   : > { %v2314_v42 = vpop.f32.mrb[26].mxu0  ;;  %v7597_v39 = vld [vmem:[#allocation3 + $0x7a] sm:$0xff]  ;;  %v7601_v30 = vld [vmem:[#allocation3 + $0x82] sm:$0xff] }
 0x31d   : > { %v7599_v18 = vld [vmem:[#allocation3 + $0x80] sm:$0xff]  ;;  %2754 = vst [vmem:[#allocation3 + $0x99] sm:$0xff] %v2722_v43  ;;  %v2691_v51 = vadd.f32 %v7511_v35, %v2652_v29  ;;  %v2540_v57 = vadd.f32 %v7452_v63, %v2314_v42  ;;  %v2316_v19 = vpop.f32.mrb[27].mxu0  ;;  %5452 = vmatprep.mubr.f32.mxu0 %v7597_v39 }
 0x31e   : > { %3904 = vmatmul.mubr.f32.gmra.mrb[54].mxu1 %v7599_v18  ;;  %5453 = vmatmul.mubr.f32.gmra.mrb[70].mxu0 %v7601_v30 }
 0x31f   : > { %3908 = vmatprep.mubr.f32.mxu1 %v2721_v47  ;;  %v2723_v40 = vmax.f32 %v2691_v51, 0.0  ;;  %v2653_v28 = vmul.f32 %v7505_v10, %v2540_v57 }
 0x320   : > { %v2319_v22 = vpop.f32.mrb[28].mxu0  ;;  %v7609_v17 = vld [vmem:[#allocation3 + $0x90] sm:$0xff] }
 0x321   : > { %2755 = vst [vmem:[#allocation3 + $0xa9] sm:$0xff] %v2723_v40  ;;  %v2692_v54 = vadd.f32 %v7511_v35, %v2653_v28  ;;  %v2545_v2 = vadd.f32 %v7459_v12, %v2319_v22  ;;  %v2321_v63 = vpop.f32.mrb[29].mxu0 }
 0x322   : > { %3909 = vmatmul.mubr.f32.gmra.mrb[56].mxu1 %v7609_v17 }
 0x323   : > { %3913 = vmatprep.mubr.f32.mxu1 %v2722_v43  ;;  %v2724_v16 = vmax.f32 %v2692_v54, 0.0  ;;  %v2654_v4 = vmul.f32 %v7505_v10, %v2545_v2 }
 0x324   : > { %v2324_v1 = vpop.f32.mrb[30].mxu0  ;;  %v7615_v47 = vld [vmem:[#allocation3 + $0x92] sm:$0xff]  ;;  %v7619_v42 = vld [vmem:[#allocation3 + $0x9a] sm:$0xff] }
 0x325   : > { %v7617_v29 = vld [vmem:[#allocation3 + $0x98] sm:$0xff]  ;;  %2756 = vst [vmem:[#allocation3 + $0xb1] sm:$0xff] %v2724_v16  ;;  %v2693_v51 = vadd.f32 %v7511_v35, %v2654_v4  ;;  %v2550_v57 = vadd.f32 %v7457_v24, %v2324_v1  ;;  %v2326_v12 = vpop.f32.mrb[31].mxu0  ;;  %5455 = vmatprep.mubr.f32.mxu0 %v7615_v47 }
 0x326   : > { %3914 = vmatmul.mubr.f32.gmra.mrb[58].mxu1 %v7617_v29  ;;  %5456 = vmatmul.mubr.f32.gmra.mrb[72].mxu0 %v7619_v42 }
 0x327   : > { %3918 = vmatprep.mubr.f32.mxu1 %v2723_v40  ;;  %v2725_v43 = vmax.f32 %v2693_v51, 0.0  ;;  %v2655_v19 = vmul.f32 %v7505_v10, %v2550_v57 }
 0x328   : > { %v2329_v28 = vpop.f32.mrb[32].mxu0  ;;  %v7627_v22 = vld [vmem:[#allocation3 + $0xa8] sm:$0xff] }
 0x329   : > { %2757 = vst [vmem:[#allocation3 + $0xc1] sm:$0xff] %v2725_v43  ;;  %v2694_v54 = vadd.f32 %v7511_v35, %v2655_v19  ;;  %v2555_v2 = vadd.f32 %v7464_v53, %v2329_v28  ;;  %v2331_v24 = vpop.f32.mrb[33].mxu0 }
 0x32a   : > { %3919 = vmatmul.mubr.f32.gmra.mrb[60].mxu1 %v7627_v22 }
 0x32b   : > { %3923 = vmatprep.mubr.f32.mxu1 %v2724_v16  ;;  %v2726_v63 = vmax.f32 %v2694_v54, 0.0  ;;  %v2656_v4 = vmul.f32 %v7505_v10, %v2555_v2 }
 0x32c   : > { %v2334_v1 = vpop.f32.mrb[34].mxu0  ;;  %v7633_v40 = vld [vmem:[#allocation3 + $0xaa] sm:$0xff]  ;;  %v7637_v57 = vld [vmem:[#allocation3 + $0xb2] sm:$0xff] }
 0x32d   : > { %v7635_v51 = vld [vmem:[#allocation3 + $0xb0] sm:$0xff]  ;;  %2758 = vst [vmem:[#allocation3 + $0xc9] sm:$0xff] %v2726_v63  ;;  %v2695_v12 = vadd.f32 %v7511_v35, %v2656_v4  ;;  %v2560_v19 = vadd.f32 %v7462_v50, %v2334_v1  ;;  %v2336_v53 = vpop.f32.mrb[35].mxu0  ;;  %5458 = vmatprep.mubr.f32.mxu0 %v7633_v40 }
 0x32e   : > { %3924 = vmatmul.mubr.f32.gmra.mrb[62].mxu1 %v7635_v51  ;;  %5459 = vmatmul.mubr.f32.gmra.mrb[74].mxu0 %v7637_v57 }
 0x32f   : > { %3928 = vmatprep.mubr.f32.mxu1 %v2725_v43  ;;  %v2727_v16 = vmax.f32 %v2695_v12, 0.0  ;;  %v2657_v28 = vmul.f32 %v7505_v10, %v2560_v19 }
 0x330   : > { %v2339_v54 = vpop.f32.mrb[36].mxu0  ;;  %v7645_v2 = vld [vmem:[#allocation3 + $0xc0] sm:$0xff] }
 0x331   : > { %2759 = vst [vmem:[#allocation3 + $0xd9] sm:$0xff] %v2727_v16  ;;  %v2696_v24 = vadd.f32 %v7511_v35, %v2657_v28  ;;  %v2565_v4 = vadd.f32 %v7469_v55, %v2339_v54  ;;  %v2341_v50 = vpop.f32.mrb[37].mxu0 }
 0x332   : > { %3929 = vmatmul.mubr.f32.gmra.mrb[64].mxu1 %v7645_v2 }
 0x333   : > { %3933 = vmatprep.mubr.f32.mxu1 %v2726_v63  ;;  %v2728_v1 = vmax.f32 %v2696_v24, 0.0  ;;  %v2658_v53 = vmul.f32 %v7505_v10, %v2565_v4 }
 0x334   : > { %v2344_v56 = vpop.f32.mrb[38].mxu0  ;;  %v7651_v43 = vld [vmem:[#allocation3 + $0xc2] sm:$0xff]  ;;  %v7655_v19 = vld [vmem:[#allocation3 + $0xca] sm:$0xff] }
 0x335   : > { %v7653_v12 = vld [vmem:[#allocation3 + $0xc8] sm:$0xff]  ;;  %2760 = vst [vmem:[#allocation3 + $0xe1] sm:$0xff] %v2728_v1  ;;  %v2697_v6 = vadd.f32 %v7511_v35, %v2658_v53  ;;  %v2570_v28 = vadd.f32 %v7467_v52, %v2344_v56  ;;  %v2346_v55 = vpop.f32.mrb[39].mxu0  ;;  %5461 = vmatprep.mubr.f32.mxu0 %v7651_v43 }
 0x336   : > { %3934 = vmatmul.mubr.f32.gmra.mrb[66].mxu1 %v7653_v12  ;;  %5462 = vmatmul.mubr.f32.gmra.mrb[76].mxu0 %v7655_v19 }
 0x337   : > { %3938 = vmatprep.mubr.f32.mxu1 %v2727_v16  ;;  %v2729_v63 = vmax.f32 %v2697_v6, 0.0  ;;  %v2659_v54 = vmul.f32 %v7505_v10, %v2570_v28 }
 0x338   : > { %v2349_v24 = vpop.f32.mrb[40].mxu0  ;;  %v7663_v4 = vld [vmem:[#allocation3 + $0xd8] sm:$0xff] }
 0x339   : > { %2761 = vst [vmem:[#allocation3 + $0xf1] sm:$0xff] %v2729_v63  ;;  %v2698_v50 = vadd.f32 %v7511_v35, %v2659_v54  ;;  %v2575_v53 = vadd.f32 %v7474_v0, %v2349_v24  ;;  %v2351_v56 = vpop.f32.mrb[41].mxu0 }
 0x33a   : > { %3939 = vmatmul.mubr.f32.gmra.mrb[68].mxu1 %v7663_v4 }
 0x33b   : > { %3943 = vmatprep.mubr.f32.mxu1 %v2728_v1  ;;  %v2730_v52 = vmax.f32 %v2698_v50, 0.0  ;;  %v2660_v55 = vmul.f32 %v7505_v10, %v2575_v53 }
 0x33c   : > { %v2354_v5 = vpop.f32.mrb[42].mxu0  ;;  %v7669_v16 = vld [vmem:[#allocation3 + $0xda] sm:$0xff]  ;;  %v7673_v28 = vld [vmem:[#allocation3 + $0xe2] sm:$0xff] }
 0x33d   : > { %v7671_v6 = vld [vmem:[#allocation3 + $0xe0] sm:$0xff]  ;;  %2762 = vst [vmem:[#allocation3 + $0xf9] sm:$0xff] %v2730_v52  ;;  %v2699_v3 = vadd.f32 %v7511_v35, %v2660_v55  ;;  %v2580_v54 = vadd.f32 %v7472_v27, %v2354_v5  ;;  %v2356_v0 = vpop.f32.mrb[43].mxu0  ;;  %5464 = vmatprep.mubr.f32.mxu0 %v7669_v16 }
 0x33e   : > { %3944 = vmatmul.mubr.f32.gmra.mrb[70].mxu1 %v7671_v6  ;;  %5465 = vmatmul.mubr.f32.gmra.mrb[78].mxu0 %v7673_v28 }
 0x33f   : > { %3948 = vmatprep.mubr.f32.mxu1 %v2729_v63  ;;  %v2731_v1 = vmax.f32 %v2699_v3, 0.0  ;;  %v2661_v24 = vmul.f32 %v7505_v10, %v2580_v54 }
 0x340   : > { %v2359_v50 = vpop.f32.mrb[44].mxu0  ;;  %v7681_v53 = vld [vmem:[#allocation3 + $0xf0] sm:$0xff] }
 0x341   : > { %2763 = vst [vmem:[#allocation3 + $0x109] sm:$0xff] %v2731_v1  ;;  %v2700_v56 = vadd.f32 %v7511_v35, %v2661_v24  ;;  %v2585_v55 = vadd.f32 %v7479_v20, %v2359_v50  ;;  %v2361_v5 = vpop.f32.mrb[45].mxu0 }
 0x342   : > { %3949 = vmatmul.mubr.f32.gmra.mrb[72].mxu1 %v7681_v53 }
 0x343   : > { %3953 = vmatprep.mubr.f32.mxu1 %v2730_v52  ;;  %v2732_v27 = vmax.f32 %v2700_v56, 0.0  ;;  %v2662_v0 = vmul.f32 %v7505_v10, %v2585_v55 }
 0x344   : > { %v2364_v45 = vpop.f32.mrb[46].mxu0  ;;  %v7687_v63 = vld [vmem:[#allocation3 + $0xf2] sm:$0xff]  ;;  %v7691_v54 = vld [vmem:[#allocation3 + $0xfa] sm:$0xff] }
 0x345   : > { %v7689_v3 = vld [vmem:[#allocation3 + $0xf8] sm:$0xff]  ;;  %2764 = vst [vmem:[#allocation3 + $0x111] sm:$0xff] %v2732_v27  ;;  %v2701_v32 = vadd.f32 %v7511_v35, %v2662_v0  ;;  %v2590_v24 = vadd.f32 %v7477_v44, %v2364_v45  ;;  %v2366_v20 = vpop.f32.mrb[47].mxu0  ;;  %5467 = vmatprep.mubr.f32.mxu0 %v7687_v63 }
 0x346   : > { %3954 = vmatmul.mubr.f32.gmra.mrb[74].mxu1 %v7689_v3  ;;  %5468 = vmatmul.mubr.f32.gmra.mrb[80].mxu0 %v7691_v54 }
 0x347   : > { %3958 = vmatprep.mubr.f32.mxu1 %v2731_v1  ;;  %v2733_v52 = vmax.f32 %v2701_v32, 0.0  ;;  %v2663_v50 = vmul.f32 %v7505_v10, %v2590_v24 }
 0x348   : > { %v2369_v56 = vpop.f32.mrb[48].mxu0  ;;  %v7699_v55 = vld [vmem:[#allocation3 + $0x108] sm:$0xff] }
 0x349   : > { %2765 = vst [vmem:[#allocation3 + $0x121] sm:$0xff] %v2733_v52  ;;  %v2702_v5 = vadd.f32 %v7511_v35, %v2663_v50  ;;  %v2595_v0 = vadd.f32 %v7484_v25, %v2369_v56  ;;  %v2371_v45 = vpop.f32.mrb[49].mxu0 }
 0x34a   : > { %3959 = vmatmul.mubr.f32.gmra.mrb[76].mxu1 %v7699_v55 }
 0x34b   : > { %3963 = vmatprep.mubr.f32.mxu1 %v2732_v27  ;;  %v2734_v44 = vmax.f32 %v2702_v5, 0.0  ;;  %v2664_v20 = vmul.f32 %v7505_v10, %v2595_v0 }
 0x34c   : > { %v2374_v26 = vpop.f32.mrb[50].mxu0  ;;  %v7705_v1 = vld [vmem:[#allocation3 + $0x10a] sm:$0xff]  ;;  %v7709_v24 = vld [vmem:[#allocation3 + $0x112] sm:$0xff] }
 0x34d   : > { %8379 = vst [vmem:[#allocation24_spill] sm:$0xff] %v7705_v1  ;;  %v7707_v32 = vld [vmem:[#allocation3 + $0x110] sm:$0xff]  ;;  %8380 = vst [vmem:[#allocation25_spill] sm:$0xff] %v7709_v24  ;;  %v2703_v23 = vadd.f32 %v7511_v35, %v2664_v20  ;;  %v2600_v50 = vadd.f32 %v7482_v38, %v2374_v26  ;;  %v2376_v25 = vpop.f32.mrb[51].mxu0  ;;  %5470 = vmatprep.mubr.f32.mxu0 %v7705_v1 }
 0x34e   : > { %2766 = vst [vmem:[#allocation3 + $0x129] sm:$0xff] %v2734_v44  ;;  %3964 = vmatmul.mubr.f32.gmra.mrb[78].mxu1 %v7707_v32  ;;  %5471 = vmatmul.mubr.f32.gmra.mrb[82].mxu0 %v7709_v24 }
 0x34f   : > { %3968 = vmatprep.mubr.f32.mxu1 %v2733_v52  ;;  %v2735_v27 = vmax.f32 %v2703_v23, 0.0  ;;  %v2665_v56 = vmul.f32 %v7505_v10, %v2600_v50 }
 0x350   : > { %v2379_v5 = vpop.f32.mrb[52].mxu0  ;;  %v7717_v0 = vld [vmem:[#allocation3 + $0x120] sm:$0xff] }
 0x351   : > { %2767 = vst [vmem:[#allocation3 + $0x139] sm:$0xff] %v2735_v27  ;;  %v2704_v45 = vadd.f32 %v7511_v35, %v2665_v56  ;;  %v2605_v20 = vadd.f32 %v7489_v15, %v2379_v5  ;;  %v2381_v26 = vpop.f32.mrb[53].mxu0 }
 0x352   : > { %3969 = vmatmul.mubr.f32.gmra.mrb[80].mxu1 %v7717_v0 }
 0x353   : > { %3973 = vmatprep.mubr.f32.mxu1 %v2734_v44  ;;  %v2736_v38 = vmax.f32 %v2704_v45, 0.0  ;;  %v2666_v25 = vmul.f32 %v7505_v10, %v2605_v20 }
 0x354   : > { %v2384_v24 = vpop.f32.mrb[54].mxu0 }
 0x355   : > { %v7723_v52 = vld [vmem:[#allocation3 + $0x122] sm:$0xff]  ;;  %v7727_v50 = vld [vmem:[#allocation3 + $0x12a] sm:$0xff]  ;;  %2768 = vst [vmem:[#allocation3 + $0x141] sm:$0xff] %v2736_v38  ;;  %v2705_v1 = vadd.f32 %v7511_v35, %v2666_v25  ;;  %v2610_v56 = vadd.f32 %v7487_v13, %v2384_v24  ;;  %v2386_v15 = vpop.f32.mrb[55].mxu0 }
 0x356   : > { %v7725_v23 = vld [vmem:[#allocation3 + $0x128] sm:$0xff]  ;;  %8381 = vst [vmem:[#allocation26_spill] sm:$0xff] %v7727_v50  ;;  %5473 = vmatprep.mubr.f32.mxu0 %v7723_v52 }
 0x357   : > { %3974 = vmatmul.mubr.f32.gmra.mrb[82].mxu1 %v7725_v23  ;;  %5474 = vmatmul.mubr.f32.gmra.mrb[84].mxu0 %v7727_v50  ;;  %v7734_v44 = vmax.f32 %v2705_v1, 0.0  ;;  %v2667_v5 = vmul.f32 %v7505_v10, %v2610_v56 }
 0x358   : > { %3978 = vmatprep.mubr.f32.mxu1 %v2735_v27  ;;  %v2389_v45 = vpop.f32.mrb[56].mxu0  ;;  %v7737_v20 = vld [vmem:[#allocation3 + $0x138] sm:$0xff] }
 0x359   : > { %8382 = vst [vmem:[#allocation27_spill] sm:$0xff] %v7734_v44  ;;  %2769 = vst [vmem:[#allocation3 + $0x151] sm:$0xff] %v7734_v44  ;;  %v2706_v26 = vadd.f32 %v7511_v35, %v2667_v5  ;;  %v2615_v13 = vadd.f32 %v7494_v14, %v2389_v45  ;;  %v2391_v24 = vpop.f32.mrb[57].mxu0 }
 0x35b   : > { %3979 = vmatmul.mubr.f32.gmra.mrb[84].mxu1 %v7737_v20  ;;  %v7743_v25 = vmax.f32 %v2706_v26, 0.0  ;;  %v2668_v1 = vmul.f32 %v7505_v10, %v2615_v13 }
 0x35c   : > { %3983 = vmatprep.mubr.f32.mxu1 %v2736_v38  ;;  %v2394_v27 = vpop.f32.mrb[58].mxu0  ;;  %v7746_v15 = vld [vmem:[#allocation3 + $0x13a] sm:$0xff]  ;;  %v7750_v50 = vld [vmem:[#allocation3 + $0x142] sm:$0xff] }
 0x35d   : > { %v7748_v56 = vld [vmem:[#allocation3 + $0x140] sm:$0xff]  ;;  %8383 = vst [vmem:[#allocation28_spill] sm:$0xff] %v7750_v50  ;;  %2770 = vst [vmem:[#allocation3 + $0x159] sm:$0xff] %v7743_v25  ;;  %v2707_v5 = vadd.f32 %v7511_v35, %v2668_v1  ;;  %v2620_v14 = vadd.f32 %v7492_v37, %v2394_v27  ;;  %v2396_v45 = vpop.f32.mrb[59].mxu0  ;;  %5476 = vmatprep.mubr.f32.mxu0 %v7746_v15 }
 0x35e   : > { %5477 = vmatmul.mubr.f32.gmra.mrb[86].mxu0 %v7750_v50 }
 0x35f   : > { %3984 = vmatmul.mubr.f32.gmra.mrb[86].mxu1 %v7748_v56  ;;  %v7759_v38 = vmax.f32 %v2707_v5, 0.0  ;;  %v2669_v26 = vmul.f32 %v7505_v10, %v2620_v14 }
 0x360   : > { %3988 = vmatprep.mubr.f32.mxu1 %v7734_v44  ;;  %v2399_v13 = vpop.f32.mrb[60].mxu0  ;;  %v7762_v24 = vld [vmem:[#allocation3 + $0x150] sm:$0xff] }
 0x361   : > { %8384 = vst [vmem:[#allocation29_spill] sm:$0xff] %v7759_v38  ;;  %2771 = vst [vmem:[#allocation3 + $0x169] sm:$0xff] %v7759_v38  ;;  %v2708_v37 = vadd.f32 %v7511_v35, %v2669_v26  ;;  %v2625_v1 = vadd.f32 %v7499_v31, %v2399_v13  ;;  %v2401_v27 = vpop.f32.mrb[61].mxu0 }
 0x363   : > { %3989 = vmatmul.mubr.f32.gmra.mrb[88].mxu1 %v7762_v24  ;;  %v7769_v45 = vmax.f32 %v2708_v37, 0.0  ;;  %v2670_v5 = vmul.f32 %v7505_v10, %v2625_v1 }
 0x364   : > { %3993 = vmatprep.mubr.f32.mxu1 %v7743_v25  ;;  %v2404_v44 = vpop.f32.mrb[62].mxu0  ;;  %v7772_v14 = vld [vmem:[#allocation3 + $0x158] sm:$0xff] }
 0x365   : > { %8385 = vst [vmem:[#allocation30_spill] sm:$0xff] %v7769_v45  ;;  %2772 = vst [vmem:[#allocation3 + $0x171] sm:$0xff] %v7769_v45  ;;  %v7776_v50 = vadd.f32 %v7511_v35, %v2670_v5  ;;  %v2630_v26 = vadd.f32 %v7497_v34, %v2404_v44  ;;  %v2406_v31 = vpop.f32.mrb[63].mxu0  ;;  %v3704_v44 = vld [vmem:[#allocation9 + $0x200] sm:$0xff]  ;;  %v3705_v5 = vld [vmem:[#allocation9 + $0x208] sm:$0xff] }
 0x367   : > { %8386 = vst [vmem:[#allocation31_spill] sm:$0xff] %v7776_v50  ;;  %3994 = vmatmul.mubr.f32.gmra.mrb[90].mxu1 %v7772_v14  ;;  %v8337_v13 = vmax.f32 %v7776_v50, 0.0  ;;  %v2671_v37 = vmul.f32 %v7505_v10, %v2630_v26  ;;  %v2903_v10 = vld [vmem:[#allocation3 + $0x2] sm:$0xff] }
 0x368   : > { %3998 = vmatprep.mubr.f32.mxu1 %v7759_v38  ;;  %v7783_v1 = vld [vmem:[#allocation3 + $0x168] sm:$0xff]  ;;  %v3706_v26 = vld [vmem:[#allocation9 + $0x210] sm:$0xff]  ;;  %v3709_v38 = vld [vmem:[#allocation9 + $0x228] sm:$0xff] }
 0x369   : > { %2773 = vst [vmem:[#allocation3 + $0x181] sm:$0xff] %v8337_v13  ;;  %v7788_v27 = vadd.f32 %v7511_v35, %v2671_v37  ;;  %v5812_v35 = vpack.c.bf16 %v3705_v5, %v3704_v44  ;;  %v3707_v37 = vld [vmem:[#allocation9 + $0x218] sm:$0xff]  ;;  %v7803_v5 = vld [vmem:[#allocation3 + $0x1a] sm:$0xff] }
 0x36a   : > { %v2904_v13 = vld [vmem:[#allocation3 + $0xa] sm:$0xff]  ;;  %v5815_v50 = vpack.c.bf16 %v3707_v37, %v3706_v26  ;;  %v3718_v26 = vld [vmem:[#allocation9 + $0x270] sm:$0xff] }
 0x36b   : > { %3999 = vmatmul.mubr.f32.gmra.mrb[92].mxu1 %v7783_v1  ;;  %v8341_v34 = vmax.f32 %v7788_v27, 0.0  ;;  %v3711_v44 = vld [vmem:[#allocation9 + $0x238] sm:$0xff] }
 0x36c   : > { %4003 = vmatprep.mubr.f32.mxu1 %v7769_v45  ;;  %v7793_v31 = vld [vmem:[#allocation3 + $0x170] sm:$0xff]  ;;  %v3719_v37 = vld [vmem:[#allocation9 + $0x278] sm:$0xff] }
 0x36d   : > { %2774 = vst [vmem:[#allocation3 + $0x189] sm:$0xff] %v8341_v34  ;;  %v3708_v45 = vld [vmem:[#allocation9 + $0x220] sm:$0xff] }
 0x36e   : > { %v5818_v34 = vpack.c.bf16 %v3709_v38, %v3708_v45  ;;  %v3715_v38 = vld [vmem:[#allocation9 + $0x258] sm:$0xff]  ;;  %v3716_v45 = vld [vmem:[#allocation9 + $0x260] sm:$0xff] }
 0x36f   : > { %4004 = vmatmul.mubr.f32.gmra.mrb[94].mxu1 %v7793_v31 }
 0x370   : > { %4073 = vmatprep.mubr.f32.mxu1 %v7525_v41  ;;  %v3710_v41 = vld [vmem:[#allocation9 + $0x230] sm:$0xff] }
 0x373   : > { %4074 = vmatmul.mubr.f32.vlgmr.msra.gmra.mrb[32].mxu1 %v2903_v10  ;;  %v3712_v10 = vld [vmem:[#allocation9 + $0x240] sm:$0xff] }
 0x374   : > { %4078 = vmatprep.mubr.f32.mxu1 %v7531_v61  ;;  %5813 = vmatpush1.bf16.msra.mxu1 %v5812_v35  ;;  %v5821_v61 = vpack.c.bf16 %v3711_v44, %v3710_v41  ;;  %v7808_v35 = vld [vmem:[#allocation3 + $0x22] sm:$0xff]  ;;  %v3721_v41 = vld [vmem:[#allocation9 + $0x288] sm:$0xff] }
 0x375   : > { %5814 = vmatprep.subr.bf16.mxu1 %v8361_v8  ;;  %v3723_v44 = vld [vmem:[#allocation9 + $0x298] sm:$0xff] }
 0x377   : > { %4079 = vmatmul.mubr.f32.gmra.mrb[34].mxu1 %v2904_v13  ;;  %v3713_v13 = vld [vmem:[#allocation9 + $0x248] sm:$0xff] }
 0x378   : > { %4083 = vmatprep.mubr.f32.mxu1 %v7537_v7  ;;  %5816 = vmatpush1.bf16.msra.mxu1 %v5815_v50  ;;  %v5824_v7 = vpack.c.bf16 %v3713_v13, %v3712_v10  ;;  %v3714_v50 = vld [vmem:[#allocation9 + $0x250] sm:$0xff]  ;;  %v3727_v10 = vld [vmem:[#allocation9 + $0x2b8] sm:$0xff]  ;;  %v3729_v13 = vld [vmem:[#allocation9 + $0x2c8] sm:$0xff] }
 0x379   : > { %5817 = vmatprep.subr.bf16.mxu1 %v8361_v8 }
 0x37b   : > { %4084 = vmatmul.mubr.f32.gmra.mrb[36].mxu1 %v7803_v5 }
 0x37c   : > { %4088 = vmatprep.mubr.f32.mxu1 %v7545_v48  ;;  %5819 = vmatpush1.bf16.msra.mxu1 %v5818_v34  ;;  %v5827_v48 = vpack.c.bf16 %v3715_v38, %v3714_v50  ;;  %v3717_v34 = vld [vmem:[#allocation9 + $0x268] sm:$0xff]  ;;  %v3735_v38 = vld [vmem:[#allocation9 + $0x2f8] sm:$0xff] }
 0x37d   : > { %5820 = vmatprep.subr.bf16.mxu1 %v8361_v8  ;;  %v3733_v50 = vld [vmem:[#allocation9 + $0x2e8] sm:$0xff] }
 0x37f   : > { %4089 = vmatmul.mubr.f32.gmra.mrb[38].mxu1 %v7808_v35 }
 0x380   : > { %4093 = vmatprep.mubr.f32.mxu1 %v7555_v46  ;;  %5822 = vmatpush1.bf16.msra.mxu1 %v5821_v61  ;;  %v5830_v46 = vpack.c.bf16 %v3717_v34, %v3716_v45  ;;  %v3725_v61 = vld [vmem:[#allocation9 + $0x2a8] sm:$0xff]  ;;  %v3740_v45 = vld [vmem:[#allocation9 + $0x320] sm:$0xff] }
 0x381   : > { %5823 = vmatprep.subr.bf16.mxu1 %v8361_v8  ;;  %v3741_v34 = vld [vmem:[#allocation9 + $0x328] sm:$0xff] }
 0x383   : > { %4094 = vmatmul.mubr.f32.gmra.mrb[40].mxu1 %v7543_v9  ;;  %v5833_v9 = vpack.c.bf16 %v3719_v37, %v3718_v26  ;;  %v5866_v26 = vpack.c.bf16 %v3741_v34, %v3740_v45  ;;  %v3742_v37 = vld [vmem:[#allocation9 + $0x330] sm:$0xff] }
 0x384   : > { %4098 = vmatprep.mubr.f32.mxu1 %v7563_v11  ;;  %5825 = vmatpush1.bf16.msra.mxu1 %v5824_v7  ;;  %v3720_v11 = vld [vmem:[#allocation9 + $0x280] sm:$0xff]  ;;  %v3731_v7 = vld [vmem:[#allocation9 + $0x2d8] sm:$0xff]  ;;  %v3103_v45 = vld [vmem:[#allocation3 + $0x7a] sm:$0xff] }
 0x385   : > { %5826 = vmatprep.subr.bf16.mxu1 %v8361_v8 }
 0x387   : > { %4099 = vmatmul.mubr.f32.gmra.mrb[42].mxu1 %v7547_v58  ;;  %v5836_v58 = vpack.c.bf16 %v3721_v41, %v3720_v11  ;;  %v7912_v11 = vld [vmem:[#allocation3 + $0x31] sm:$0xff] }
 0x388   : > { %4103 = vmatprep.mubr.f32.mxu1 %v7573_v60  ;;  %5828 = vmatpush1.bf16.msra.mxu1 %v5827_v48  ;;  %v3722_v60 = vld [vmem:[#allocation9 + $0x290] sm:$0xff] }
 0x389   : > { %5829 = vmatprep.subr.bf16.mxu1 %v8361_v8 }
 0x38b   : > { %4104 = vmatmul.mubr.f32.gmra.mrb[44].mxu1 %v7561_v33  ;;  %v5839_v33 = vpack.c.bf16 %v3723_v44, %v3722_v60  ;;  %v3744_v44 = vld [vmem:[#allocation9 + $0x340] sm:$0xff] }
 0x38c   : > { %4108 = vmatprep.mubr.f32.mxu1 %v7581_v49  ;;  %5831 = vmatpush1.bf16.msra.mxu1 %v5830_v46  ;;  %v3724_v49 = vld [vmem:[#allocation9 + $0x2a0] sm:$0xff]  ;;  %v3032_v46 = vld [vmem:[#allocation3 + $0x21] sm:$0xff] }
 0x38d   : > { %5832 = vmatprep.subr.bf16.mxu1 %v8361_v8 }
 0x38f   : > { %4109 = vmatmul.mubr.f32.gmra.mrb[46].mxu1 %v7565_v59  ;;  %v5842_v59 = vpack.c.bf16 %v3725_v61, %v3724_v49  ;;  %v7920_v49 = vld [vmem:[#allocation3 + $0x39] sm:$0xff]  ;;  %v3099_v61 = vld [vmem:[#allocation3 + $0x4a] sm:$0xff] }
 0x390   : > { %4113 = vmatprep.mubr.f32.mxu1 %v7591_v36  ;;  %5834 = vmatpush1.bf16.msra.mxu1 %v5833_v9  ;;  %v3726_v36 = vld [vmem:[#allocation9 + $0x2b0] sm:$0xff]  ;;  %v3743_v9 = vld [vmem:[#allocation9 + $0x338] sm:$0xff] }
 0x391   : > { %5835 = vmatprep.subr.bf16.mxu1 %v8361_v8  ;;  %v5869_v60 = vpack.c.bf16 %v3743_v9, %v3742_v37  ;;  %v3104_v9 = vld [vmem:[#allocation3 + $0x82] sm:$0xff] }
 0x393   : > { %4114 = vmatmul.mubr.f32.gmra.mrb[48].mxu1 %v7579_v62  ;;  %v5845_v62 = vpack.c.bf16 %v3727_v10, %v3726_v36  ;;  %v3746_v36 = vld [vmem:[#allocation9 + $0x350] sm:$0xff]  ;;  %v3747_v10 = vld [vmem:[#allocation9 + $0x358] sm:$0xff] }
 0x394   : > { %4118 = vmatprep.mubr.f32.mxu1 %v7599_v18  ;;  %5837 = vmatpush1.bf16.msra.mxu1 %v5836_v58  ;;  %v3728_v18 = vld [vmem:[#allocation9 + $0x2c0] sm:$0xff] }
 0x395   : > { %5838 = vmatprep.subr.bf16.mxu1 %v8361_v8 }
 0x397   : > { %4119 = vmatmul.mubr.f32.gmra.mrb[50].mxu1 %v7583_v21  ;;  %v5848_v21 = vpack.c.bf16 %v3729_v13, %v3728_v18  ;;  %v3100_v13 = vld [vmem:[#allocation3 + $0x52] sm:$0xff] }
 0x398   : > { %4123 = vmatprep.mubr.f32.mxu1 %v7609_v17  ;;  %5840 = vmatpush1.bf16.msra.mxu1 %v5839_v33  ;;  %v3730_v17 = vld [vmem:[#allocation9 + $0x2d0] sm:$0xff]  ;;  %v3745_v33 = vld [vmem:[#allocation9 + $0x348] sm:$0xff] }
 0x399   : > { %5841 = vmatprep.subr.bf16.mxu1 %v8361_v8 }
 0x39b   : > { %4124 = vmatmul.mubr.f32.gmra.mrb[52].mxu1 %v7597_v39  ;;  %v5851_v39 = vpack.c.bf16 %v3731_v7, %v3730_v17  ;;  %v5875_v17 = vpack.c.bf16 %v3747_v10, %v3746_v36  ;;  %v3748_v7 = vld [vmem:[#allocation9 + $0x360] sm:$0xff]  ;;  %v3758_v10 = vld [vmem:[#allocation9 + $0x3b0] sm:$0xff] }
 0x39c   : > { %4128 = vmatprep.mubr.f32.mxu1 %v7617_v29  ;;  %5843 = vmatpush1.bf16.msra.mxu1 %v5842_v59  ;;  %v3732_v29 = vld [vmem:[#allocation9 + $0x2e0] sm:$0xff]  ;;  %v5872_v59 = vpack.c.bf16 %v3745_v33, %v3744_v44  ;;  %v3757_v33 = vld [vmem:[#allocation9 + $0x3a8] sm:$0xff] }
 0x39d   : > { %5844 = vmatprep.subr.bf16.mxu1 %v8361_v8  ;;  %v3756_v44 = vld [vmem:[#allocation9 + $0x3a0] sm:$0xff] }
 0x39e   : > { %v5890_v36 = vpack.c.bf16 %v3757_v33, %v3756_v44  ;;  %v3764_v44 = vld [vmem:[#allocation9 + $0x3e0] sm:$0xff]  ;;  %v3765_v33 = vld [vmem:[#allocation9 + $0x3e8] sm:$0xff] }
 0x39f   : > { %4129 = vmatmul.mubr.f32.gmra.mrb[54].mxu1 %v7601_v30  ;;  %v5854_v30 = vpack.c.bf16 %v3733_v50, %v3732_v29  ;;  %v7932_v29 = vld [vmem:[#allocation3 + $0x51] sm:$0xff]  ;;  %v3101_v50 = vld [vmem:[#allocation3 + $0x62] sm:$0xff] }
 0x3a0   : > { %4133 = vmatprep.mubr.f32.mxu1 %v7627_v22  ;;  %5846 = vmatpush1.bf16.msra.mxu1 %v5845_v62  ;;  %v3734_v22 = vld [vmem:[#allocation9 + $0x2f0] sm:$0xff]  ;;  %v7924_v62 = vld [vmem:[#allocation3 + $0x49] sm:$0xff] }
 0x3a1   : > { %5847 = vmatprep.subr.bf16.mxu1 %v8361_v8 }
 0x3a3   : > { %4134 = vmatmul.mubr.f32.gmra.mrb[56].mxu1 %v7615_v47  ;;  %v5857_v47 = vpack.c.bf16 %v3735_v38, %v3734_v22  ;;  %v3750_v22 = vld [vmem:[#allocation9 + $0x370] sm:$0xff]  ;;  %v3751_v38 = vld [vmem:[#allocation9 + $0x378] sm:$0xff] }
 0x3a4   : > { %4138 = vmatprep.mubr.f32.mxu1 %v7635_v51  ;;  %5849 = vmatpush1.bf16.msra.mxu1 %v5848_v21  ;;  %v8389_v51 = vld [vmem:[#allocation26_spill] sm:$0xff] }
 0x3a5   : > { %5850 = vmatprep.subr.bf16.mxu1 %v8361_v8 }
 0x3a7   : > { %4139 = vmatmul.mubr.f32.gmra.mrb[58].mxu1 %v7619_v42  ;;  %v8387_v42 = vld [vmem:[#allocation24_spill] sm:$0xff] }
 0x3a8   : > { %4143 = vmatprep.mubr.f32.mxu1 %v7645_v2  ;;  %5852 = vmatpush1.bf16.msra.mxu1 %v5851_v39  ;;  %v3749_v39 = vld [vmem:[#allocation9 + $0x368] sm:$0xff] }
 0x3a9   : > { %5853 = vmatprep.subr.bf16.mxu1 %v8361_v8 }
 0x3ab   : > { %4144 = vmatmul.mubr.f32.gmra.mrb[60].mxu1 %v7633_v40  ;;  %v8388_v40 = vld [vmem:[#allocation25_spill] sm:$0xff] }
 0x3ac   : > { %4148 = vmatprep.mubr.f32.mxu1 %v7653_v12  ;;  %5855 = vmatpush1.bf16.msra.mxu1 %v5854_v30  ;;  %v7877_v12 = vld [vmem:[#allocation3 + $0x152] sm:$0xff]  ;;  %v5878_v30 = vpack.c.bf16 %v3749_v39, %v3748_v7  ;;  %v3106_v39 = vld [vmem:[#allocation3 + $0x9a] sm:$0xff] }
 0x3ad   : > { %5856 = vmatprep.subr.bf16.mxu1 %v8361_v8 }
 0x3af   : > { %4149 = vmatmul.mubr.f32.gmra.mrb[62].mxu1 %v7637_v57 }
 0x3b0   : > { %4153 = vmatprep.mubr.f32.mxu1 %v7663_v4  ;;  %5858 = vmatpush1.bf16.msra.mxu1 %v5857_v47  ;;  %v7936_v47 = vld [vmem:[#allocation3 + $0x61] sm:$0xff] }
 0x3b1   : > { %5859 = vmatprep.subr.bf16.mxu1 %v8361_v8 }
 0x3b3   : > { %4154 = vmatmul.mubr.f32.gmra.mrb[64].mxu1 %v7651_v43  ;;  %v8390_v43 = vld [vmem:[#allocation28_spill] sm:$0xff] }
 0x3b4   : > { %4158 = vmatprep.mubr.f32.mxu1 %v7671_v6  ;;  %v7888_v6 = vld [vmem:[#allocation3 + $0x180] sm:$0xff] }
 0x3b7   : > { %4159 = vmatmul.mubr.f32.gmra.mrb[66].mxu1 %v7655_v19 }
 0x3b8   : > { %4163 = vmatprep.mubr.f32.mxu1 %v7681_v53 }
 0x3bb   : > { %4164 = vmatmul.mubr.f32.gmra.mrb[68].mxu1 %v7669_v16  ;;  %v7885_v16 = vld [vmem:[#allocation3 + $0x15a] sm:$0xff] }
 0x3bc   : > { %4168 = vmatprep.mubr.f32.mxu1 %v7689_v3  ;;  %v7896_v3 = vld [vmem:[#allocation3 + $0x188] sm:$0xff] }
 0x3bf   : > { %4169 = vmatmul.mubr.f32.gmra.mrb[70].mxu1 %v7673_v28  ;;  %v7891_v28 = vld [vmem:[#allocation3 + $0x16a] sm:$0xff] }
 0x3c0   : > { %4173 = vmatprep.mubr.f32.mxu1 %v7699_v55 }
 0x3c3   : > { %4174 = vmatmul.mubr.f32.gmra.mrb[72].mxu1 %v7687_v63 }
 0x3c4   : > { %4178 = vmatprep.mubr.f32.mxu1 %v7707_v32  ;;  %v3736_v32 = vld [vmem:[#allocation9 + $0x300] sm:$0xff] }
 0x3c7   : > { %4179 = vmatmul.mubr.f32.gmra.mrb[74].mxu1 %v7691_v54 }
 0x3c8   : > { %4183 = vmatprep.mubr.f32.mxu1 %v7717_v0  ;;  %v3737_v0 = vld [vmem:[#allocation9 + $0x308] sm:$0xff] }
 0x3cb   : > { %4184 = vmatmul.mubr.f32.gmra.mrb[76].mxu1 %v8387_v42 }
 0x3cc   : > { %4188 = vmatprep.mubr.f32.mxu1 %v7725_v23  ;;  %v7901_v23 = vld [vmem:[#allocation3 + $0x172] sm:$0xff] }
 0x3cf   : > { %4189 = vmatmul.mubr.f32.gmra.mrb[78].mxu1 %v8388_v40 }
 0x3d0   : > { %4193 = vmatprep.mubr.f32.mxu1 %v7737_v20  ;;  %v5860_v20 = vpack.c.bf16 %v3737_v0, %v3736_v32  ;;  %v3102_v0 = vld [vmem:[#allocation3 + $0x6a] sm:$0xff] }
 0x3d3   : > { %4194 = vmatmul.mubr.f32.gmra.mrb[80].mxu1 %v7723_v52 }
 0x3d4   : > { %4198 = vmatprep.mubr.f32.mxu1 %v7748_v56  ;;  %v3738_v56 = vld [vmem:[#allocation9 + $0x310] sm:$0xff] }
 0x3d7   : > { %4199 = vmatmul.mubr.f32.gmra.mrb[82].mxu1 %v8389_v51 }
 0x3d8   : > { %4203 = vmatprep.mubr.f32.mxu1 %v7762_v24  ;;  %v3739_v24 = vld [vmem:[#allocation9 + $0x318] sm:$0xff] }
 0x3d9   : > { %v7869_v57 = vpop.f32.mrb[64].mxu0  ;;  %v5863_v48 = vpack.c.bf16 %v3739_v24, %v3738_v56  ;;  %v5881_v56 = vpack.c.bf16 %v3751_v38, %v3750_v22  ;;  %v3752_v24 = vld [vmem:[#allocation9 + $0x380] sm:$0xff]  ;;  %v3761_v38 = vld [vmem:[#allocation9 + $0x3c8] sm:$0xff] }
 0x3da   : > { %v7872_v2 = vpop.f32.mrb[65].mxu0  ;;  %v3760_v22 = vld [vmem:[#allocation9 + $0x3c0] sm:$0xff] }
 0x3db   : > { %4204 = vmatmul.mubr.f32.gmra.mrb[84].mxu1 %v7746_v15 }
 0x3dc   : > { %4208 = vmatprep.mubr.f32.mxu1 %v7772_v14  ;;  %v3031_v14 = vld [vmem:[#allocation3 + $0x19] sm:$0xff] }
 0x3df   : > { %4209 = vmatmul.mubr.f32.gmra.mrb[86].mxu1 %v8390_v43 }
 0x3e0   : > { %4213 = vmatprep.mubr.f32.mxu1 %v7783_v1 }
 0x3e1   : > { %v7879_v19 = vpop.f32.mrb[66].mxu0 }
 0x3e2   : > { %v7882_v4 = vpop.f32.mrb[67].mxu0 }
 0x3e3   : > { %4214 = vmatmul.mubr.f32.gmra.mrb[88].mxu1 %v7877_v12 }
 0x3e4   : > { %4218 = vmatprep.mubr.f32.mxu1 %v7793_v31 }
 0x3e7   : > { %4219 = vmatmul.mubr.f32.gmra.mrb[90].mxu1 %v7885_v16 }
 0x3e8   : > { %4223 = vmatprep.mubr.f32.mxu1 %v7888_v6 }
 0x3e9   : > { %v7893_v53 = vpop.f32.mrb[68].mxu0 }
 0x3ea   : > { %v7898_v55 = vpop.f32.mrb[69].mxu0 }
 0x3eb   : > { %4224 = vmatmul.mubr.f32.gmra.mrb[92].mxu1 %v7891_v28 }
 0x3ec   : > { %4228 = vmatprep.mubr.f32.mxu1 %v7896_v3 }
 0x3ef   : > { %4229 = vmatmul.mubr.f32.gmra.mrb[94].mxu1 %v7901_v23 }
 0x3f0   : > { %4298 = vmatprep.mubr.f32.mxu1 %v7803_v5  ;;  %v3097_v5 = vld [vmem:[#allocation3 + $0x32] sm:$0xff] }
 0x3f1   : > { %v7905_v1 = vpop.f32.mrb[70].mxu0 }
 0x3f2   : > { %v7907_v31 = vpop.f32.mrb[71].mxu0 }
 0x3f3   : > { %4299 = vmatmul.mubr.f32.vlgmr.msra.gmra.mrb[32].mxu1 %v3031_v14  ;;  %v3753_v14 = vld [vmem:[#allocation9 + $0x388] sm:$0xff] }
 0x3f4   : > { %4303 = vmatprep.mubr.f32.mxu1 %v7808_v35  ;;  %5861 = vmatpush1.bf16.msra.mxu1 %v5860_v20  ;;  %v3098_v35 = vld [vmem:[#allocation3 + $0x3a] sm:$0xff]  ;;  %v5884_v34 = vpack.c.bf16 %v3753_v14, %v3752_v24  ;;  %v5896_v24 = vpack.c.bf16 %v3761_v38, %v3760_v22  ;;  %v3110_v38 = vld [vmem:[#allocation3 + $0xca] sm:$0xff] }
 0x3f5   : > { %5862 = vmatprep.subr.bf16.mxu1 %v8361_v8  ;;  %v3762_v14 = vld [vmem:[#allocation9 + $0x3d0] sm:$0xff] }
 0x3f7   : > { %4304 = vmatmul.mubr.f32.gmra.mrb[34].mxu1 %v3032_v46  ;;  %v3754_v46 = vld [vmem:[#allocation9 + $0x390] sm:$0xff] }
 0x3f8   : > { %4308 = vmatprep.mubr.f32.mxu1 %v3097_v5  ;;  %5864 = vmatpush1.bf16.msra.mxu1 %v5863_v48  ;;  %v7944_v48 = vld [vmem:[#allocation3 + $0x69] sm:$0xff] }
 0x3f9   : > { %5865 = vmatprep.subr.bf16.mxu1 %v8361_v8  ;;  %v7914_v41 = vpop.f32.mrb[72].mxu0  ;;  %v3755_v5 = vld [vmem:[#allocation9 + $0x398] sm:$0xff] }
 0x3fa   : > { %v7917_v58 = vpop.f32.mrb[73].mxu0 }
 0x3fb   : > { %4309 = vmatmul.mubr.f32.gmra.mrb[36].mxu1 %v7912_v11 }
 0x3fc   : > { %4313 = vmatprep.mubr.f32.mxu1 %v3098_v35  ;;  %5867 = vmatpush1.bf16.msra.mxu1 %v5866_v26  ;;  %v7948_v26 = vld [vmem:[#allocation3 + $0x79] sm:$0xff] }
 0x3fd   : > { %5868 = vmatprep.subr.bf16.mxu1 %v8361_v8 }
 0x3ff   : > { %4314 = vmatmul.mubr.f32.gmra.mrb[38].mxu1 %v7920_v49 }
 0x400   : > { %4318 = vmatprep.mubr.f32.mxu1 %v3099_v61  ;;  %5870 = vmatpush1.bf16.msra.mxu1 %v5869_v60  ;;  %v5887_v60 = vpack.c.bf16 %v3755_v5, %v3754_v46  ;;  %v7956_v61 = vld [vmem:[#allocation3 + $0x81] sm:$0xff]  ;;  %v3108_v5 = vld [vmem:[#allocation3 + $0xb2] sm:$0xff] }
 0x401   : > { %5871 = vmatprep.subr.bf16.mxu1 %v8361_v8  ;;  %v7926_v18 = vpop.f32.mrb[74].mxu0 }
 0x402   : > { %v7929_v21 = vpop.f32.mrb[75].mxu0 }
 0x403   : > { %4319 = vmatmul.mubr.f32.gmra.mrb[40].mxu1 %v7924_v62 }
 0x404   : > { %4323 = vmatprep.mubr.f32.mxu1 %v3100_v13  ;;  %5873 = vmatpush1.bf16.msra.mxu1 %v5872_v59  ;;  %v3105_v59 = vld [vmem:[#allocation3 + $0x92] sm:$0xff]  ;;  %v3759_v13 = vld [vmem:[#allocation9 + $0x3b8] sm:$0xff] }
 0x405   : > { %5874 = vmatprep.subr.bf16.mxu1 %v8361_v8 }
 0x407   : > { %4324 = vmatmul.mubr.f32.gmra.mrb[42].mxu1 %v7932_v29 }
 0x408   : > { %4328 = vmatprep.mubr.f32.mxu1 %v3101_v50  ;;  %5876 = vmatpush1.bf16.msra.mxu1 %v5875_v17  ;;  %v7960_v17 = vld [vmem:[#allocation3 + $0x91] sm:$0xff] }
 0x409   : > { %5877 = vmatprep.subr.bf16.mxu1 %v8361_v8  ;;  %v7938_v32 = vpop.f32.mrb[76].mxu0 }
 0x40a   : > { %v7941_v20 = vpop.f32.mrb[77].mxu0 }
 0x40b   : > { %4329 = vmatmul.mubr.f32.gmra.mrb[44].mxu1 %v7936_v47 }
 0x40c   : > { %4333 = vmatprep.mubr.f32.mxu1 %v3102_v0  ;;  %5879 = vmatpush1.bf16.msra.mxu1 %v5878_v30  ;;  %v5893_v30 = vpack.c.bf16 %v3759_v13, %v3758_v10  ;;  %v7968_v0 = vld [vmem:[#allocation3 + $0x99] sm:$0xff]  ;;  %v5902_v10 = vpack.c.bf16 %v3765_v33, %v3764_v44  ;;  %v3112_v33 = vld [vmem:[#allocation3 + $0xe2] sm:$0xff] }
 0x40d   : > { %5880 = vmatprep.subr.bf16.mxu1 %v8361_v8  ;;  %v3766_v13 = vld [vmem:[#allocation9 + $0x3f0] sm:$0xff] }
 0x40f   : > { %4334 = vmatmul.mubr.f32.gmra.mrb[46].mxu1 %v7944_v48 }
 0x410   : > { %4338 = vmatprep.mubr.f32.mxu1 %v3103_v45  ;;  %5882 = vmatpush1.bf16.msra.mxu1 %v5881_v56  ;;  %v3107_v56 = vld [vmem:[#allocation3 + $0xaa] sm:$0xff] }
 0x411   : > { %5883 = vmatprep.subr.bf16.mxu1 %v8361_v8  ;;  %v7950_v37 = vpop.f32.mrb[78].mxu0  ;;  %v3763_v45 = vld [vmem:[#allocation9 + $0x3d8] sm:$0xff] }
 0x412   : > { %v7953_v35 = vpop.f32.mrb[79].mxu0 }
 0x413   : > { %4339 = vmatmul.mubr.f32.gmra.mrb[48].mxu1 %v7948_v26 }
 0x414   : > { %4343 = vmatprep.mubr.f32.mxu1 %v3104_v9  ;;  %5885 = vmatpush1.bf16.msra.mxu1 %v5884_v34  ;;  %v7972_v34 = vld [vmem:[#allocation3 + $0xa9] sm:$0xff] }
 0x415   : > { %5886 = vmatprep.subr.bf16.mxu1 %v8361_v8 }
 0x417   : > { %4344 = vmatmul.mubr.f32.gmra.mrb[50].mxu1 %v7956_v61 }
 0x418   : > { %4348 = vmatprep.mubr.f32.mxu1 %v3105_v59  ;;  %5888 = vmatpush1.bf16.msra.mxu1 %v5887_v60  ;;  %v5899_v60 = vpack.c.bf16 %v3763_v45, %v3762_v14  ;;  %v7980_v59 = vld [vmem:[#allocation3 + $0xb1] sm:$0xff]  ;;  %v7992_v14 = vld [vmem:[#allocation3 + $0xc9] sm:$0xff]  ;;  %v3111_v45 = vld [vmem:[#allocation3 + $0xda] sm:$0xff] }
 0x419   : > { %5889 = vmatprep.subr.bf16.mxu1 %v8361_v8  ;;  %v7962_v7 = vpop.f32.mrb[80].mxu0 }
 0x41a   : > { %v7965_v50 = vpop.f32.mrb[81].mxu0 }
 0x41b   : > { %4349 = vmatmul.mubr.f32.gmra.mrb[52].mxu1 %v7960_v17 }
 0x41c   : > { %4353 = vmatprep.mubr.f32.mxu1 %v3106_v39  ;;  %5891 = vmatpush1.bf16.msra.mxu1 %v5890_v36  ;;  %v3109_v36 = vld [vmem:[#allocation3 + $0xc2] sm:$0xff] }
 0x41d   : > { %5892 = vmatprep.subr.bf16.mxu1 %v8361_v8  ;;  %v3767_v39 = vld [vmem:[#allocation9 + $0x3f8] sm:$0xff] }
 0x41f   : > { %4354 = vmatmul.mubr.f32.gmra.mrb[54].mxu1 %v7968_v0 }
 0x420   : > { %4358 = vmatprep.mubr.f32.mxu1 %v3107_v56  ;;  %5894 = vmatpush1.bf16.msra.mxu1 %v5893_v30  ;;  %v7984_v30 = vld [vmem:[#allocation3 + $0xc1] sm:$0xff] }
 0x421   : > { %5895 = vmatprep.subr.bf16.mxu1 %v8361_v8  ;;  %v7974_v46 = vpop.f32.mrb[82].mxu0 }
 0x422   : > { %v7977_v9 = vpop.f32.mrb[83].mxu0 }
 0x423   : > { %4359 = vmatmul.mubr.f32.gmra.mrb[56].mxu1 %v7972_v34 }
 0x424   : > { %4363 = vmatprep.mubr.f32.mxu1 %v3108_v5  ;;  %5897 = vmatpush1.bf16.msra.mxu1 %v5896_v24  ;;  %v5905_v24 = vpack.c.bf16 %v3767_v39, %v3766_v13  ;;  %v8391_v5 = vld [vmem:[#allocation16_spill] sm:$0xff]  ;;  %v8011_v13 = vld [vmem:[#allocation3 + $0xf9] sm:$0xff] }
 0x425   : > { %5898 = vmatprep.subr.bf16.mxu1 %v8361_v8  ;;  %v8015_v39 = vld [vmem:[#allocation3 + $0x109] sm:$0xff] }
 0x427   : > { %4364 = vmatmul.mubr.f32.gmra.mrb[58].mxu1 %v7980_v59 }
 0x428   : > { %4368 = vmatprep.mubr.f32.mxu1 %v3109_v36  ;;  %5900 = vmatpush1.bf16.msra.mxu1 %v5899_v60  ;;  %v7996_v60 = vld [vmem:[#allocation3 + $0xd9] sm:$0xff] }
 0x429   : > { %5901 = vmatprep.subr.bf16.mxu1 %v8361_v8 }
 0x42a   : > { %v7986_v22 = vpop.f32.mrb[84].mxu0 }
 0x42b   : > { %4369 = vmatmul.mubr.f32.gmra.mrb[60].mxu1 %v7984_v30  ;;  %v7989_v56 = vpop.f32.mrb[85].mxu0 }
 0x42c   : > { %4373 = vmatprep.mubr.f32.mxu1 %v3110_v38  ;;  %5903 = vmatpush1.bf16.msra.mxu1 %v5902_v10  ;;  %v8007_v10 = vld [vmem:[#allocation3 + $0xf1] sm:$0xff] }
 0x42d   : > { %5904 = vmatprep.subr.bf16.mxu1 %v8361_v8  ;;  %v8003_v8 = vld [vmem:[#allocation3 + $0xe1] sm:$0xff]  ;;  %v8019_v38 = vld [vmem:[#allocation3 + $0x111] sm:$0xff] }
 0x42f   : > { %4374 = vmatmul.mubr.f32.gmra.mrb[62].mxu1 %v7992_v14 }
 0x430   : > { %4378 = vmatprep.mubr.f32.mxu1 %v3111_v45  ;;  %5906 = vmatpush1.bf16.msra.mxu1 %v5905_v24  ;;  %v8395_v24 = vld [vmem:[#allocation31_spill] sm:$0xff] }
 0x431   : > { %5939 = vmatprep.subr.bf16.mxu1 %v8391_v5  ;;  %v7998_v44 = vpop.f32.mrb[86].mxu0  ;;  %v8396_v45 = vmax.f32 %v8395_v24, 0.0  ;;  %v8399_v24 = vld [vmem:[#allocation18_spill] sm:$0xff] }
 0x432   : > { %v8001_v36 = vpop.f32.mrb[87].mxu0 }
 0x433   : > { %4379 = vmatmul.mubr.f32.gmra.mrb[64].mxu1 %v7996_v60 }
 0x434   : > { %4383 = vmatprep.mubr.f32.mxu1 %v3112_v33  ;;  %v8051_v33 = vld [vmem:[#allocation3 + $0x18a] sm:$0xff] }
 0x437   : > { %4384 = vmatmul.mubr.f32.gmra.mrb[66].mxu1 %v8003_v8 }
 0x438   : > { %4388 = vmatprep.mubr.f32.mxu1 %v7687_v63  ;;  %v8023_v63 = vld [vmem:[#allocation3 + $0x121] sm:$0xff] }
 0x43b   : > { %4389 = vmatmul.mubr.f32.gmra.mrb[68].mxu1 %v8007_v10 }
 0x43c   : > { %4393 = vmatprep.mubr.f32.mxu1 %v7691_v54  ;;  %v8027_v54 = vld [vmem:[#allocation3 + $0x129] sm:$0xff] }
 0x43f   : > { %4394 = vmatmul.mubr.f32.gmra.mrb[70].mxu1 %v8011_v13 }
 0x440   : > { %4398 = vmatprep.mubr.f32.mxu1 %v8387_v42  ;;  %v8031_v42 = vld [vmem:[#allocation3 + $0x139] sm:$0xff] }
 0x443   : > { %4399 = vmatmul.mubr.f32.gmra.mrb[72].mxu1 %v8015_v39 }
 0x444   : > { %4403 = vmatprep.mubr.f32.mxu1 %v8388_v40  ;;  %v8035_v40 = vld [vmem:[#allocation3 + $0x141] sm:$0xff] }
 0x447   : > { %4404 = vmatmul.mubr.f32.gmra.mrb[74].mxu1 %v8019_v38 }
 0x448   : > { %4408 = vmatprep.mubr.f32.mxu1 %v7723_v52  ;;  %v8392_v52 = vld [vmem:[#allocation27_spill] sm:$0xff] }
 0x44b   : > { %4409 = vmatmul.mubr.f32.gmra.mrb[76].mxu1 %v8023_v63 }
 0x44c   : > { %4413 = vmatprep.mubr.f32.mxu1 %v8389_v51  ;;  %v8394_v51 = vld [vmem:[#allocation30_spill] sm:$0xff] }
 0x44f   : > { %4414 = vmatmul.mubr.f32.gmra.mrb[78].mxu1 %v8027_v54 }
 0x450   : > { %4418 = vmatprep.mubr.f32.mxu1 %v7746_v15  ;;  %v8393_v15 = vld [vmem:[#allocation29_spill] sm:$0xff] }
 0x453   : > { %4419 = vmatmul.mubr.f32.gmra.mrb[80].mxu1 %v8031_v42 }
 0x454   : > { %4423 = vmatprep.mubr.f32.mxu1 %v8390_v43  ;;  %v8046_v43 = vld [vmem:[#allocation3 + $0x182] sm:$0xff] }
 0x457   : > { %4424 = vmatmul.mubr.f32.gmra.mrb[82].mxu1 %v8035_v40 }
 0x458   : > { %4428 = vmatprep.mubr.f32.mxu1 %v7877_v12 }
 0x45b   : > { %4429 = vmatmul.mubr.f32.gmra.mrb[84].mxu1 %v8392_v52  ;;  %v3160_v52 = vld [vmem:[#allocation3 + $0x30] sm:$0xff] }
 0x45c   : > { %4433 = vmatprep.mubr.f32.mxu1 %v7885_v16 }
 0x45f   : > { %4434 = vmatmul.mubr.f32.gmra.mrb[86].mxu1 %v7743_v25  ;;  %v8397_v25 = vmax.f32 %v7788_v27, 0.0  ;;  %v3162_v27 = vld [vmem:[#allocation3 + $0x48] sm:$0xff] }
 0x460   : > { %4438 = vmatprep.mubr.f32.mxu1 %v7891_v28 }
 0x463   : > { %4439 = vmatmul.mubr.f32.gmra.mrb[88].mxu1 %v8393_v15  ;;  %v8398_v15 = vld [vmem:[#allocation17_spill] sm:$0xff] }
 0x464   : > { %4443 = vmatprep.mubr.f32.mxu1 %v7901_v23 }
 0x467   : > { %4444 = vmatmul.mubr.f32.gmra.mrb[90].mxu1 %v8394_v51  ;;  %v3161_v51 = vld [vmem:[#allocation3 + $0x38] sm:$0xff] }
 0x468   : > { %4448 = vmatprep.mubr.f32.mxu1 %v8046_v43 }
 0x46b   : > { %4449 = vmatmul.mubr.f32.gmra.mrb[92].mxu1 %v8396_v45  ;;  %v8402_v45 = vld [vmem:[#allocation21_spill] sm:$0xff] }
 0x46c   : > { %4453 = vmatprep.mubr.f32.mxu1 %v8051_v33 }
 0x46f   : > { %4454 = vmatmul.mubr.f32.gmra.mrb[94].mxu1 %v8397_v25  ;;  %v8403_v25 = vld [vmem:[#allocation22_spill] sm:$0xff] }
 0x470   : > { %4523 = vmatprep.mubr.f32.mxu1 %v7912_v11  ;;  %v8400_v11 = vld [vmem:[#allocation19_spill] sm:$0xff] }
 0x473   : > { %4524 = vmatmul.mubr.f32.vlgmr.msra.gmra.mrb[32].mxu1 %v3160_v52  ;;  %v8404_v52 = vld [vmem:[#allocation23_spill] sm:$0xff] }
 0x474   : > { %4528 = vmatprep.mubr.f32.mxu1 %v7920_v49  ;;  %5947 = vmatpush3.bf16.msra.mxu1 %v8391_v5  ;;  %v3163_v49 = vld [vmem:[#allocation3 + $0x50] sm:$0xff] }
 0x475   : > { %5940 = vmatprep.subr.bf16.mxu1 %v8398_v15  ;;  %v8401_v5 = vld [vmem:[#allocation20_spill] sm:$0xff] }
 0x477   : > { %4529 = vmatmul.mubr.f32.gmra.mrb[34].mxu1 %v3161_v51  ;;  %v3170_v51 = vld [vmem:[#allocation3 + $0xa8] sm:$0xff] }
 0x478   : > { %4533 = vmatprep.mubr.f32.mxu1 %v7924_v62  ;;  %5948 = vmatpush3.bf16.msra.mxu1 %v8398_v15  ;;  %v3164_v62 = vld [vmem:[#allocation3 + $0x60] sm:$0xff]  ;;  %v3168_v15 = vld [vmem:[#allocation3 + $0x90] sm:$0xff] }
 0x479   : > { %5941 = vmatprep.subr.bf16.mxu1 %v8399_v24 }
 0x47b   : > { %4534 = vmatmul.mubr.f32.gmra.mrb[36].mxu1 %v3162_v27  ;;  %v3248_v27 = vld [vmem:[#allocation3 + $0x151] sm:$0xff] }
 0x47c   : > { %4538 = vmatprep.mubr.f32.mxu1 %v7932_v29  ;;  %5949 = vmatpush3.bf16.msra.mxu1 %v8399_v24  ;;  %v3165_v29 = vld [vmem:[#allocation3 + $0x68] sm:$0xff]  ;;  %v3172_v24 = vld [vmem:[#allocation3 + $0xc0] sm:$0xff] }
 0x47d   : > { %5942 = vmatprep.subr.bf16.mxu1 %v8400_v11 }
 0x47f   : > { %4539 = vmatmul.mubr.f32.gmra.mrb[38].mxu1 %v3163_v49  ;;  %v3250_v49 = vld [vmem:[#allocation3 + $0x169] sm:$0xff] }
 0x480   : > { %4543 = vmatprep.mubr.f32.mxu1 %v7936_v47  ;;  %5950 = vmatpush3.bf16.msra.mxu1 %v8400_v11  ;;  %v3166_v47 = vld [vmem:[#allocation3 + $0x78] sm:$0xff] }
 0x481   : > { %5943 = vmatprep.subr.bf16.mxu1 %v8401_v5  ;;  %v3249_v11 = vld [vmem:[#allocation3 + $0x159] sm:$0xff] }
 0x483   : > { %4544 = vmatmul.mubr.f32.gmra.mrb[40].mxu1 %v3164_v62  ;;  %v3252_v62 = vld [vmem:[#allocation3 + $0x181] sm:$0xff] }
 0x484   : > { %4548 = vmatprep.mubr.f32.mxu1 %v7944_v48  ;;  %5951 = vmatpush3.bf16.msra.mxu1 %v8401_v5  ;;  %v3167_v48 = vld [vmem:[#allocation3 + $0x80] sm:$0xff]  ;;  %v3251_v5 = vld [vmem:[#allocation3 + $0x171] sm:$0xff] }
 0x485   : > { %5944 = vmatprep.subr.bf16.mxu1 %v8402_v45 }
 0x487   : > { %4549 = vmatmul.mubr.f32.gmra.mrb[42].mxu1 %v3165_v29  ;;  %v3255_v29 = vld [vmem:[#allocation3 + $0x1a1] sm:$0xff] }
 0x488   : > { %4553 = vmatprep.mubr.f32.mxu1 %v7948_v26  ;;  %5952 = vmatpush3.bf16.msra.mxu1 %v8402_v45  ;;  %v3169_v26 = vld [vmem:[#allocation3 + $0x98] sm:$0xff] }
 0x489   : > { %5945 = vmatprep.subr.bf16.mxu1 %v8403_v25  ;;  %v3254_v45 = vld [vmem:[#allocation3 + $0x199] sm:$0xff] }
 0x48b   : > { %4554 = vmatmul.mubr.f32.gmra.mrb[44].mxu1 %v3166_v47 }
 0x48c   : > { %4558 = vmatprep.mubr.f32.mxu1 %v7956_v61  ;;  %5953 = vmatpush3.bf16.msra.mxu1 %v8403_v25  ;;  %v3171_v61 = vld [vmem:[#allocation3 + $0xb0] sm:$0xff] }
 0x48d   : > { %5946 = vmatprep.subr.bf16.mxu1 %v8404_v52  ;;  %v6406_v25 = vld [vmem:[#allocation2] sm:$0xff] }
 0x48f   : > { %4559 = vmatmul.mubr.f32.gmra.mrb[46].mxu1 %v3167_v48 }
 0x490   : > { %4563 = vmatprep.mubr.f32.mxu1 %v7960_v17  ;;  %5954 = vmatpush3.bf16.msra.mxu1 %v8404_v52  ;;  %v3173_v17 = vld [vmem:[#allocation3 + $0xc8] sm:$0xff] }
 0x493   : > { %4564 = vmatmul.mubr.f32.gmra.mrb[48].mxu1 %v3168_v15 }
 0x494   : > { %4568 = vmatprep.mubr.f32.mxu1 %v7968_v0  ;;  %v3174_v0 = vld [vmem:[#allocation3 + $0xd8] sm:$0xff] }
 0x497   : > { %4569 = vmatmul.mubr.f32.gmra.mrb[50].mxu1 %v3169_v26 }
 0x498   : > { %4573 = vmatprep.mubr.f32.mxu1 %v7972_v34  ;;  %v3175_v34 = vld [vmem:[#allocation3 + $0xe0] sm:$0xff] }
 0x49b   : > { %4574 = vmatmul.mubr.f32.gmra.mrb[52].mxu1 %v3170_v51 }
 0x49c   : > { %4578 = vmatprep.mubr.f32.mxu1 %v7980_v59  ;;  %v3176_v59 = vld [vmem:[#allocation3 + $0xf0] sm:$0xff] }
 0x49f   : > { %4579 = vmatmul.mubr.f32.gmra.mrb[54].mxu1 %v3171_v61  ;;  %v4988_v61 = vld [vmem:[#allocation5 + $0x8] sm:$0xff] }
 0x4a0   : > { %4583 = vmatprep.mubr.f32.mxu1 %v7984_v30  ;;  %v3177_v30 = vld [vmem:[#allocation3 + $0xf8] sm:$0xff] }
 0x4a3   : > { %4584 = vmatmul.mubr.f32.gmra.mrb[56].mxu1 %v3172_v24 }
 0x4a4   : > { %4588 = vmatprep.mubr.f32.mxu1 %v7992_v14  ;;  %v3178_v14 = vld [vmem:[#allocation3 + $0x108] sm:$0xff] }
 0x4a7   : > { %4589 = vmatmul.mubr.f32.gmra.mrb[58].mxu1 %v3173_v17 }
 0x4a8   : > { %4593 = vmatprep.mubr.f32.mxu1 %v7996_v60  ;;  %v3179_v60 = vld [vmem:[#allocation3 + $0x110] sm:$0xff] }
 0x4ab   : > { %4594 = vmatmul.mubr.f32.gmra.mrb[60].mxu1 %v3174_v0 }
 0x4ac   : > { %4598 = vmatprep.mubr.f32.mxu1 %v8003_v8  ;;  %v3180_v8 = vld [vmem:[#allocation3 + $0x120] sm:$0xff] }
 0x4af   : > { %4599 = vmatmul.mubr.f32.gmra.mrb[62].mxu1 %v3175_v34 }
 0x4b0   : > { %4603 = vmatprep.mubr.f32.mxu1 %v8007_v10  ;;  %v3181_v10 = vld [vmem:[#allocation3 + $0x128] sm:$0xff] }
 0x4b3   : > { %4604 = vmatmul.mubr.f32.gmra.mrb[64].mxu1 %v3176_v59 }
 0x4b4   : > { %4608 = vmatprep.mubr.f32.mxu1 %v8011_v13  ;;  %v3182_v13 = vld [vmem:[#allocation3 + $0x138] sm:$0xff] }
 0x4b7   : > { %4609 = vmatmul.mubr.f32.gmra.mrb[66].mxu1 %v3177_v30 }
 0x4b8   : > { %4613 = vmatprep.mubr.f32.mxu1 %v8015_v39  ;;  %v3183_v39 = vld [vmem:[#allocation3 + $0x140] sm:$0xff] }
 0x4bb   : > { %4614 = vmatmul.mubr.f32.gmra.mrb[68].mxu1 %v3178_v14  ;;  %v4989_v14 = vld [vmem:[#allocation5 + $0x10] sm:$0xff] }
 0x4bc   : > { %4618 = vmatprep.mubr.f32.mxu1 %v8019_v38  ;;  %v3184_v38 = vld [vmem:[#allocation3 + $0x150] sm:$0xff] }
 0x4bf   : > { %4619 = vmatmul.mubr.f32.gmra.mrb[70].mxu1 %v3179_v60 }
 0x4c0   : > { %4623 = vmatprep.mubr.f32.mxu1 %v8023_v63  ;;  %v3185_v63 = vld [vmem:[#allocation3 + $0x158] sm:$0xff] }
 0x4c3   : > { %4624 = vmatmul.mubr.f32.gmra.mrb[72].mxu1 %v3180_v8 }
 0x4c4   : > { %4628 = vmatprep.mubr.f32.mxu1 %v8027_v54  ;;  %v3186_v54 = vld [vmem:[#allocation3 + $0x168] sm:$0xff] }
 0x4c7   : > { %4629 = vmatmul.mubr.f32.gmra.mrb[74].mxu1 %v3181_v10 }
 0x4c8   : > { %4633 = vmatprep.mubr.f32.mxu1 %v8031_v42  ;;  %v3187_v42 = vld [vmem:[#allocation3 + $0x170] sm:$0xff] }
 0x4cb   : > { %4634 = vmatmul.mubr.f32.gmra.mrb[76].mxu1 %v3182_v13 }
 0x4cc   : > { %4638 = vmatprep.mubr.f32.mxu1 %v8035_v40  ;;  %v3253_v40 = vld [vmem:[#allocation3 + $0x189] sm:$0xff] }
 0x4cf   : > { %4639 = vmatmul.mubr.f32.gmra.mrb[78].mxu1 %v3183_v39 }
 0x4d0   : > { %4643 = vmatprep.mubr.f32.mxu1 %v3248_v27 }
 0x4d3   : > { %4644 = vmatmul.mubr.f32.gmra.mrb[80].mxu1 %v3184_v38  ;;  %v4990_v38 = vld [vmem:[#allocation5 + $0x18] sm:$0xff] }
 0x4d4   : > { %4648 = vmatprep.mubr.f32.mxu1 %v3249_v11 }
 0x4d7   : > { %4649 = vmatmul.mubr.f32.gmra.mrb[82].mxu1 %v3185_v63 }
 0x4d8   : > { %4653 = vmatprep.mubr.f32.mxu1 %v3250_v49 }
 0x4db   : > { %4654 = vmatmul.mubr.f32.gmra.mrb[84].mxu1 %v3186_v54 }
 0x4dc   : > { %4658 = vmatprep.mubr.f32.mxu1 %v3251_v5 }
 0x4df   : > { %4659 = vmatmul.mubr.f32.gmra.mrb[86].mxu1 %v3187_v42 }
 0x4e0   : > { %4663 = vmatprep.mubr.f32.mxu1 %v3252_v62 }
 0x4e3   : > { %4664 = vmatmul.mubr.f32.gmra.mrb[88].mxu1 %v7888_v6  ;;  %v3318_v6 = vld [vmem:[#allocation3 + $0x19a] sm:$0xff] }
 0x4e4   : > { %4668 = vmatprep.mubr.f32.mxu1 %v3253_v40 }
 0x4e7   : > { %4669 = vmatmul.mubr.f32.gmra.mrb[90].mxu1 %v7896_v3  ;;  %v3319_v3 = vld [vmem:[#allocation3 + $0x1a2] sm:$0xff] }
 0x4e8   : > { %4673 = vmatprep.mubr.f32.mxu1 %v3254_v45 }
 0x4eb   : > { %4674 = vmatmul.mubr.f32.gmra.mrb[92].mxu1 %v6406_v25 }
 0x4ec   : > { %4678 = vmatprep.mubr.f32.mxu1 %v3255_v29 }
 0x4ef   : > { %4679 = vmatmul.mubr.f32.gmra.mrb[94].mxu1 %v6406_v25 }
 0x4f0   : > { %5479 = vmatprep.mubr.f32.mxu1 %v7877_v12  ;;  %v8106_v12 = vld [vmem:[%s8295_s5] ss:$0 sm:$0xff] }
 0x4f3   : > { %5480 = vmatmul.mubr.f32.vlgmr.msra.gmra.mrb[96].mxu1 %v7885_v16 }
 0x4f4   : > { %5482 = vmatprep.mubr.f32.mxu1 %v7891_v28 }
 0x4f7   : > { %5483 = vmatmul.mubr.f32.gmra.mrb[98].mxu1 %v7901_v23  ;;  %v8113_v23 = vld [vmem:[%s8296_s6] ss:$0 sm:$0xff] }
 0x4f8   : > { %5485 = vmatprep.mubr.f32.mxu1 %v8046_v43 }
 0x4fb   : > { %5486 = vmatmul.mubr.f32.gmra.mrb[100].mxu1 %v8051_v33  ;;  %v4987_v33 = vld [vmem:[#allocation5] sm:$0xff] }
 0x4fc   : > { %5488 = vmatprep.mubr.f32.mxu1 %v3318_v6 }
 0x4ff   : > { %5489 = vmatmul.mubr.f32.gmra.mrb[102].mxu1 %v3319_v3 }
 0x546   : > { %v4525_v47 = vpop.f32.mrb[32].mxu1 }
 0x547   : > { %v4751_v16 = vadd.f32 %v7872_v2, %v4525_v47  ;;  %v4527_v28 = vpop.f32.mrb[33].mxu1 }
 0x549   : > { %v4916_v43 = vmul.f32 %v8106_v12, %v4751_v16 }
 0x54a   : > { %v4530_v52 = vpop.f32.mrb[34].mxu1 }
 0x54b   : > { %v4955_v48 = vadd.f32 %v8113_v23, %v4916_v43  ;;  %v4756_v15 = vadd.f32 %v7869_v57, %v4530_v52  ;;  %v4532_v26 = vpop.f32.mrb[35].mxu1 }
 0x54d   : > { %v5019_v51 = vadd.f32 %v4987_v33, %v4955_v48  ;;  %v4917_v2 = vmul.f32 %v8106_v12, %v4756_v15 }
 0x54e   : > { %v4535_v24 = vpop.f32.mrb[36].mxu1 }
 0x54f   : > { %v5051_v17 = vmax.f32 %v5019_v51, 0.0  ;;  %v4956_v0 = vadd.f32 %v8113_v23, %v4917_v2  ;;  %v4761_v34 = vadd.f32 %v7882_v4, %v4535_v24  ;;  %v4537_v59 = vpop.f32.mrb[37].mxu1 }
 0x551   : > { %5083 = vst [vmem:[%s8123_s13] sm:$0xff] %v5051_v17  ;;  %v5020_v30 = vadd.f32 %v4988_v61, %v4956_v0  ;;  %v4918_v57 = vmul.f32 %v8106_v12, %v4761_v34 }
 0x552   : > { %v4540_v60 = vpop.f32.mrb[38].mxu1 }
 0x553   : > { %v5052_v8 = vmax.f32 %v5020_v30, 0.0  ;;  %v4957_v10 = vadd.f32 %v8113_v23, %v4918_v57  ;;  %v4766_v13 = vadd.f32 %v7879_v19, %v4540_v60  ;;  %v4542_v39 = vpop.f32.mrb[39].mxu1  ;;  %v4991_v19 = vld [vmem:[#allocation5 + $0x20] sm:$0xff] }
 0x555   : > { %5084 = vst [vmem:[%s8123_s13 + $0x8] sm:$0xff] %v5052_v8  ;;  %v5021_v4 = vadd.f32 %v4989_v14, %v4957_v10  ;;  %v4919_v27 = vmul.f32 %v8106_v12, %v4766_v13 }
 0x556   : > { %v4545_v11 = vpop.f32.mrb[40].mxu1 }
 0x557   : > { %v5053_v63 = vmax.f32 %v5021_v4, 0.0  ;;  %v4958_v49 = vadd.f32 %v8113_v23, %v4919_v27  ;;  %v4771_v54 = vadd.f32 %v7898_v55, %v4545_v11  ;;  %v4547_v5 = vpop.f32.mrb[41].mxu1  ;;  %v4992_v55 = vld [vmem:[#allocation5 + $0x28] sm:$0xff] }
 0x559   : > { %5085 = vst [vmem:[%s8123_s13 + $0x10] sm:$0xff] %v5053_v63  ;;  %v5022_v42 = vadd.f32 %v4990_v38, %v4958_v49  ;;  %v4920_v62 = vmul.f32 %v8106_v12, %v4771_v54 }
 0x55a   : > { %v4550_v40 = vpop.f32.mrb[42].mxu1 }
 0x55b   : > { %v5054_v45 = vmax.f32 %v5022_v42, 0.0  ;;  %v4959_v29 = vadd.f32 %v8113_v23, %v4920_v62  ;;  %v4776_v25 = vadd.f32 %v7893_v53, %v4550_v40  ;;  %v4552_v6 = vpop.f32.mrb[43].mxu1  ;;  %v4993_v53 = vld [vmem:[#allocation5 + $0x30] sm:$0xff] }
 0x55d   : > { %5086 = vst [vmem:[%s8123_s13 + $0x18] sm:$0xff] %v5054_v45  ;;  %v5023_v3 = vadd.f32 %v4991_v19, %v4959_v29  ;;  %v4921_v47 = vmul.f32 %v8106_v12, %v4776_v25 }
 0x55e   : > { %v4555_v16 = vpop.f32.mrb[44].mxu1 }
 0x55f   : > { %v5055_v28 = vmax.f32 %v5023_v3, 0.0  ;;  %v4960_v43 = vadd.f32 %v8113_v23, %v4921_v47  ;;  %v4781_v33 = vadd.f32 %v7907_v31, %v4555_v16  ;;  %v4557_v52 = vpop.f32.mrb[45].mxu1  ;;  %v4994_v31 = vld [vmem:[#allocation5 + $0x38] sm:$0xff] }
 0x561   : > { %5087 = vst [vmem:[%s8123_s13 + $0x20] sm:$0xff] %v5055_v28  ;;  %v5024_v48 = vadd.f32 %v4992_v55, %v4960_v43  ;;  %v4922_v15 = vmul.f32 %v8106_v12, %v4781_v33 }
 0x562   : > { %v4560_v26 = vpop.f32.mrb[46].mxu1 }
 0x563   : > { %v5056_v51 = vmax.f32 %v5024_v48, 0.0  ;;  %v4961_v2 = vadd.f32 %v8113_v23, %v4922_v15  ;;  %v4786_v61 = vadd.f32 %v7905_v1, %v4560_v26  ;;  %v4562_v24 = vpop.f32.mrb[47].mxu1  ;;  %v4995_v1 = vld [vmem:[#allocation5 + $0x40] sm:$0xff] }
 0x565   : > { %5088 = vst [vmem:[%s8123_s13 + $0x28] sm:$0xff] %v5056_v51  ;;  %v5025_v17 = vadd.f32 %v4993_v53, %v4961_v2  ;;  %v4923_v0 = vmul.f32 %v8106_v12, %v4786_v61 }
 0x566   : > { %v4565_v34 = vpop.f32.mrb[48].mxu1 }
 0x567   : > { %v5057_v59 = vmax.f32 %v5025_v17, 0.0  ;;  %v4962_v30 = vadd.f32 %v8113_v23, %v4923_v0  ;;  %v4791_v57 = vadd.f32 %v7917_v58, %v4565_v34  ;;  %v4567_v14 = vpop.f32.mrb[49].mxu1  ;;  %v4996_v58 = vld [vmem:[#allocation5 + $0x48] sm:$0xff] }
 0x569   : > { %5089 = vst [vmem:[%s8123_s13 + $0x30] sm:$0xff] %v5057_v59  ;;  %v5026_v60 = vadd.f32 %v4994_v31, %v4962_v30  ;;  %v4924_v8 = vmul.f32 %v8106_v12, %v4791_v57 }
 0x56a   : > { %v4570_v10 = vpop.f32.mrb[50].mxu1 }
 0x56b   : > { %v5058_v13 = vmax.f32 %v5026_v60, 0.0  ;;  %v4963_v39 = vadd.f32 %v8113_v23, %v4924_v8  ;;  %v4796_v4 = vadd.f32 %v7914_v41, %v4570_v10  ;;  %v4572_v27 = vpop.f32.mrb[51].mxu1  ;;  %v4997_v41 = vld [vmem:[#allocation5 + $0x50] sm:$0xff] }
 0x56d   : > { %5090 = vst [vmem:[%s8123_s13 + $0x38] sm:$0xff] %v5058_v13  ;;  %v5027_v38 = vadd.f32 %v4995_v1, %v4963_v39  ;;  %v4925_v11 = vmul.f32 %v8106_v12, %v4796_v4 }
 0x56e   : > { %v4575_v63 = vpop.f32.mrb[52].mxu1 }
 0x56f   : > { %v5059_v49 = vmax.f32 %v5027_v38, 0.0  ;;  %v4964_v54 = vadd.f32 %v8113_v23, %v4925_v11  ;;  %v4801_v5 = vadd.f32 %v7929_v21, %v4575_v63  ;;  %v4577_v42 = vpop.f32.mrb[53].mxu1  ;;  %v4998_v21 = vld [vmem:[#allocation5 + $0x58] sm:$0xff] }
 0x571   : > { %5091 = vst [vmem:[%s8123_s13 + $0x40] sm:$0xff] %v5059_v49  ;;  %v5028_v62 = vadd.f32 %v4996_v58, %v4964_v54  ;;  %v4926_v19 = vmul.f32 %v8106_v12, %v4801_v5 }
 0x572   : > { %v4580_v40 = vpop.f32.mrb[54].mxu1 }
 0x573   : > { %v5060_v45 = vmax.f32 %v5028_v62, 0.0  ;;  %v4965_v29 = vadd.f32 %v8113_v23, %v4926_v19  ;;  %v4806_v25 = vadd.f32 %v7926_v18, %v4580_v40  ;;  %v4582_v6 = vpop.f32.mrb[55].mxu1  ;;  %v4999_v18 = vld [vmem:[#allocation5 + $0x60] sm:$0xff] }
 0x575   : > { %5092 = vst [vmem:[%s8123_s13 + $0x48] sm:$0xff] %v5060_v45  ;;  %v5029_v3 = vadd.f32 %v4997_v41, %v4965_v29  ;;  %v4927_v47 = vmul.f32 %v8106_v12, %v4806_v25 }
 0x576   : > { %v4585_v55 = vpop.f32.mrb[56].mxu1 }
 0x577   : > { %v5061_v16 = vmax.f32 %v5029_v3, 0.0  ;;  %v4966_v28 = vadd.f32 %v8113_v23, %v4927_v47  ;;  %v4811_v43 = vadd.f32 %v7941_v20, %v4585_v55  ;;  %v4587_v33 = vpop.f32.mrb[57].mxu1  ;;  %v5000_v20 = vld [vmem:[#allocation5 + $0x68] sm:$0xff] }
 0x579   : > { %5093 = vst [vmem:[%s8123_s13 + $0x50] sm:$0xff] %v5061_v16  ;;  %v5030_v52 = vadd.f32 %v4998_v21, %v4966_v28  ;;  %v4928_v48 = vmul.f32 %v8106_v12, %v4811_v43 }
 0x57a   : > { %v4590_v15 = vpop.f32.mrb[58].mxu1 }
 0x57b   : > { %v5062_v53 = vmax.f32 %v5030_v52, 0.0  ;;  %v4967_v26 = vadd.f32 %v8113_v23, %v4928_v48  ;;  %v4816_v51 = vadd.f32 %v7938_v32, %v4590_v15  ;;  %v4592_v2 = vpop.f32.mrb[59].mxu1  ;;  %v5001_v32 = vld [vmem:[#allocation5 + $0x70] sm:$0xff] }
 0x57d   : > { %5094 = vst [vmem:[%s8123_s13 + $0x58] sm:$0xff] %v5062_v53  ;;  %v5031_v61 = vadd.f32 %v4999_v18, %v4967_v26  ;;  %v4929_v24 = vmul.f32 %v8106_v12, %v4816_v51 }
 0x57e   : > { %v4595_v17 = vpop.f32.mrb[60].mxu1 }
 0x57f   : > { %v5063_v0 = vmax.f32 %v5031_v61, 0.0  ;;  %v4968_v31 = vadd.f32 %v8113_v23, %v4929_v24  ;;  %v4821_v34 = vadd.f32 %v7953_v35, %v4595_v17  ;;  %v4597_v59 = vpop.f32.mrb[61].mxu1  ;;  %v5002_v35 = vld [vmem:[#allocation5 + $0x78] sm:$0xff] }
 0x581   : > { %5095 = vst [vmem:[%s8123_s13 + $0x60] sm:$0xff] %v5063_v0  ;;  %v5032_v30 = vadd.f32 %v5000_v20, %v4968_v31  ;;  %v4930_v57 = vmul.f32 %v8106_v12, %v4821_v34 }
 0x582   : > { %v4600_v14 = vpop.f32.mrb[62].mxu1 }
 0x583   : > { %v5064_v60 = vmax.f32 %v5032_v30, 0.0  ;;  %v4969_v8 = vadd.f32 %v8113_v23, %v4930_v57  ;;  %v4826_v1 = vadd.f32 %v7950_v37, %v4600_v14  ;;  %v4602_v10 = vpop.f32.mrb[63].mxu1  ;;  %v5003_v37 = vld [vmem:[#allocation5 + $0x80] sm:$0xff] }
 0x585   : > { %5096 = vst [vmem:[%s8123_s13 + $0x68] sm:$0xff] %v5064_v60  ;;  %v5033_v13 = vadd.f32 %v5001_v32, %v4969_v8  ;;  %v4931_v39 = vmul.f32 %v8106_v12, %v4826_v1 }
 0x586   : > { %v4605_v4 = vpop.f32.mrb[64].mxu1 }
 0x587   : > { %v5065_v27 = vmax.f32 %v5033_v13, 0.0  ;;  %v4970_v38 = vadd.f32 %v8113_v23, %v4931_v39  ;;  %v4831_v11 = vadd.f32 %v7965_v50, %v4605_v4  ;;  %v4607_v58 = vpop.f32.mrb[65].mxu1  ;;  %v5004_v50 = vld [vmem:[#allocation5 + $0x88] sm:$0xff] }
 0x589   : > { %5097 = vst [vmem:[%s8123_s13 + $0x70] sm:$0xff] %v5065_v27  ;;  %v5034_v63 = vadd.f32 %v5002_v35, %v4970_v38  ;;  %v4932_v49 = vmul.f32 %v8106_v12, %v4831_v11 }
 0x58a   : > { %v4610_v54 = vpop.f32.mrb[66].mxu1 }
 0x58b   : > { %v5066_v5 = vmax.f32 %v5034_v63, 0.0  ;;  %v4971_v42 = vadd.f32 %v8113_v23, %v4932_v49  ;;  %v4836_v62 = vadd.f32 %v7962_v7, %v4610_v54  ;;  %v4612_v19 = vpop.f32.mrb[67].mxu1  ;;  %v5005_v7 = vld [vmem:[#allocation5 + $0x90] sm:$0xff] }
 0x58d   : > { %5098 = vst [vmem:[%s8123_s13 + $0x78] sm:$0xff] %v5066_v5  ;;  %v5035_v41 = vadd.f32 %v5003_v37, %v4971_v42  ;;  %v4933_v40 = vmul.f32 %v8106_v12, %v4836_v62 }
 0x58e   : > { %v4615_v45 = vpop.f32.mrb[68].mxu1 }
 0x58f   : > { %v5067_v29 = vmax.f32 %v5035_v41, 0.0  ;;  %v4972_v25 = vadd.f32 %v8113_v23, %v4933_v40  ;;  %v4841_v6 = vadd.f32 %v7977_v9, %v4615_v45  ;;  %v4617_v3 = vpop.f32.mrb[69].mxu1  ;;  %v5006_v9 = vld [vmem:[#allocation5 + $0x98] sm:$0xff] }
 0x591   : > { %5099 = vst [vmem:[%s8123_s13 + $0x80] sm:$0xff] %v5067_v29  ;;  %v5036_v47 = vadd.f32 %v5004_v50, %v4972_v25  ;;  %v4934_v21 = vmul.f32 %v8106_v12, %v4841_v6 }
 0x592   : > { %v4620_v55 = vpop.f32.mrb[70].mxu1 }
 0x593   : > { %v5068_v16 = vmax.f32 %v5036_v47, 0.0  ;;  %v4973_v28 = vadd.f32 %v8113_v23, %v4934_v21  ;;  %v4846_v43 = vadd.f32 %v7974_v46, %v4620_v55  ;;  %v4622_v33 = vpop.f32.mrb[71].mxu1  ;;  %v5007_v46 = vld [vmem:[#allocation5 + $0xa0] sm:$0xff] }
 0x595   : > { %5100 = vst [vmem:[%s8123_s13 + $0x88] sm:$0xff] %v5068_v16  ;;  %v5037_v52 = vadd.f32 %v5005_v7, %v4973_v28  ;;  %v4935_v48 = vmul.f32 %v8106_v12, %v4846_v43  ;;  %v5012_v43 = vld [vmem:[#allocation5 + $0xc8] sm:$0xff] }
 0x596   : > { %v4625_v18 = vpop.f32.mrb[72].mxu1 }
 0x597   : > { %v5069_v15 = vmax.f32 %v5037_v52, 0.0  ;;  %v4974_v53 = vadd.f32 %v8113_v23, %v4935_v48  ;;  %v4851_v26 = vadd.f32 %v7989_v56, %v4625_v18  ;;  %v4627_v51 = vpop.f32.mrb[73].mxu1  ;;  %v5008_v56 = vld [vmem:[#allocation5 + $0xa8] sm:$0xff] }
 0x599   : > { %5101 = vst [vmem:[%s8123_s13 + $0x90] sm:$0xff] %v5069_v15  ;;  %v5038_v2 = vadd.f32 %v5006_v9, %v4974_v53  ;;  %v4936_v61 = vmul.f32 %v8106_v12, %v4851_v26  ;;  %v5011_v9 = vld [vmem:[#allocation5 + $0xc0] sm:$0xff] }
 0x59a   : > { %v4630_v24 = vpop.f32.mrb[74].mxu1 }
 0x59b   : > { %v5070_v20 = vmax.f32 %v5038_v2, 0.0  ;;  %v4975_v17 = vadd.f32 %v8113_v23, %v4936_v61  ;;  %v4856_v0 = vadd.f32 %v7986_v22, %v4630_v24  ;;  %v4632_v31 = vpop.f32.mrb[75].mxu1  ;;  %v5009_v22 = vld [vmem:[#allocation5 + $0xb0] sm:$0xff] }
 0x59c   : > { %v5013_v31 = vld [vmem:[#allocation5 + $0xd0] sm:$0xff] }
 0x59d   : > { %5102 = vst [vmem:[%s8123_s13 + $0x98] sm:$0xff] %v5070_v20  ;;  %v5039_v34 = vadd.f32 %v5007_v46, %v4975_v17  ;;  %v4937_v59 = vmul.f32 %v8106_v12, %v4856_v0  ;;  %v5014_v46 = vld [vmem:[#allocation5 + $0xd8] sm:$0xff] }
 0x59e   : > { %v4635_v30 = vpop.f32.mrb[76].mxu1 }
 0x59f   : > { %v5071_v57 = vmax.f32 %v5039_v34, 0.0  ;;  %v4976_v32 = vadd.f32 %v8113_v23, %v4937_v59  ;;  %v4861_v14 = vadd.f32 %v8001_v36, %v4635_v30  ;;  %v4637_v60 = vpop.f32.mrb[77].mxu1  ;;  %v5010_v36 = vld [vmem:[#allocation5 + $0xb8] sm:$0xff] }
 0x5a1   : > { %5103 = vst [vmem:[%s8123_s13 + $0xa0] sm:$0xff] %v5071_v57  ;;  %v5040_v8 = vadd.f32 %v5008_v56, %v4976_v32  ;;  %v4938_v1 = vmul.f32 %v8106_v12, %v4861_v14 }
 0x5a2   : > { %v4640_v10 = vpop.f32.mrb[78].mxu1 }
 0x5a3   : > { %v5072_v13 = vmax.f32 %v5040_v8, 0.0  ;;  %v4977_v39 = vadd.f32 %v8113_v23, %v4938_v1  ;;  %v4866_v35 = vadd.f32 %v7998_v44, %v4640_v10  ;;  %v4642_v4 = vpop.f32.mrb[79].mxu1  ;;  %v5016_v8 = vld [vmem:[#allocation5 + $0xe8] sm:$0xff] }
 0x5a5   : > { %5104 = vst [vmem:[%s8123_s13 + $0xa8] sm:$0xff] %v5072_v13  ;;  %v5041_v27 = vadd.f32 %v5009_v22, %v4977_v39  ;;  %v4939_v38 = vmul.f32 %v8106_v12, %v4866_v35  ;;  %v5015_v39 = vld [vmem:[#allocation5 + $0xe0] sm:$0xff] }
 0x5a6   : > { %v4645_v11 = vpop.f32.mrb[80].mxu1 }
 0x5a7   : > { %v5073_v58 = vmax.f32 %v5041_v27, 0.0  ;;  %v4978_v63 = vadd.f32 %v8113_v23, %v4939_v38  ;;  %v4647_v49 = vpop.f32.mrb[81].mxu1 }
 0x5a8   : > { %v5018_v49 = vld [vmem:[#allocation5 + $0xf8] sm:$0xff] }
 0x5a9   : > { %5105 = vst [vmem:[%s8123_s13 + $0xb0] sm:$0xff] %v5073_v58  ;;  %v5042_v37 = vadd.f32 %v5010_v36, %v4978_v63 }
 0x5aa   : > { %v4650_v54 = vpop.f32.mrb[82].mxu1 }
 0x5ab   : > { %v5074_v5 = vmax.f32 %v5042_v37, 0.0  ;;  %v4652_v42 = vpop.f32.mrb[83].mxu1 }
 0x5ac   : > { %v5017_v42 = vld [vmem:[#allocation5 + $0xf0] sm:$0xff] }
 0x5ad   : > { %5106 = vst [vmem:[%s8123_s13 + $0xb8] sm:$0xff] %v5074_v5 }
 0x5ae   : > { %v4655_v62 = vpop.f32.mrb[84].mxu1 }
 0x5af   : > { %v4657_v19 = vpop.f32.mrb[85].mxu1 }
 0x5b2   : > { %v4660_v44 = vpop.f32.mrb[86].mxu1 }
 0x5b3   : > { %v4662_v41 = vpop.f32.mrb[87].mxu1 }
 0x5b6   : > { %v4665_v40 = vpop.f32.mrb[88].mxu1 }
 0x5b7   : > { %v4667_v50 = vpop.f32.mrb[89].mxu1 }
 0x5ba   : > { %v4670_v45 = vpop.f32.mrb[90].mxu1 }
 0x5bb   : > { %v4672_v29 = vpop.f32.mrb[91].mxu1 }
 0x5be   : > { %v4675_v25 = vpop.f32.mrb[92].mxu1 }
 0x5bf   : > { %v4677_v6 = vpop.f32.mrb[93].mxu1 }
 0x5c2   : > { %v4680_v3 = vpop.f32.mrb[94].mxu1 }
 0x5c3   : > { %v4682_v47 = vpop.f32.mrb[95].mxu1 }
 0x5c6   : > { %v5481_v21 = vpop.f32.mrb[96].mxu1 }
 0x5c7   : > { %v4876_v7 = vadd.f32 %v5481_v21, %v4650_v54  ;;  %v4870_v55 = vpop.f32.mrb[97].mxu1 }
 0x5c8   : > { %v4871_v16 = vadd.f32 %v4870_v55, %v4645_v11 }
 0x5c9   : > { %v4941_v28 = vmul.f32 %v8106_v12, %v4876_v7 }
 0x5ca   : > { %v4940_v33 = vmul.f32 %v8106_v12, %v4871_v16  ;;  %v5484_v52 = vpop.f32.mrb[98].mxu1 }
 0x5cb   : > { %v4980_v48 = vadd.f32 %v8113_v23, %v4941_v28  ;;  %v4886_v18 = vadd.f32 %v5484_v52, %v4660_v44  ;;  %v4880_v15 = vpop.f32.mrb[99].mxu1 }
 0x5cc   : > { %v4979_v53 = vadd.f32 %v8113_v23, %v4940_v33  ;;  %v4881_v26 = vadd.f32 %v4880_v15, %v4655_v62 }
 0x5cd   : > { %v5044_v51 = vadd.f32 %v5012_v43, %v4980_v48  ;;  %v4943_v2 = vmul.f32 %v8106_v12, %v4886_v18 }
 0x5ce   : > { %v5043_v61 = vadd.f32 %v5011_v9, %v4979_v53  ;;  %v4942_v24 = vmul.f32 %v8106_v12, %v4881_v26  ;;  %v5487_v20 = vpop.f32.mrb[100].mxu1 }
 0x5cf   : > { %v5076_v17 = vmax.f32 %v5044_v51, 0.0  ;;  %v4982_v0 = vadd.f32 %v8113_v23, %v4943_v2  ;;  %v4896_v34 = vadd.f32 %v5487_v20, %v4670_v45  ;;  %v4890_v59 = vpop.f32.mrb[101].mxu1 }
 0x5d0   : > { %v5075_v56 = vmax.f32 %v5043_v61, 0.0  ;;  %v4981_v30 = vadd.f32 %v8113_v23, %v4942_v24  ;;  %v4891_v57 = vadd.f32 %v4890_v59, %v4665_v40 }
 0x5d1   : > { %5108 = vst [vmem:[%s8123_s13 + $0xc8] sm:$0xff] %v5076_v17  ;;  %v5046_v32 = vadd.f32 %v5014_v46, %v4982_v0  ;;  %v4945_v14 = vmul.f32 %v8106_v12, %v4896_v34 }
 0x5d2   : > { %5107 = vst [vmem:[%s8123_s13 + $0xc0] sm:$0xff] %v5075_v56  ;;  %v5045_v60 = vadd.f32 %v5013_v31, %v4981_v30  ;;  %v4944_v1 = vmul.f32 %v8106_v12, %v4891_v57  ;;  %v5490_v22 = vpop.f32.mrb[102].mxu1 }
 0x5d3   : > { %v5078_v10 = vmax.f32 %v5046_v32, 0.0  ;;  %v4984_v13 = vadd.f32 %v8113_v23, %v4945_v14  ;;  %v4906_v35 = vadd.f32 %v5490_v22, %v4680_v3  ;;  %v4900_v4 = vpop.f32.mrb[103].mxu1 }
 0x5d4   : > { %v5077_v27 = vmax.f32 %v5045_v60, 0.0  ;;  %v4983_v38 = vadd.f32 %v8113_v23, %v4944_v1  ;;  %v4901_v36 = vadd.f32 %v4900_v4, %v4675_v25 }
 0x5d5   : > { %5110 = vst [vmem:[%s8123_s13 + $0xd8] sm:$0xff] %v5078_v10  ;;  %v5048_v11 = vadd.f32 %v5016_v8, %v4984_v13  ;;  %v4947_v58 = vmul.f32 %v8106_v12, %v4906_v35 }
 0x5d6   : > { %5109 = vst [vmem:[%s8123_s13 + $0xd0] sm:$0xff] %v5077_v27  ;;  %v5047_v63 = vadd.f32 %v5015_v39, %v4983_v38  ;;  %v4946_v37 = vmul.f32 %v8106_v12, %v4901_v36 }
 0x5d7   : > { %v5080_v54 = vmax.f32 %v5048_v11, 0.0  ;;  %v4986_v5 = vadd.f32 %v8113_v23, %v4947_v58 }
 0x5d8   : > { %v5079_v62 = vmax.f32 %v5047_v63, 0.0  ;;  %v4985_v19 = vadd.f32 %v8113_v23, %v4946_v37 }
 0x5d9   : > { %5112 = vst [vmem:[%s8123_s13 + $0xe8] sm:$0xff] %v5080_v54  ;;  %v5050_v44 = vadd.f32 %v5018_v49, %v4986_v5 }
 0x5da   : > { %5111 = vst [vmem:[%s8123_s13 + $0xe0] sm:$0xff] %v5079_v62  ;;  %v5049_v41 = vadd.f32 %v5017_v42, %v4985_v19 }
 0x5db   : > { %v5082_v40 = vmax.f32 %v5050_v44, 0.0 }
 0x5dc   : > { %v5081_v12 = vmax.f32 %v5049_v41, 0.0 }
 0x5dd   : > { %5114 = vst [vmem:[%s8123_s13 + $0xf8] sm:$0xff] %v5082_v40 }
 0x5de   : > { %5113 = vst [vmem:[%s8123_s13 + $0xf0] sm:$0xff] %v5081_v12 }
 0x5df   : > { %6476 = shalt.err (!%p6473_p11)
}
 0x5e0   : > { %s6477_s8 = scalar_lea.hbm %s8241_s20, 4096  ;;  %s6481_s10 = scalar_lea.hbm %s8297_s7, 8192 }
 0x5e1   : > { %p6478_p13 = scmp.ne.s32.totalorder %s8241_s20, %s6477_s8  ;;  %p6482_p6 = scmp.lt.u32.totalorder %s8241_s20, %s8297_s7 }
 0x5e2   : > { %p6483_p9 = scmp.lt.u32.totalorder %s6481_s10, %s6477_s8  ;;  %p6485_p10 = scmp.lt.u32.totalorder %s6477_s8, %s8241_s20 }
 0x5e3   : > { %p6479_p5 = pnand %p6478_p13, %p8405_p1 }
 0x5e4   : > { %p6484_p12 = por %p6483_p9, %p6482_p6 }
 0x5e5   : > { %p6480_p0 = pneg %p6479_p5 }
 0x5e6   : > { %p6486_p2 = por %p6485_p10, %p6484_p12 }
 0x5e8   : > { %p6487_p3 = pnand %p6486_p2, %p6480_p0 }
 0x5ea   : > { %6490 = shalt.err (!%p6487_p3)
}
 0x5eb   : > { %s6542_s16 = smov 128   ;;  %s6543_s14 = smov 8  }
 0x5ec   : > { %6347 = dma.vmem_to_hbm [thread:$0]  (%p8405_p1), %s8243_s18, 4096, %s8241_s20, %s8249_s28, %s6542_s16, %s6542_s16, %s6543_s14  }
 0x5ed PF: > { %p6364_p4 = scmp.ge.s32.totalorder %s6533_s27, 2  ;;  %s5144_s17 = sand.u32 1, %s6521_s24  }
 0x5ee   : > { %p8406_p7 = scmp.ne.s32.totalorder %s8344_s12, 0  ;;  %s5145_s21 = scalar_lea.sflag [#allocation8], %s5144_s17 }
 0x5f0   : > { %p6357_p8 = pnand %p6364_p4, %p8406_p7 }
 0x5f2   : > { %6516 = dma.done.wait (!%p6357_p8), %s5145_s21, 4096  }
 0x5f3   : > { %6518 = vsyncadd (!%p6357_p8), %s5145_s21, 4294963200  ;;  %s8407_s22 = sld [smem:[#allocation15_spill]]  ;;  %p19_p11 = scmp.ge.s32.totalorder %s6609_s30, 4  }
 0x5f4   : > { %s8408_s24 = smov %s6525_s25  ;;  %s8409_s25 = smov %s6529_s26 }
 0x5f5   : > { %s8411_s27 = smov %s6609_s30  ;;  %21 = sbr.rel (!%p19_p11) target bundleno = 5 (0x5), region = 97 }
 0x5f9   : > { %s8410_s26 = smov %s8407_s22 }
 0x5fc   :  { %5150 = vsyncpa [#allocation7], 1 }
 0x5fd   :  { %5152 = vsyncpa [#allocation7 + $0x1], 1 }
 0x5fe   :  { %5153 = vsyncpa [#allocation10], 1 }
 0x5ff   :  { %5154 = vsyncpa [#allocation8], 1 }
 0x600   :  { %5156 = vsyncpa [#allocation8 + $0x1], 1 }

</bundles_post_ra>
